<compile_context>
chip_gen: v6e
topology: v6e:2x2x1
jax: 0.10.0
libtpu: 0.0.40
codegen_flags: <defaults>
</compile_context>

<pallas_src>
import functools

import jax
import jax.numpy as jnp
import numpy as np
from jax.experimental import pallas as pl
from jax.experimental.pallas import tpu as pltpu


# ----------------------------------------------------------------------------
# Generic single-block matmul + bias kernel (input projection and fc).
# ----------------------------------------------------------------------------
def _matmul_bias_kernel(x_ref, w_ref, b_ref, o_ref):
    o_ref[...] = (jnp.dot(x_ref[...], w_ref[...],
                          preferred_element_type=jnp.float32)
                  + b_ref[...]).astype(o_ref.dtype)


def matmul_bias(x2d, w, b):
    """x2d: (N, K), w: (K, M), b: (M,) -> (N, M).  One VMEM-resident block."""
    N, K = x2d.shape
    M = w.shape[1]
    return pl.pallas_call(
        _matmul_bias_kernel,
        out_shape=jax.ShapeDtypeStruct((N, M), x2d.dtype),
        grid=(1,),
        in_specs=[
            pl.BlockSpec((N, K), lambda i: (0, 0)),
            pl.BlockSpec((K, M), lambda i: (0, 0)),
            pl.BlockSpec((1, M), lambda i: (0, 0)),
        ],
        out_specs=pl.BlockSpec((N, M), lambda i: (0, 0)),
    )(x2d, w, b.reshape(1, -1))


def linear_fc(x2d, w, b):
    """Final Linear.  w: (C, Fin) torch layout, b: (C,) -> (N, C).

    The output lane dim is padded to a multiple of 128 so the kernel's stores
    are unmasked; the narrow slice back to C columns happens in plain JAX.
    """
    C = w.shape[0]
    c_pad = ((C + 127) // 128) * 128
    w_p = jnp.pad(jnp.transpose(w), ((0, 0), (0, c_pad - C)))
    b_p = jnp.pad(b, (0, c_pad - C))
    out = matmul_bias(x2d, w_p, b_p)          # (N, c_pad)
    return out[:, :C]


# ----------------------------------------------------------------------------
# Fused (bi)directional GRU recurrence kernel: whole sequence in one call.
#
# refs (per direction d, concatenated fwd-then-rev):
#   gi_refs[d]  : (T, 3, B, H)  precomputed x@W_ih + b_ih (+ b_hh for r,z)
#   whh_refs[d] : (3, H, H)     per-gate recurrent weights, already transposed
#   bhn_refs[d] : (B, H)        n-gate recurrent bias, pre-broadcast
#   out_refs[d] : (T, B, H)     per-direction hidden-state outputs
# ----------------------------------------------------------------------------
def _gru_rnn_kernel(*refs, seq_len, num_dir):
    gi_refs = refs[0:num_dir]
    whh_refs = refs[num_dir:2 * num_dir]
    bhn_refs = refs[2 * num_dir:3 * num_dir]
    out_refs = refs[3 * num_dir:4 * num_dir]

    batch = gi_refs[0].shape[2]
    hid = gi_refs[0].shape[3]

    # Hoist all loop-invariant loads out of the recurrence.
    w_r = [whh_refs[d][0] for d in range(num_dir)]
    w_z = [whh_refs[d][1] for d in range(num_dir)]
    w_n = [whh_refs[d][2] for d in range(num_dir)]
    b_n = [bhn_refs[d][...] for d in range(num_dir)]

    def step(t, hs):
        new_hs = []
        for d in range(num_dir):
            # direction 0 walks time forward, direction 1 walks it backward.
            td = t if d == 0 else seq_len - 1 - t
            gi_t = gi_refs[d][td]                      # (3, B, H) gate-major
            h_prev = hs[d]                             # (B, H) f32 (in vregs)

            gh_r = jnp.dot(h_prev, w_r[d], preferred_element_type=jnp.float32)
            gh_z = jnp.dot(h_prev, w_z[d], preferred_element_type=jnp.float32)
            gh_n = jnp.dot(h_prev, w_n[d],
                           preferred_element_type=jnp.float32) + b_n[d]

            r = jax.nn.sigmoid(gi_t[0] + gh_r)
            z = jax.nn.sigmoid(gi_t[1] + gh_z)
            n = jnp.tanh(gi_t[2] + r * gh_n)
            h_new = (1.0 - z) * n + z * h_prev

            out_refs[d][td] = h_new.astype(out_refs[d].dtype)
            new_hs.append(h_new)
        return tuple(new_hs)

    h0 = tuple(jnp.zeros((batch, hid), jnp.float32) for _ in range(num_dir))
    unroll = True if seq_len <= 64 else 8
    jax.lax.fori_loop(0, seq_len, step, h0, unroll=unroll)


def gru_layer_fused(x, dir_params, hidden_size):
    """One (bi)directional GRU layer.  x: (T, B, in) -> (T, B, D*H)."""
    T, B, in_size = x.shape
    D = len(dir_params)
    H = hidden_size

    # ---- Phase 1: hoisted input projection, one matmul for all T, B, D. ----
    # Columns ordered [direction][gate r,z,n].  The r/z parts of b_hh are
    # additive outside any nonlinearity, so they are folded in here too.
    w_cols, b_cols = [], []
    for p in dir_params:
        w_ih, b_ih, b_hh = p["w_ih"], p["b_ih"], p["b_hh"]
        for g in range(3):
            w_cols.append(jnp.transpose(w_ih[g * H:(g + 1) * H, :]))  # (in, H)
            bias = b_ih[g * H:(g + 1) * H]
            if g < 2:                                   # r, z gates only
                bias = bias + b_hh[g * H:(g + 1) * H]
            b_cols.append(bias)
    wih_all = jnp.concatenate(w_cols, axis=1)           # (in, D*3*H)
    bih_all = jnp.concatenate(b_cols)                   # (D*3*H,)

    gi = matmul_bias(x.reshape(T * B, in_size), wih_all, bih_all)
    # (T*B, D*3H) -> (D, T, 3, B, H): gate-major, per-direction slabs.
    gi = gi.reshape(T, B, D, 3, H).transpose(2, 0, 3, 1, 4)
    gi_list = [gi[d] for d in range(D)]                 # each (T, 3, B, H)

    whh_list = [
        jnp.stack([jnp.transpose(p["w_hh"][g * H:(g + 1) * H, :])
                   for g in range(3)])                  # (3, H, H)
        for p in dir_params
    ]
    bhn_list = [
        jnp.broadcast_to(p["b_hh"][2 * H:3 * H][None, :], (B, H))
        for p in dir_params
    ]

    in_specs = (
        [pl.BlockSpec((T, 3, B, H), lambda i: (0, 0, 0, 0))] * D
        + [pl.BlockSpec((3, H, H), lambda i: (0, 0, 0))] * D
        + [pl.BlockSpec((B, H), lambda i: (0, 0))] * D
    )
    out_specs = tuple([pl.BlockSpec((T, B, H), lambda i: (0, 0, 0))] * D)
    out_shape = tuple([jax.ShapeDtypeStruct((T, B, H), x.dtype)] * D)

    outs = pl.pallas_call(
        functools.partial(_gru_rnn_kernel, seq_len=T, num_dir=D),
        out_shape=out_shape,
        grid=(1,),
        in_specs=in_specs,
        out_specs=out_specs,
        compiler_params=pltpu.CompilerParams(
            dimension_semantics=("arbitrary",)),
    )(*gi_list, *whh_list, *bhn_list)

    if D == 1:
        return outs[0]
    return jnp.concatenate(list(outs), axis=-1)         # (T, B, D*H)


# ----------------------------------------------------------------------------
# Full SequencePredictor forward.
# ----------------------------------------------------------------------------
def sequence_predictor_forward(x_img, params, num_layers, bidirectional):
    # _reshape_features: (B, 1, H, W) -> (W, B, H)
    x = jnp.squeeze(x_img, axis=1)
    x = jnp.transpose(x, (2, 0, 1))                     # (T, B, input_size)

    hidden = params["rnn"][0]["w_hh"].shape[1]

    layer_in = x
    for l in range(num_layers):
        p = params["rnn"][l]
        dir_params = [{"w_ih": p["w_ih"], "w_hh": p["w_hh"],
                       "b_ih": p["b_ih"], "b_hh": p["b_hh"]}]
        if bidirectional:
            dir_params.append({"w_ih": p["w_ih_rev"], "w_hh": p["w_hh_rev"],
                               "b_ih": p["b_ih_rev"], "b_hh": p["b_hh_rev"]})
        layer_in = gru_layer_fused(layer_in, dir_params, hidden)
        # TODO(synk): inter-layer GRU dropout is a training-time op (identity
        # in eval); not implemented here.

    T, B, F = layer_in.shape
    logits = linear_fc(layer_in.reshape(T * B, F),
                       params["fc"]["w"], params["fc"]["b"])
    return logits.reshape(T, B, -1)                     # (W, B, num_classes)


# ----------------------------------------------------------------------------
# Pure-JAX reference (lax.scan GRU) for correctness check.
# ----------------------------------------------------------------------------
def _gru_layer_ref(x, w_ih, w_hh, b_ih, b_hh):
    T, B, _ = x.shape
    hid = w_hh.shape[0] // 3

    def step(h, x_t):
        gi = x_t @ w_ih.T + b_ih
        gh = h @ w_hh.T + b_hh
        i_r, i_z, i_n = jnp.split(gi, 3, axis=-1)
        h_r, h_z, h_n = jnp.split(gh, 3, axis=-1)
        r = jax.nn.sigmoid(i_r + h_r)
        z = jax.nn.sigmoid(i_z + h_z)
        n = jnp.tanh(i_n + r * h_n)
        h_new = (1.0 - z) * n + z * h
        return h_new, h_new

    _, ys = jax.lax.scan(step, jnp.zeros((B, hid), x.dtype), x)
    return ys


def _forward_ref(x_img, params, num_layers, bidirectional):
    x = jnp.transpose(jnp.squeeze(x_img, axis=1), (2, 0, 1))
    layer_in = x
    for l in range(num_layers):
        p = params["rnn"][l]
        fwd = _gru_layer_ref(layer_in, p["w_ih"], p["w_hh"], p["b_ih"], p["b_hh"])
        if bidirectional:
            rev = _gru_layer_ref(jnp.flip(layer_in, 0), p["w_ih_rev"],
                                 p["w_hh_rev"], p["b_ih_rev"], p["b_hh_rev"])
            layer_in = jnp.concatenate([fwd, jnp.flip(rev, 0)], axis=-1)
        else:
            layer_in = fwd
    return layer_in @ params["fc"]["w"].T + params["fc"]["b"]


# ----------------------------------------------------------------------------
# Deterministic parameter init (mirrors torch shapes; U(-1/sqrt(H), 1/sqrt(H))).
# ----------------------------------------------------------------------------
def init_params(key, input_size, hidden_size, num_layers, num_classes, bidirectional):
    num_dir = 2 if bidirectional else 1
    k_gru = 1.0 / np.sqrt(hidden_size)
    params = {"rnn": []}

    def u(key, shape, bound):
        return jax.random.uniform(key, shape, jnp.float32, -bound, bound)

    for l in range(num_layers):
        in_sz = input_size if l == 0 else hidden_size * num_dir
        keys = jax.random.split(jax.random.fold_in(key, l), 8)
        layer = {
            "w_ih": u(keys[0], (3 * hidden_size, in_sz), k_gru),
            "w_hh": u(keys[1], (3 * hidden_size, hidden_size), k_gru),
            "b_ih": u(keys[2], (3 * hidden_size,), k_gru),
            "b_hh": u(keys[3], (3 * hidden_size,), k_gru),
        }
        if bidirectional:
            layer.update({
                "w_ih_rev": u(keys[4], (3 * hidden_size, in_sz), k_gru),
                "w_hh_rev": u(keys[5], (3 * hidden_size, hidden_size), k_gru),
                "b_ih_rev": u(keys[6], (3 * hidden_size,), k_gru),
                "b_hh_rev": u(keys[7], (3 * hidden_size,), k_gru),
            })
        params["rnn"].append(layer)

    fc_in = hidden_size * num_dir
    k_fc = 1.0 / np.sqrt(fc_in)
    kw, kb = jax.random.split(jax.random.fold_in(key, 1000))
    params["fc"] = {
        "w": u(kw, (num_classes, fc_in), k_fc),
        "b": u(kb, (num_classes,), k_fc),
    }
    return params


if __name__ == "__main__":
    # Module config
    input_size = 16      # image height H (feature dim fed to the GRU)
    hidden_size = 32
    num_layers = 2
    num_classes = 11
    bidirectional = True

    # Input: (B, C=1, H, W);  W is the sequence length.
    B, H, W = 2, input_size, 8
    key = jax.random.PRNGKey(0)
    k_x, k_p = jax.random.split(key)
    x_img = jax.random.normal(k_x, (B, 1, H, W), dtype=jnp.float32)

    params = init_params(k_p, input_size, hidden_size, num_layers,
                         num_classes, bidirectional)

    fwd_fn = jax.jit(functools.partial(sequence_predictor_forward,
                                       num_layers=num_layers,
                                       bidirectional=bidirectional))
    out = jax.block_until_ready(fwd_fn(x_img, params))

    ref = jax.block_until_ready(
        _forward_ref(x_img, params, num_layers, bidirectional))

    assert out.shape == (W, B, num_classes), out.shape
    np.testing.assert_allclose(np.asarray(out), np.asarray(ref),
                               rtol=1e-4, atol=1e-4)
    print("KERNEL_OK")
</pallas_src>

<mosaic_0001>
module attributes {stable_mosaic.version = 11 : i64} {
  func.func @_matmul_bias_kernel(%arg0: i32, %arg1: memref<16x16xf32, #tpu.memory_space<vmem>>, %arg2: memref<16x192xf32, #tpu.memory_space<vmem>>, %arg3: memref<1x192xf32, #tpu.memory_space<vmem>>, %arg4: memref<16x192xf32, #tpu.memory_space<vmem>>) attributes {dimension_semantics = [#tpu.dimension_semantics<arbitrary>], iteration_bounds = array<i64: 1>, scalar_prefetch = 0 : i64, scratch_operands = 0 : i64, tpu.core_type = #tpu.core_type<tc>, window_params = [{pipeline_mode = #tpu.pipeline_mode<synchronous>, transform_indices = @transform_0, window_bounds = array<i64: 16, 16>}, {pipeline_mode = #tpu.pipeline_mode<synchronous>, transform_indices = @transform_1, window_bounds = array<i64: 16, 192>}, {pipeline_mode = #tpu.pipeline_mode<synchronous>, transform_indices = @transform_2, window_bounds = array<i64: 1, 192>}, {pipeline_mode = #tpu.pipeline_mode<synchronous>, transform_indices = @transform_3, window_bounds = array<i64: 16, 192>}]} {
    %c0 = arith.constant 0 : index
    %c0_0 = arith.constant 0 : index
    %0 = vector.load %arg1[%c0, %c0_0] : memref<16x16xf32, #tpu.memory_space<vmem>>, vector<16x16xf32>
    %c0_1 = arith.constant 0 : index
    %c0_2 = arith.constant 0 : index
    %1 = vector.load %arg2[%c0_1, %c0_2] : memref<16x192xf32, #tpu.memory_space<vmem>>, vector<16x192xf32>
    %cst = arith.constant dense<0.000000e+00> : vector<16x192xf32>
    %2 = tpu.matmul %0, %1, %cst {dimension_numbers = #tpu.dot_dimension_numbers<[1], [0], [0], [1], [0, 0, 1, 1], [], []>} : vector<16x16xf32>, vector<16x192xf32>, vector<16x192xf32> -> vector<16x192xf32>
    %c0_3 = arith.constant 0 : index
    %c0_4 = arith.constant 0 : index
    %3 = vector.load %arg3[%c0_3, %c0_4] : memref<1x192xf32, #tpu.memory_space<vmem>>, vector<1x192xf32>
    %4 = vector.broadcast %3 : vector<1x192xf32> to vector<16x192xf32>
    %5 = arith.addf %2, %4 : vector<16x192xf32>
    %c0_5 = arith.constant 0 : index
    %c0_6 = arith.constant 0 : index
    %6 = vector.load %arg4[%c0_5, %c0_6] : memref<16x192xf32, #tpu.memory_space<vmem>>, vector<16x192xf32>
    tpu.vector_store %arg4[%c0_5, %c0_6], %5 {strides = array<i32>} : memref<16x192xf32, #tpu.memory_space<vmem>>, vector<16x192xf32>,
    return
  }
  func.func @transform_0(%arg0: i32) -> (i32, i32) {
    %c0_i32 = arith.constant 0 : i32
    %c0_i32_0 = arith.constant 0 : i32
    %c0_i32_1 = arith.constant 0 : i32
    return %c0_i32, %c0_i32_0 : i32, i32
  }
  func.func @transform_1(%arg0: i32) -> (i32, i32) {
    %c0_i32 = arith.constant 0 : i32
    %c0_i32_0 = arith.constant 0 : i32
    %c0_i32_1 = arith.constant 0 : i32
    return %c0_i32, %c0_i32_0 : i32, i32
  }
  func.func @transform_2(%arg0: i32) -> (i32, i32) {
    %c0_i32 = arith.constant 0 : i32
    %c0_i32_0 = arith.constant 0 : i32
    %c0_i32_1 = arith.constant 0 : i32
    return %c0_i32, %c0_i32_0 : i32, i32
  }
  func.func @transform_3(%arg0: i32) -> (i32, i32) {
    %c0_i32 = arith.constant 0 : i32
    %c0_i32_0 = arith.constant 0 : i32
    %c0_i32_1 = arith.constant 0 : i32
    return %c0_i32, %c0_i32_0 : i32, i32
  }
}

module attributes {stable_mosaic.version = 11 : i64} {
  func.func @_matmul_bias_kernel(%arg0: i32, %arg1: memref<16x64xf32, #tpu.memory_space<vmem>>, %arg2: memref<64x192xf32, #tpu.memory_space<vmem>>, %arg3: memref<1x192xf32, #tpu.memory_space<vmem>>, %arg4: memref<16x192xf32, #tpu.memory_space<vmem>>) attributes {dimension_semantics = [#tpu.dimension_semantics<arbitrary>], iteration_bounds = array<i64: 1>, scalar_prefetch = 0 : i64, scratch_operands = 0 : i64, tpu.core_type = #tpu.core_type<tc>, window_params = [{pipeline_mode = #tpu.pipeline_mode<synchronous>, transform_indices = @transform_0, window_bounds = array<i64: 16, 64>}, {pipeline_mode = #tpu.pipeline_mode<synchronous>, transform_indices = @transform_1, window_bounds = array<i64: 64, 192>}, {pipeline_mode = #tpu.pipeline_mode<synchronous>, transform_indices = @transform_2, window_bounds = array<i64: 1, 192>}, {pipeline_mode = #tpu.pipeline_mode<synchronous>, transform_indices = @transform_3, window_bounds = array<i64: 16, 192>}]} {
    %c0 = arith.constant 0 : index
    %c0_0 = arith.constant 0 : index
    %0 = vector.load %arg1[%c0, %c0_0] : memref<16x64xf32, #tpu.memory_space<vmem>>, vector<16x64xf32>
    %c0_1 = arith.constant 0 : index
    %c0_2 = arith.constant 0 : index
    %1 = vector.load %arg2[%c0_1, %c0_2] : memref<64x192xf32, #tpu.memory_space<vmem>>, vector<64x192xf32>
    %cst = arith.constant dense<0.000000e+00> : vector<16x192xf32>
    %2 = tpu.matmul %0, %1, %cst {dimension_numbers = #tpu.dot_dimension_numbers<[1], [0], [0], [1], [0, 0, 1, 1], [], []>} : vector<16x64xf32>, vector<64x192xf32>, vector<16x192xf32> -> vector<16x192xf32>
    %c0_3 = arith.constant 0 : index
    %c0_4 = arith.constant 0 : index
    %3 = vector.load %arg3[%c0_3, %c0_4] : memref<1x192xf32, #tpu.memory_space<vmem>>, vector<1x192xf32>
    %4 = vector.broadcast %3 : vector<1x192xf32> to vector<16x192xf32>
    %5 = arith.addf %2, %4 : vector<16x192xf32>
    %c0_5 = arith.constant 0 : index
    %c0_6 = arith.constant 0 : index
    %6 = vector.load %arg4[%c0_5, %c0_6] : memref<16x192xf32, #tpu.memory_space<vmem>>, vector<16x192xf32>
    tpu.vector_store %arg4[%c0_5, %c0_6], %5 {strides = array<i32>} : memref<16x192xf32, #tpu.memory_space<vmem>>, vector<16x192xf32>,
    return
  }
  func.func @transform_0(%arg0: i32) -> (i32, i32) {
    %c0_i32 = arith.constant 0 : i32
    %c0_i32_0 = arith.constant 0 : i32
    %c0_i32_1 = arith.constant 0 : i32
    return %c0_i32, %c0_i32_0 : i32, i32
  }
  func.func @transform_1(%arg0: i32) -> (i32, i32) {
    %c0_i32 = arith.constant 0 : i32
    %c0_i32_0 = arith.constant 0 : i32
    %c0_i32_1 = arith.constant 0 : i32
    return %c0_i32, %c0_i32_0 : i32, i32
  }
  func.func @transform_2(%arg0: i32) -> (i32, i32) {
    %c0_i32 = arith.constant 0 : i32
    %c0_i32_0 = arith.constant 0 : i32
    %c0_i32_1 = arith.constant 0 : i32
    return %c0_i32, %c0_i32_0 : i32, i32
  }
  func.func @transform_3(%arg0: i32) -> (i32, i32) {
    %c0_i32 = arith.constant 0 : i32
    %c0_i32_0 = arith.constant 0 : i32
    %c0_i32_1 = arith.constant 0 : i32
    return %c0_i32, %c0_i32_0 : i32, i32
  }
}

module attributes {stable_mosaic.version = 11 : i64} {
  func.func @_gru_rnn_kernel(%arg0: i32, %arg1: memref<8x3x2x32xf32, #tpu.memory_space<vmem>>, %arg2: memref<8x3x2x32xf32, #tpu.memory_space<vmem>>, %arg3: memref<3x32x32xf32, #tpu.memory_space<vmem>>, %arg4: memref<3x32x32xf32, #tpu.memory_space<vmem>>, %arg5: memref<2x32xf32, #tpu.memory_space<vmem>>, %arg6: memref<2x32xf32, #tpu.memory_space<vmem>>, %arg7: memref<8x2x32xf32, #tpu.memory_space<vmem>>, %arg8: memref<8x2x32xf32, #tpu.memory_space<vmem>>) attributes {dimension_semantics = [#tpu.dimension_semantics<arbitrary>], iteration_bounds = array<i64: 1>, scalar_prefetch = 0 : i64, scratch_operands = 0 : i64, tpu.core_type = #tpu.core_type<tc>, window_params = [{pipeline_mode = #tpu.pipeline_mode<synchronous>, transform_indices = @transform_0, window_bounds = array<i64: 8, 3, 2, 32>}, {pipeline_mode = #tpu.pipeline_mode<synchronous>, transform_indices = @transform_1, window_bounds = array<i64: 8, 3, 2, 32>}, {pipeline_mode = #tpu.pipeline_mode<synchronous>, transform_indices = @transform_2, window_bounds = array<i64: 3, 32, 32>}, {pipeline_mode = #tpu.pipeline_mode<synchronous>, transform_indices = @transform_3, window_bounds = array<i64: 3, 32, 32>}, {pipeline_mode = #tpu.pipeline_mode<synchronous>, transform_indices = @transform_4, window_bounds = array<i64: 2, 32>}, {pipeline_mode = #tpu.pipeline_mode<synchronous>, transform_indices = @transform_5, window_bounds = array<i64: 2, 32>}, {pipeline_mode = #tpu.pipeline_mode<synchronous>, transform_indices = @transform_6, window_bounds = array<i64: 8, 2, 32>}, {pipeline_mode = #tpu.pipeline_mode<synchronous>, transform_indices = @transform_7, window_bounds = array<i64: 8, 2, 32>}]} {
    %c0 = arith.constant 0 : index
    %c0_0 = arith.constant 0 : index
    %c0_1 = arith.constant 0 : index
    %0 = vector.load %arg3[%c0, %c0_0, %c0_1] : memref<3x32x32xf32, #tpu.memory_space<vmem>>, vector<1x32x32xf32>
    %1 = vector.shape_cast %0 : vector<1x32x32xf32> to vector<32x32xf32>
    %c0_2 = arith.constant 0 : index
    %c0_3 = arith.constant 0 : index
    %c0_4 = arith.constant 0 : index
    %2 = vector.load %arg4[%c0_2, %c0_3, %c0_4] : memref<3x32x32xf32, #tpu.memory_space<vmem>>, vector<1x32x32xf32>
    %3 = vector.shape_cast %2 : vector<1x32x32xf32> to vector<32x32xf32>
    %c1 = arith.constant 1 : index
    %c0_5 = arith.constant 0 : index
    %c0_6 = arith.constant 0 : index
    %4 = vector.load %arg3[%c1, %c0_5, %c0_6] : memref<3x32x32xf32, #tpu.memory_space<vmem>>, vector<1x32x32xf32>
    %5 = vector.shape_cast %4 : vector<1x32x32xf32> to vector<32x32xf32>
    %c1_7 = arith.constant 1 : index
    %c0_8 = arith.constant 0 : index
    %c0_9 = arith.constant 0 : index
    %6 = vector.load %arg4[%c1_7, %c0_8, %c0_9] : memref<3x32x32xf32, #tpu.memory_space<vmem>>, vector<1x32x32xf32>
    %7 = vector.shape_cast %6 : vector<1x32x32xf32> to vector<32x32xf32>
    %c2 = arith.constant 2 : index
    %c0_10 = arith.constant 0 : index
    %c0_11 = arith.constant 0 : index
    %8 = vector.load %arg3[%c2, %c0_10, %c0_11] : memref<3x32x32xf32, #tpu.memory_space<vmem>>, vector<1x32x32xf32>
    %9 = vector.shape_cast %8 : vector<1x32x32xf32> to vector<32x32xf32>
    %c2_12 = arith.constant 2 : index
    %c0_13 = arith.constant 0 : index
    %c0_14 = arith.constant 0 : index
    %10 = vector.load %arg4[%c2_12, %c0_13, %c0_14] : memref<3x32x32xf32, #tpu.memory_space<vmem>>, vector<1x32x32xf32>
    %11 = vector.shape_cast %10 : vector<1x32x32xf32> to vector<32x32xf32>
    %c0_15 = arith.constant 0 : index
    %c0_16 = arith.constant 0 : index
    %12 = vector.load %arg5[%c0_15, %c0_16] : memref<2x32xf32, #tpu.memory_space<vmem>>, vector<2x32xf32>
    %c0_17 = arith.constant 0 : index
    %c0_18 = arith.constant 0 : index
    %13 = vector.load %arg6[%c0_17, %c0_18] : memref<2x32xf32, #tpu.memory_space<vmem>>, vector<2x32xf32>
    %cst = arith.constant 0.000000e+00 : f32
    %14 = vector.broadcast %cst : f32 to vector<2x32xf32>
    %cst_19 = arith.constant 0.000000e+00 : f32
    %15 = vector.broadcast %cst_19 : f32 to vector<2x32xf32>
    %c0_i32 = arith.constant 0 : i32
    %16 = arith.index_cast %c0_i32 : i32 to index
    %c0_20 = arith.constant 0 : index
    %c0_21 = arith.constant 0 : index
    %c0_22 = arith.constant 0 : index
    %17 = vector.load %arg1[%16, %c0_20, %c0_21, %c0_22] : memref<8x3x2x32xf32, #tpu.memory_space<vmem>>, vector<1x3x2x32xf32>
    %18 = vector.shape_cast %17 : vector<1x3x2x32xf32> to vector<3x2x32xf32>
    %cst_23 = arith.constant dense<0.000000e+00> : vector<2x32xf32>
    %19 = tpu.matmul %14, %1, %cst_23 {dimension_numbers = #tpu.dot_dimension_numbers<[1], [0], [0], [1], [0, 0, 1, 1], [], []>} : vector<2x32xf32>, vector<32x32xf32>, vector<2x32xf32> -> vector<2x32xf32>
    %cst_24 = arith.constant dense<0.000000e+00> : vector<2x32xf32>
    %20 = tpu.matmul %14, %5, %cst_24 {dimension_numbers = #tpu.dot_dimension_numbers<[1], [0], [0], [1], [0, 0, 1, 1], [], []>} : vector<2x32xf32>, vector<32x32xf32>, vector<2x32xf32> -> vector<2x32xf32>
    %cst_25 = arith.constant dense<0.000000e+00> : vector<2x32xf32>
    %21 = tpu.matmul %14, %9, %cst_25 {dimension_numbers = #tpu.dot_dimension_numbers<[1], [0], [0], [1], [0, 0, 1, 1], [], []>} : vector<2x32xf32>, vector<32x32xf32>, vector<2x32xf32> -> vector<2x32xf32>
    %22 = arith.addf %21, %12 : vector<2x32xf32>
    %23 = vector.extract_strided_slice %18 {offsets = [0, 0, 0], sizes = [1, 2, 32], strides = [1, 1, 1]} : vector<3x2x32xf32> to vector<1x2x32xf32>
    %24 = vector.shape_cast %23 : vector<1x2x32xf32> to vector<2x32xf32>
    %25 = arith.addf %24, %19 : vector<2x32xf32>
    %26 = arith.negf %25 : vector<2x32xf32>
    %27 = math.exp %26 : vector<2x32xf32>
    %cst_26 = arith.constant 1.000000e+00 : f32
    %28 = vector.broadcast %cst_26 : f32 to vector<2x32xf32>
    %29 = arith.addf %28, %27 : vector<2x32xf32>
    %30 = arith.divf %28, %29 : vector<2x32xf32>
    %31 = vector.extract_strided_slice %18 {offsets = [1, 0, 0], sizes = [1, 2, 32], strides = [1, 1, 1]} : vector<3x2x32xf32> to vector<1x2x32xf32>
    %32 = vector.shape_cast %31 : vector<1x2x32xf32> to vector<2x32xf32>
    %33 = arith.addf %32, %20 : vector<2x32xf32>
    %34 = arith.negf %33 : vector<2x32xf32>
    %35 = math.exp %34 : vector<2x32xf32>
    %cst_27 = arith.constant 1.000000e+00 : f32
    %36 = vector.broadcast %cst_27 : f32 to vector<2x32xf32>
    %37 = arith.addf %36, %35 : vector<2x32xf32>
    %38 = arith.divf %36, %37 : vector<2x32xf32>
    %39 = vector.extract_strided_slice %18 {offsets = [2, 0, 0], sizes = [1, 2, 32], strides = [1, 1, 1]} : vector<3x2x32xf32> to vector<1x2x32xf32>
    %40 = vector.shape_cast %39 : vector<1x2x32xf32> to vector<2x32xf32>
    %41 = arith.mulf %30, %22 : vector<2x32xf32>
    %42 = arith.addf %40, %41 : vector<2x32xf32>
    %43 = math.tanh %42 : vector<2x32xf32>
    %cst_28 = arith.constant 1.000000e+00 : f32
    %44 = vector.broadcast %cst_28 : f32 to vector<2x32xf32>
    %45 = arith.subf %44, %38 : vector<2x32xf32>
    %46 = arith.mulf %45, %43 : vector<2x32xf32>
    %47 = arith.mulf %38, %14 : vector<2x32xf32>
    %48 = arith.addf %46, %47 : vector<2x32xf32>
    %49 = arith.index_cast %c0_i32 : i32 to index
    %c0_29 = arith.constant 0 : index
    %c0_30 = arith.constant 0 : index
    %50 = vector.load %arg7[%49, %c0_29, %c0_30] : memref<8x2x32xf32, #tpu.memory_space<vmem>>, vector<1x2x32xf32>
    %51 = vector.shape_cast %50 : vector<1x2x32xf32> to vector<2x32xf32>
    %52 = vector.shape_cast %48 : vector<2x32xf32> to vector<1x2x32xf32>
    tpu.vector_store %arg7[%49, %c0_29, %c0_30], %52 {strides = array<i32>} : memref<8x2x32xf32, #tpu.memory_space<vmem>>, vector<1x2x32xf32>,
    %c7_i32 = arith.constant 7 : i32
    %53 = arith.subi %c7_i32, %c0_i32 : i32
    %54 = arith.index_cast %53 : i32 to index
    %c0_31 = arith.constant 0 : index
    %c0_32 = arith.constant 0 : index
    %c0_33 = arith.constant 0 : index
    %55 = vector.load %arg2[%54, %c0_31, %c0_32, %c0_33] : memref<8x3x2x32xf32, #tpu.memory_space<vmem>>, vector<1x3x2x32xf32>
    %56 = vector.shape_cast %55 : vector<1x3x2x32xf32> to vector<3x2x32xf32>
    %cst_34 = arith.constant dense<0.000000e+00> : vector<2x32xf32>
    %57 = tpu.matmul %15, %3, %cst_34 {dimension_numbers = #tpu.dot_dimension_numbers<[1], [0], [0], [1], [0, 0, 1, 1], [], []>} : vector<2x32xf32>, vector<32x32xf32>, vector<2x32xf32> -> vector<2x32xf32>
    %cst_35 = arith.constant dense<0.000000e+00> : vector<2x32xf32>
    %58 = tpu.matmul %15, %7, %cst_35 {dimension_numbers = #tpu.dot_dimension_numbers<[1], [0], [0], [1], [0, 0, 1, 1], [], []>} : vector<2x32xf32>, vector<32x32xf32>, vector<2x32xf32> -> vector<2x32xf32>
    %cst_36 = arith.constant dense<0.000000e+00> : vector<2x32xf32>
    %59 = tpu.matmul %15, %11, %cst_36 {dimension_numbers = #tpu.dot_dimension_numbers<[1], [0], [0], [1], [0, 0, 1, 1], [], []>} : vector<2x32xf32>, vector<32x32xf32>, vector<2x32xf32> -> vector<2x32xf32>
    %60 = arith.addf %59, %13 : vector<2x32xf32>
    %61 = vector.extract_strided_slice %56 {offsets = [0, 0, 0], sizes = [1, 2, 32], strides = [1, 1, 1]} : vector<3x2x32xf32> to vector<1x2x32xf32>
    %62 = vector.shape_cast %61 : vector<1x2x32xf32> to vector<2x32xf32>
    %63 = arith.addf %62, %57 : vector<2x32xf32>
    %64 = arith.negf %63 : vector<2x32xf32>
    %65 = math.exp %64 : vector<2x32xf32>
    %cst_37 = arith.constant 1.000000e+00 : f32
    %66 = vector.broadcast %cst_37 : f32 to vector<2x32xf32>
    %67 = arith.addf %66, %65 : vector<2x32xf32>
    %68 = arith.divf %66, %67 : vector<2x32xf32>
    %69 = vector.extract_strided_slice %56 {offsets = [1, 0, 0], sizes = [1, 2, 32], strides = [1, 1, 1]} : vector<3x2x32xf32> to vector<1x2x32xf32>
    %70 = vector.shape_cast %69 : vector<1x2x32xf32> to vector<2x32xf32>
    %71 = arith.addf %70, %58 : vector<2x32xf32>
    %72 = arith.negf %71 : vector<2x32xf32>
    %73 = math.exp %72 : vector<2x32xf32>
    %cst_38 = arith.constant 1.000000e+00 : f32
    %74 = vector.broadcast %cst_38 : f32 to vector<2x32xf32>
    %75 = arith.addf %74, %73 : vector<2x32xf32>
    %76 = arith.divf %74, %75 : vector<2x32xf32>
    %77 = vector.extract_strided_slice %56 {offsets = [2, 0, 0], sizes = [1, 2, 32], strides = [1, 1, 1]} : vector<3x2x32xf32> to vector<1x2x32xf32>
    %78 = vector.shape_cast %77 : vector<1x2x32xf32> to vector<2x32xf32>
    %79 = arith.mulf %68, %60 : vector<2x32xf32>
    %80 = arith.addf %78, %79 : vector<2x32xf32>
    %81 = math.tanh %80 : vector<2x32xf32>
    %cst_39 = arith.constant 1.000000e+00 : f32
    %82 = vector.broadcast %cst_39 : f32 to vector<2x32xf32>
    %83 = arith.subf %82, %76 : vector<2x32xf32>
    %84 = arith.mulf %83, %81 : vector<2x32xf32>
    %85 = arith.mulf %76, %15 : vector<2x32xf32>
    %86 = arith.addf %84, %85 : vector<2x32xf32>
    %87 = arith.index_cast %53 : i32 to index
    %c0_40 = arith.constant 0 : index
    %c0_41 = arith.constant 0 : index
    %88 = vector.load %arg8[%87, %c0_40, %c0_41] : memref<8x2x32xf32, #tpu.memory_space<vmem>>, vector<1x2x32xf32>
    %89 = vector.shape_cast %88 : vector<1x2x32xf32> to vector<2x32xf32>
    %90 = vector.shape_cast %86 : vector<2x32xf32> to vector<1x2x32xf32>
    tpu.vector_store %arg8[%87, %c0_40, %c0_41], %90 {strides = array<i32>} : memref<8x2x32xf32, #tpu.memory_space<vmem>>, vector<1x2x32xf32>,
    %c1_i32 = arith.constant 1 : i32
    %91 = arith.index_cast %c1_i32 : i32 to index
    %c0_42 = arith.constant 0 : index
    %c0_43 = arith.constant 0 : index
    %c0_44 = arith.constant 0 : index
    %92 = vector.load %arg1[%91, %c0_42, %c0_43, %c0_44] : memref<8x3x2x32xf32, #tpu.memory_space<vmem>>, vector<1x3x2x32xf32>
    %93 = vector.shape_cast %92 : vector<1x3x2x32xf32> to vector<3x2x32xf32>
    %cst_45 = arith.constant dense<0.000000e+00> : vector<2x32xf32>
    %94 = tpu.matmul %48, %1, %cst_45 {dimension_numbers = #tpu.dot_dimension_numbers<[1], [0], [0], [1], [0, 0, 1, 1], [], []>} : vector<2x32xf32>, vector<32x32xf32>, vector<2x32xf32> -> vector<2x32xf32>
    %cst_46 = arith.constant dense<0.000000e+00> : vector<2x32xf32>
    %95 = tpu.matmul %48, %5, %cst_46 {dimension_numbers = #tpu.dot_dimension_numbers<[1], [0], [0], [1], [0, 0, 1, 1], [], []>} : vector<2x32xf32>, vector<32x32xf32>, vector<2x32xf32> -> vector<2x32xf32>
    %cst_47 = arith.constant dense<0.000000e+00> : vector<2x32xf32>
    %96 = tpu.matmul %48, %9, %cst_47 {dimension_numbers = #tpu.dot_dimension_numbers<[1], [0], [0], [1], [0, 0, 1, 1], [], []>} : vector<2x32xf32>, vector<32x32xf32>, vector<2x32xf32> -> vector<2x32xf32>
    %97 = arith.addf %96, %12 : vector<2x32xf32>
    %98 = vector.extract_strided_slice %93 {offsets = [0, 0, 0], sizes = [1, 2, 32], strides = [1, 1, 1]} : vector<3x2x32xf32> to vector<1x2x32xf32>
    %99 = vector.shape_cast %98 : vector<1x2x32xf32> to vector<2x32xf32>
    %100 = arith.addf %99, %94 : vector<2x32xf32>
    %101 = arith.negf %100 : vector<2x32xf32>
    %102 = math.exp %101 : vector<2x32xf32>
    %cst_48 = arith.constant 1.000000e+00 : f32
    %103 = vector.broadcast %cst_48 : f32 to vector<2x32xf32>
    %104 = arith.addf %103, %102 : vector<2x32xf32>
    %105 = arith.divf %103, %104 : vector<2x32xf32>
    %106 = vector.extract_strided_slice %93 {offsets = [1, 0, 0], sizes = [1, 2, 32], strides = [1, 1, 1]} : vector<3x2x32xf32> to vector<1x2x32xf32>
    %107 = vector.shape_cast %106 : vector<1x2x32xf32> to vector<2x32xf32>
    %108 = arith.addf %107, %95 : vector<2x32xf32>
    %109 = arith.negf %108 : vector<2x32xf32>
    %110 = math.exp %109 : vector<2x32xf32>
    %cst_49 = arith.constant 1.000000e+00 : f32
    %111 = vector.broadcast %cst_49 : f32 to vector<2x32xf32>
    %112 = arith.addf %111, %110 : vector<2x32xf32>
    %113 = arith.divf %111, %112 : vector<2x32xf32>
    %114 = vector.extract_strided_slice %93 {offsets = [2, 0, 0], sizes = [1, 2, 32], strides = [1, 1, 1]} : vector<3x2x32xf32> to vector<1x2x32xf32>
    %115 = vector.shape_cast %114 : vector<1x2x32xf32> to vector<2x32xf32>
    %116 = arith.mulf %105, %97 : vector<2x32xf32>
    %117 = arith.addf %115, %116 : vector<2x32xf32>
    %118 = math.tanh %117 : vector<2x32xf32>
    %cst_50 = arith.constant 1.000000e+00 : f32
    %119 = vector.broadcast %cst_50 : f32 to vector<2x32xf32>
    %120 = arith.subf %119, %113 : vector<2x32xf32>
    %121 = arith.mulf %120, %118 : vector<2x32xf32>
    %122 = arith.mulf %113, %48 : vector<2x32xf32>
    %123 = arith.addf %121, %122 : vector<2x32xf32>
    %124 = arith.index_cast %c1_i32 : i32 to index
    %c0_51 = arith.constant 0 : index
    %c0_52 = arith.constant 0 : index
    %125 = vector.load %arg7[%124, %c0_51, %c0_52] : memref<8x2x32xf32, #tpu.memory_space<vmem>>, vector<1x2x32xf32>
    %126 = vector.shape_cast %125 : vector<1x2x32xf32> to vector<2x32xf32>
    %127 = vector.shape_cast %123 : vector<2x32xf32> to vector<1x2x32xf32>
    tpu.vector_store %arg7[%124, %c0_51, %c0_52], %127 {strides = array<i32>} : memref<8x2x32xf32, #tpu.memory_space<vmem>>, vector<1x2x32xf32>,
    %c7_i32_53 = arith.constant 7 : i32
    %128 = arith.subi %c7_i32_53, %c1_i32 : i32
    %129 = arith.index_cast %128 : i32 to index
    %c0_54 = arith.constant 0 : index
    %c0_55 = arith.constant 0 : index
    %c0_56 = arith.constant 0 : index
    %130 = vector.load %arg2[%129, %c0_54, %c0_55, %c0_56] : memref<8x3x2x32xf32, #tpu.memory_space<vmem>>, vector<1x3x2x32xf32>
    %131 = vector.shape_cast %130 : vector<1x3x2x32xf32> to vector<3x2x32xf32>
    %cst_57 = arith.constant dense<0.000000e+00> : vector<2x32xf32>
    %132 = tpu.matmul %86, %3, %cst_57 {dimension_numbers = #tpu.dot_dimension_numbers<[1], [0], [0], [1], [0, 0, 1, 1], [], []>} : vector<2x32xf32>, vector<32x32xf32>, vector<2x32xf32> -> vector<2x32xf32>
    %cst_58 = arith.constant dense<0.000000e+00> : vector<2x32xf32>
    %133 = tpu.matmul %86, %7, %cst_58 {dimension_numbers = #tpu.dot_dimension_numbers<[1], [0], [0], [1], [0, 0, 1, 1], [], []>} : vector<2x32xf32>, vector<32x32xf32>, vector<2x32xf32> -> vector<2x32xf32>
    %cst_59 = arith.constant dense<0.000000e+00> : vector<2x32xf32>
    %134 = tpu.matmul %86, %11, %cst_59 {dimension_numbers = #tpu.dot_dimension_numbers<[1], [0], [0], [1], [0, 0, 1, 1], [], []>} : vector<2x32xf32>, vector<32x32xf32>, vector<2x32xf32> -> vector<2x32xf32>
    %135 = arith.addf %134, %13 : vector<2x32xf32>
    %136 = vector.extract_strided_slice %131 {offsets = [0, 0, 0], sizes = [1, 2, 32], strides = [1, 1, 1]} : vector<3x2x32xf32> to vector<1x2x32xf32>
    %137 = vector.shape_cast %136 : vector<1x2x32xf32> to vector<2x32xf32>
    %138 = arith.addf %137, %132 : vector<2x32xf32>
    %139 = arith.negf %138 : vector<2x32xf32>
    %140 = math.exp %139 : vector<2x32xf32>
    %cst_60 = arith.constant 1.000000e+00 : f32
    %141 = vector.broadcast %cst_60 : f32 to vector<2x32xf32>
    %142 = arith.addf %141, %140 : vector<2x32xf32>
    %143 = arith.divf %141, %142 : vector<2x32xf32>
    %144 = vector.extract_strided_slice %131 {offsets = [1, 0, 0], sizes = [1, 2, 32], strides = [1, 1, 1]} : vector<3x2x32xf32> to vector<1x2x32xf32>
    %145 = vector.shape_cast %144 : vector<1x2x32xf32> to vector<2x32xf32>
    %146 = arith.addf %145, %133 : vector<2x32xf32>
    %147 = arith.negf %146 : vector<2x32xf32>
    %148 = math.exp %147 : vector<2x32xf32>
    %cst_61 = arith.constant 1.000000e+00 : f32
    %149 = vector.broadcast %cst_61 : f32 to vector<2x32xf32>
    %150 = arith.addf %149, %148 : vector<2x32xf32>
    %151 = arith.divf %149, %150 : vector<2x32xf32>
    %152 = vector.extract_strided_slice %131 {offsets = [2, 0, 0], sizes = [1, 2, 32], strides = [1, 1, 1]} : vector<3x2x32xf32> to vector<1x2x32xf32>
    %153 = vector.shape_cast %152 : vector<1x2x32xf32> to vector<2x32xf32>
    %154 = arith.mulf %143, %135 : vector<2x32xf32>
    %155 = arith.addf %153, %154 : vector<2x32xf32>
    %156 = math.tanh %155 : vector<2x32xf32>
    %cst_62 = arith.constant 1.000000e+00 : f32
    %157 = vector.broadcast %cst_62 : f32 to vector<2x32xf32>
    %158 = arith.subf %157, %151 : vector<2x32xf32>
    %159 = arith.mulf %158, %156 : vector<2x32xf32>
    %160 = arith.mulf %151, %86 : vector<2x32xf32>
    %161 = arith.addf %159, %160 : vector<2x32xf32>
    %162 = arith.index_cast %128 : i32 to index
    %c0_63 = arith.constant 0 : index
    %c0_64 = arith.constant 0 : index
    %163 = vector.load %arg8[%162, %c0_63, %c0_64] : memref<8x2x32xf32, #tpu.memory_space<vmem>>, vector<1x2x32xf32>
    %164 = vector.shape_cast %163 : vector<1x2x32xf32> to vector<2x32xf32>
    %165 = vector.shape_cast %161 : vector<2x32xf32> to vector<1x2x32xf32>
    tpu.vector_store %arg8[%162, %c0_63, %c0_64], %165 {strides = array<i32>} : memref<8x2x32xf32, #tpu.memory_space<vmem>>, vector<1x2x32xf32>,
    %c2_i32 = arith.constant 2 : i32
    %166 = arith.index_cast %c2_i32 : i32 to index
    %c0_65 = arith.constant 0 : index
    %c0_66 = arith.constant 0 : index
    %c0_67 = arith.constant 0 : index
    %167 = vector.load %arg1[%166, %c0_65, %c0_66, %c0_67] : memref<8x3x2x32xf32, #tpu.memory_space<vmem>>, vector<1x3x2x32xf32>
    %168 = vector.shape_cast %167 : vector<1x3x2x32xf32> to vector<3x2x32xf32>
    %cst_68 = arith.constant dense<0.000000e+00> : vector<2x32xf32>
    %169 = tpu.matmul %123, %1, %cst_68 {dimension_numbers = #tpu.dot_dimension_numbers<[1], [0], [0], [1], [0, 0, 1, 1], [], []>} : vector<2x32xf32>, vector<32x32xf32>, vector<2x32xf32> -> vector<2x32xf32>
    %cst_69 = arith.constant dense<0.000000e+00> : vector<2x32xf32>
    %170 = tpu.matmul %123, %5, %cst_69 {dimension_numbers = #tpu.dot_dimension_numbers<[1], [0], [0], [1], [0, 0, 1, 1], [], []>} : vector<2x32xf32>, vector<32x32xf32>, vector<2x32xf32> -> vector<2x32xf32>
    %cst_70 = arith.constant dense<0.000000e+00> : vector<2x32xf32>
    %171 = tpu.matmul %123, %9, %cst_70 {dimension_numbers = #tpu.dot_dimension_numbers<[1], [0], [0], [1], [0, 0, 1, 1], [], []>} : vector<2x32xf32>, vector<32x32xf32>, vector<2x32xf32> -> vector<2x32xf32>
    %172 = arith.addf %171, %12 : vector<2x32xf32>
    %173 = vector.extract_strided_slice %168 {offsets = [0, 0, 0], sizes = [1, 2, 32], strides = [1, 1, 1]} : vector<3x2x32xf32> to vector<1x2x32xf32>
    %174 = vector.shape_cast %173 : vector<1x2x32xf32> to vector<2x32xf32>
    %175 = arith.addf %174, %169 : vector<2x32xf32>
    %176 = arith.negf %175 : vector<2x32xf32>
    %177 = math.exp %176 : vector<2x32xf32>
    %cst_71 = arith.constant 1.000000e+00 : f32
    %178 = vector.broadcast %cst_71 : f32 to vector<2x32xf32>
    %179 = arith.addf %178, %177 : vector<2x32xf32>
    %180 = arith.divf %178, %179 : vector<2x32xf32>
    %181 = vector.extract_strided_slice %168 {offsets = [1, 0, 0], sizes = [1, 2, 32], strides = [1, 1, 1]} : vector<3x2x32xf32> to vector<1x2x32xf32>
    %182 = vector.shape_cast %181 : vector<1x2x32xf32> to vector<2x32xf32>
    %183 = arith.addf %182, %170 : vector<2x32xf32>
    %184 = arith.negf %183 : vector<2x32xf32>
    %185 = math.exp %184 : vector<2x32xf32>
    %cst_72 = arith.constant 1.000000e+00 : f32
    %186 = vector.broadcast %cst_72 : f32 to vector<2x32xf32>
    %187 = arith.addf %186, %185 : vector<2x32xf32>
    %188 = arith.divf %186, %187 : vector<2x32xf32>
    %189 = vector.extract_strided_slice %168 {offsets = [2, 0, 0], sizes = [1, 2, 32], strides = [1, 1, 1]} : vector<3x2x32xf32> to vector<1x2x32xf32>
    %190 = vector.shape_cast %189 : vector<1x2x32xf32> to vector<2x32xf32>
    %191 = arith.mulf %180, %172 : vector<2x32xf32>
    %192 = arith.addf %190, %191 : vector<2x32xf32>
    %193 = math.tanh %192 : vector<2x32xf32>
    %cst_73 = arith.constant 1.000000e+00 : f32
    %194 = vector.broadcast %cst_73 : f32 to vector<2x32xf32>
    %195 = arith.subf %194, %188 : vector<2x32xf32>
    %196 = arith.mulf %195, %193 : vector<2x32xf32>
    %197 = arith.mulf %188, %123 : vector<2x32xf32>
    %198 = arith.addf %196, %197 : vector<2x32xf32>
    %199 = arith.index_cast %c2_i32 : i32 to index
    %c0_74 = arith.constant 0 : index
    %c0_75 = arith.constant 0 : index
    %200 = vector.load %arg7[%199, %c0_74, %c0_75] : memref<8x2x32xf32, #tpu.memory_space<vmem>>, vector<1x2x32xf32>
    %201 = vector.shape_cast %200 : vector<1x2x32xf32> to vector<2x32xf32>
    %202 = vector.shape_cast %198 : vector<2x32xf32> to vector<1x2x32xf32>
    tpu.vector_store %arg7[%199, %c0_74, %c0_75], %202 {strides = array<i32>} : memref<8x2x32xf32, #tpu.memory_space<vmem>>, vector<1x2x32xf32>,
    %c7_i32_76 = arith.constant 7 : i32
    %203 = arith.subi %c7_i32_76, %c2_i32 : i32
    %204 = arith.index_cast %203 : i32 to index
    %c0_77 = arith.constant 0 : index
    %c0_78 = arith.constant 0 : index
    %c0_79 = arith.constant 0 : index
    %205 = vector.load %arg2[%204, %c0_77, %c0_78, %c0_79] : memref<8x3x2x32xf32, #tpu.memory_space<vmem>>, vector<1x3x2x32xf32>
    %206 = vector.shape_cast %205 : vector<1x3x2x32xf32> to vector<3x2x32xf32>
    %cst_80 = arith.constant dense<0.000000e+00> : vector<2x32xf32>
    %207 = tpu.matmul %161, %3, %cst_80 {dimension_numbers = #tpu.dot_dimension_numbers<[1], [0], [0], [1], [0, 0, 1, 1], [], []>} : vector<2x32xf32>, vector<32x32xf32>, vector<2x32xf32> -> vector<2x32xf32>
    %cst_81 = arith.constant dense<0.000000e+00> : vector<2x32xf32>
    %208 = tpu.matmul %161, %7, %cst_81 {dimension_numbers = #tpu.dot_dimension_numbers<[1], [0], [0], [1], [0, 0, 1, 1], [], []>} : vector<2x32xf32>, vector<32x32xf32>, vector<2x32xf32> -> vector<2x32xf32>
    %cst_82 = arith.constant dense<0.000000e+00> : vector<2x32xf32>
    %209 = tpu.matmul %161, %11, %cst_82 {dimension_numbers = #tpu.dot_dimension_numbers<[1], [0], [0], [1], [0, 0, 1, 1], [], []>} : vector<2x32xf32>, vector<32x32xf32>, vector<2x32xf32> -> vector<2x32xf32>
    %210 = arith.addf %209, %13 : vector<2x32xf32>
    %211 = vector.extract_strided_slice %206 {offsets = [0, 0, 0], sizes = [1, 2, 32], strides = [1, 1, 1]} : vector<3x2x32xf32> to vector<1x2x32xf32>
    %212 = vector.shape_cast %211 : vector<1x2x32xf32> to vector<2x32xf32>
    %213 = arith.addf %212, %207 : vector<2x32xf32>
    %214 = arith.negf %213 : vector<2x32xf32>
    %215 = math.exp %214 : vector<2x32xf32>
    %cst_83 = arith.constant 1.000000e+00 : f32
    %216 = vector.broadcast %cst_83 : f32 to vector<2x32xf32>
    %217 = arith.addf %216, %215 : vector<2x32xf32>
    %218 = arith.divf %216, %217 : vector<2x32xf32>
    %219 = vector.extract_strided_slice %206 {offsets = [1, 0, 0], sizes = [1, 2, 32], strides = [1, 1, 1]} : vector<3x2x32xf32> to vector<1x2x32xf32>
    %220 = vector.shape_cast %219 : vector<1x2x32xf32> to vector<2x32xf32>
    %221 = arith.addf %220, %208 : vector<2x32xf32>
    %222 = arith.negf %221 : vector<2x32xf32>
    %223 = math.exp %222 : vector<2x32xf32>
    %cst_84 = arith.constant 1.000000e+00 : f32
    %224 = vector.broadcast %cst_84 : f32 to vector<2x32xf32>
    %225 = arith.addf %224, %223 : vector<2x32xf32>
    %226 = arith.divf %224, %225 : vector<2x32xf32>
    %227 = vector.extract_strided_slice %206 {offsets = [2, 0, 0], sizes = [1, 2, 32], strides = [1, 1, 1]} : vector<3x2x32xf32> to vector<1x2x32xf32>
    %228 = vector.shape_cast %227 : vector<1x2x32xf32> to vector<2x32xf32>
    %229 = arith.mulf %218, %210 : vector<2x32xf32>
    %230 = arith.addf %228, %229 : vector<2x32xf32>
    %231 = math.tanh %230 : vector<2x32xf32>
    %cst_85 = arith.constant 1.000000e+00 : f32
    %232 = vector.broadcast %cst_85 : f32 to vector<2x32xf32>
    %233 = arith.subf %232, %226 : vector<2x32xf32>
    %234 = arith.mulf %233, %231 : vector<2x32xf32>
    %235 = arith.mulf %226, %161 : vector<2x32xf32>
    %236 = arith.addf %234, %235 : vector<2x32xf32>
    %237 = arith.index_cast %203 : i32 to index
    %c0_86 = arith.constant 0 : index
    %c0_87 = arith.constant 0 : index
    %238 = vector.load %arg8[%237, %c0_86, %c0_87] : memref<8x2x32xf32, #tpu.memory_space<vmem>>, vector<1x2x32xf32>
    %239 = vector.shape_cast %238 : vector<1x2x32xf32> to vector<2x32xf32>
    %240 = vector.shape_cast %236 : vector<2x32xf32> to vector<1x2x32xf32>
    tpu.vector_store %arg8[%237, %c0_86, %c0_87], %240 {strides = array<i32>} : memref<8x2x32xf32, #tpu.memory_space<vmem>>, vector<1x2x32xf32>,
    %c3_i32 = arith.constant 3 : i32
    %241 = arith.index_cast %c3_i32 : i32 to index
    %c0_88 = arith.constant 0 : index
    %c0_89 = arith.constant 0 : index
    %c0_90 = arith.constant 0 : index
    %242 = vector.load %arg1[%241, %c0_88, %c0_89, %c0_90] : memref<8x3x2x32xf32, #tpu.memory_space<vmem>>, vector<1x3x2x32xf32>
    %243 = vector.shape_cast %242 : vector<1x3x2x32xf32> to vector<3x2x32xf32>
    %cst_91 = arith.constant dense<0.000000e+00> : vector<2x32xf32>
    %244 = tpu.matmul %198, %1, %cst_91 {dimension_numbers = #tpu.dot_dimension_numbers<[1], [0], [0], [1], [0, 0, 1, 1], [], []>} : vector<2x32xf32>, vector<32x32xf32>, vector<2x32xf32> -> vector<2x32xf32>
    %cst_92 = arith.constant dense<0.000000e+00> : vector<2x32xf32>
    %245 = tpu.matmul %198, %5, %cst_92 {dimension_numbers = #tpu.dot_dimension_numbers<[1], [0], [0], [1], [0, 0, 1, 1], [], []>} : vector<2x32xf32>, vector<32x32xf32>, vector<2x32xf32> -> vector<2x32xf32>
    %cst_93 = arith.constant dense<0.000000e+00> : vector<2x32xf32>
    %246 = tpu.matmul %198, %9, %cst_93 {dimension_numbers = #tpu.dot_dimension_numbers<[1], [0], [0], [1], [0, 0, 1, 1], [], []>} : vector<2x32xf32>, vector<32x32xf32>, vector<2x32xf32> -> vector<2x32xf32>
    %247 = arith.addf %246, %12 : vector<2x32xf32>
    %248 = vector.extract_strided_slice %243 {offsets = [0, 0, 0], sizes = [1, 2, 32], strides = [1, 1, 1]} : vector<3x2x32xf32> to vector<1x2x32xf32>
    %249 = vector.shape_cast %248 : vector<1x2x32xf32> to vector<2x32xf32>
    %250 = arith.addf %249, %244 : vector<2x32xf32>
    %251 = arith.negf %250 : vector<2x32xf32>
    %252 = math.exp %251 : vector<2x32xf32>
    %cst_94 = arith.constant 1.000000e+00 : f32
    %253 = vector.broadcast %cst_94 : f32 to vector<2x32xf32>
    %254 = arith.addf %253, %252 : vector<2x32xf32>
    %255 = arith.divf %253, %254 : vector<2x32xf32>
    %256 = vector.extract_strided_slice %243 {offsets = [1, 0, 0], sizes = [1, 2, 32], strides = [1, 1, 1]} : vector<3x2x32xf32> to vector<1x2x32xf32>
    %257 = vector.shape_cast %256 : vector<1x2x32xf32> to vector<2x32xf32>
    %258 = arith.addf %257, %245 : vector<2x32xf32>
    %259 = arith.negf %258 : vector<2x32xf32>
    %260 = math.exp %259 : vector<2x32xf32>
    %cst_95 = arith.constant 1.000000e+00 : f32
    %261 = vector.broadcast %cst_95 : f32 to vector<2x32xf32>
    %262 = arith.addf %261, %260 : vector<2x32xf32>
    %263 = arith.divf %261, %262 : vector<2x32xf32>
    %264 = vector.extract_strided_slice %243 {offsets = [2, 0, 0], sizes = [1, 2, 32], strides = [1, 1, 1]} : vector<3x2x32xf32> to vector<1x2x32xf32>
    %265 = vector.shape_cast %264 : vector<1x2x32xf32> to vector<2x32xf32>
    %266 = arith.mulf %255, %247 : vector<2x32xf32>
    %267 = arith.addf %265, %266 : vector<2x32xf32>
    %268 = math.tanh %267 : vector<2x32xf32>
    %cst_96 = arith.constant 1.000000e+00 : f32
    %269 = vector.broadcast %cst_96 : f32 to vector<2x32xf32>
    %270 = arith.subf %269, %263 : vector<2x32xf32>
    %271 = arith.mulf %270, %268 : vector<2x32xf32>
    %272 = arith.mulf %263, %198 : vector<2x32xf32>
    %273 = arith.addf %271, %272 : vector<2x32xf32>
    %274 = arith.index_cast %c3_i32 : i32 to index
    %c0_97 = arith.constant 0 : index
    %c0_98 = arith.constant 0 : index
    %275 = vector.load %arg7[%274, %c0_97, %c0_98] : memref<8x2x32xf32, #tpu.memory_space<vmem>>, vector<1x2x32xf32>
    %276 = vector.shape_cast %275 : vector<1x2x32xf32> to vector<2x32xf32>
    %277 = vector.shape_cast %273 : vector<2x32xf32> to vector<1x2x32xf32>
    tpu.vector_store %arg7[%274, %c0_97, %c0_98], %277 {strides = array<i32>} : memref<8x2x32xf32, #tpu.memory_space<vmem>>, vector<1x2x32xf32>,
    %c7_i32_99 = arith.constant 7 : i32
    %278 = arith.subi %c7_i32_99, %c3_i32 : i32
    %279 = arith.index_cast %278 : i32 to index
    %c0_100 = arith.constant 0 : index
    %c0_101 = arith.constant 0 : index
    %c0_102 = arith.constant 0 : index
    %280 = vector.load %arg2[%279, %c0_100, %c0_101, %c0_102] : memref<8x3x2x32xf32, #tpu.memory_space<vmem>>, vector<1x3x2x32xf32>
    %281 = vector.shape_cast %280 : vector<1x3x2x32xf32> to vector<3x2x32xf32>
    %cst_103 = arith.constant dense<0.000000e+00> : vector<2x32xf32>
    %282 = tpu.matmul %236, %3, %cst_103 {dimension_numbers = #tpu.dot_dimension_numbers<[1], [0], [0], [1], [0, 0, 1, 1], [], []>} : vector<2x32xf32>, vector<32x32xf32>, vector<2x32xf32> -> vector<2x32xf32>
    %cst_104 = arith.constant dense<0.000000e+00> : vector<2x32xf32>
    %283 = tpu.matmul %236, %7, %cst_104 {dimension_numbers = #tpu.dot_dimension_numbers<[1], [0], [0], [1], [0, 0, 1, 1], [], []>} : vector<2x32xf32>, vector<32x32xf32>, vector<2x32xf32> -> vector<2x32xf32>
    %cst_105 = arith.constant dense<0.000000e+00> : vector<2x32xf32>
    %284 = tpu.matmul %236, %11, %cst_105 {dimension_numbers = #tpu.dot_dimension_numbers<[1], [0], [0], [1], [0, 0, 1, 1], [], []>} : vector<2x32xf32>, vector<32x32xf32>, vector<2x32xf32> -> vector<2x32xf32>
    %285 = arith.addf %284, %13 : vector<2x32xf32>
    %286 = vector.extract_strided_slice %281 {offsets = [0, 0, 0], sizes = [1, 2, 32], strides = [1, 1, 1]} : vector<3x2x32xf32> to vector<1x2x32xf32>
    %287 = vector.shape_cast %286 : vector<1x2x32xf32> to vector<2x32xf32>
    %288 = arith.addf %287, %282 : vector<2x32xf32>
    %289 = arith.negf %288 : vector<2x32xf32>
    %290 = math.exp %289 : vector<2x32xf32>
    %cst_106 = arith.constant 1.000000e+00 : f32
    %291 = vector.broadcast %cst_106 : f32 to vector<2x32xf32>
    %292 = arith.addf %291, %290 : vector<2x32xf32>
    %293 = arith.divf %291, %292 : vector<2x32xf32>
    %294 = vector.extract_strided_slice %281 {offsets = [1, 0, 0], sizes = [1, 2, 32], strides = [1, 1, 1]} : vector<3x2x32xf32> to vector<1x2x32xf32>
    %295 = vector.shape_cast %294 : vector<1x2x32xf32> to vector<2x32xf32>
    %296 = arith.addf %295, %283 : vector<2x32xf32>
    %297 = arith.negf %296 : vector<2x32xf32>
    %298 = math.exp %297 : vector<2x32xf32>
    %cst_107 = arith.constant 1.000000e+00 : f32
    %299 = vector.broadcast %cst_107 : f32 to vector<2x32xf32>
    %300 = arith.addf %299, %298 : vector<2x32xf32>
    %301 = arith.divf %299, %300 : vector<2x32xf32>
    %302 = vector.extract_strided_slice %281 {offsets = [2, 0, 0], sizes = [1, 2, 32], strides = [1, 1, 1]} : vector<3x2x32xf32> to vector<1x2x32xf32>
    %303 = vector.shape_cast %302 : vector<1x2x32xf32> to vector<2x32xf32>
    %304 = arith.mulf %293, %285 : vector<2x32xf32>
    %305 = arith.addf %303, %304 : vector<2x32xf32>
    %306 = math.tanh %305 : vector<2x32xf32>
    %cst_108 = arith.constant 1.000000e+00 : f32
    %307 = vector.broadcast %cst_108 : f32 to vector<2x32xf32>
    %308 = arith.subf %307, %301 : vector<2x32xf32>
    %309 = arith.mulf %308, %306 : vector<2x32xf32>
    %310 = arith.mulf %301, %236 : vector<2x32xf32>
    %311 = arith.addf %309, %310 : vector<2x32xf32>
    %312 = arith.index_cast %278 : i32 to index
    %c0_109 = arith.constant 0 : index
    %c0_110 = arith.constant 0 : index
    %313 = vector.load %arg8[%312, %c0_109, %c0_110] : memref<8x2x32xf32, #tpu.memory_space<vmem>>, vector<1x2x32xf32>
    %314 = vector.shape_cast %313 : vector<1x2x32xf32> to vector<2x32xf32>
    %315 = vector.shape_cast %311 : vector<2x32xf32> to vector<1x2x32xf32>
    tpu.vector_store %arg8[%312, %c0_109, %c0_110], %315 {strides = array<i32>} : memref<8x2x32xf32, #tpu.memory_space<vmem>>, vector<1x2x32xf32>,
    %c4_i32 = arith.constant 4 : i32
    %316 = arith.index_cast %c4_i32 : i32 to index
    %c0_111 = arith.constant 0 : index
    %c0_112 = arith.constant 0 : index
    %c0_113 = arith.constant 0 : index
    %317 = vector.load %arg1[%316, %c0_111, %c0_112, %c0_113] : memref<8x3x2x32xf32, #tpu.memory_space<vmem>>, vector<1x3x2x32xf32>
    %318 = vector.shape_cast %317 : vector<1x3x2x32xf32> to vector<3x2x32xf32>
    %cst_114 = arith.constant dense<0.000000e+00> : vector<2x32xf32>
    %319 = tpu.matmul %273, %1, %cst_114 {dimension_numbers = #tpu.dot_dimension_numbers<[1], [0], [0], [1], [0, 0, 1, 1], [], []>} : vector<2x32xf32>, vector<32x32xf32>, vector<2x32xf32> -> vector<2x32xf32>
    %cst_115 = arith.constant dense<0.000000e+00> : vector<2x32xf32>
    %320 = tpu.matmul %273, %5, %cst_115 {dimension_numbers = #tpu.dot_dimension_numbers<[1], [0], [0], [1], [0, 0, 1, 1], [], []>} : vector<2x32xf32>, vector<32x32xf32>, vector<2x32xf32> -> vector<2x32xf32>
    %cst_116 = arith.constant dense<0.000000e+00> : vector<2x32xf32>
    %321 = tpu.matmul %273, %9, %cst_116 {dimension_numbers = #tpu.dot_dimension_numbers<[1], [0], [0], [1], [0, 0, 1, 1], [], []>} : vector<2x32xf32>, vector<32x32xf32>, vector<2x32xf32> -> vector<2x32xf32>
    %322 = arith.addf %321, %12 : vector<2x32xf32>
    %323 = vector.extract_strided_slice %318 {offsets = [0, 0, 0], sizes = [1, 2, 32], strides = [1, 1, 1]} : vector<3x2x32xf32> to vector<1x2x32xf32>
    %324 = vector.shape_cast %323 : vector<1x2x32xf32> to vector<2x32xf32>
    %325 = arith.addf %324, %319 : vector<2x32xf32>
    %326 = arith.negf %325 : vector<2x32xf32>
    %327 = math.exp %326 : vector<2x32xf32>
    %cst_117 = arith.constant 1.000000e+00 : f32
    %328 = vector.broadcast %cst_117 : f32 to vector<2x32xf32>
    %329 = arith.addf %328, %327 : vector<2x32xf32>
    %330 = arith.divf %328, %329 : vector<2x32xf32>
    %331 = vector.extract_strided_slice %318 {offsets = [1, 0, 0], sizes = [1, 2, 32], strides = [1, 1, 1]} : vector<3x2x32xf32> to vector<1x2x32xf32>
    %332 = vector.shape_cast %331 : vector<1x2x32xf32> to vector<2x32xf32>
    %333 = arith.addf %332, %320 : vector<2x32xf32>
    %334 = arith.negf %333 : vector<2x32xf32>
    %335 = math.exp %334 : vector<2x32xf32>
    %cst_118 = arith.constant 1.000000e+00 : f32
    %336 = vector.broadcast %cst_118 : f32 to vector<2x32xf32>
    %337 = arith.addf %336, %335 : vector<2x32xf32>
    %338 = arith.divf %336, %337 : vector<2x32xf32>
    %339 = vector.extract_strided_slice %318 {offsets = [2, 0, 0], sizes = [1, 2, 32], strides = [1, 1, 1]} : vector<3x2x32xf32> to vector<1x2x32xf32>
    %340 = vector.shape_cast %339 : vector<1x2x32xf32> to vector<2x32xf32>
    %341 = arith.mulf %330, %322 : vector<2x32xf32>
    %342 = arith.addf %340, %341 : vector<2x32xf32>
    %343 = math.tanh %342 : vector<2x32xf32>
    %cst_119 = arith.constant 1.000000e+00 : f32
    %344 = vector.broadcast %cst_119 : f32 to vector<2x32xf32>
    %345 = arith.subf %344, %338 : vector<2x32xf32>
    %346 = arith.mulf %345, %343 : vector<2x32xf32>
    %347 = arith.mulf %338, %273 : vector<2x32xf32>
    %348 = arith.addf %346, %347 : vector<2x32xf32>
    %349 = arith.index_cast %c4_i32 : i32 to index
    %c0_120 = arith.constant 0 : index
    %c0_121 = arith.constant 0 : index
    %350 = vector.load %arg7[%349, %c0_120, %c0_121] : memref<8x2x32xf32, #tpu.memory_space<vmem>>, vector<1x2x32xf32>
    %351 = vector.shape_cast %350 : vector<1x2x32xf32> to vector<2x32xf32>
    %352 = vector.shape_cast %348 : vector<2x32xf32> to vector<1x2x32xf32>
    tpu.vector_store %arg7[%349, %c0_120, %c0_121], %352 {strides = array<i32>} : memref<8x2x32xf32, #tpu.memory_space<vmem>>, vector<1x2x32xf32>,
    %c7_i32_122 = arith.constant 7 : i32
    %353 = arith.subi %c7_i32_122, %c4_i32 : i32
    %354 = arith.index_cast %353 : i32 to index
    %c0_123 = arith.constant 0 : index
    %c0_124 = arith.constant 0 : index
    %c0_125 = arith.constant 0 : index
    %355 = vector.load %arg2[%354, %c0_123, %c0_124, %c0_125] : memref<8x3x2x32xf32, #tpu.memory_space<vmem>>, vector<1x3x2x32xf32>
    %356 = vector.shape_cast %355 : vector<1x3x2x32xf32> to vector<3x2x32xf32>
    %cst_126 = arith.constant dense<0.000000e+00> : vector<2x32xf32>
    %357 = tpu.matmul %311, %3, %cst_126 {dimension_numbers = #tpu.dot_dimension_numbers<[1], [0], [0], [1], [0, 0, 1, 1], [], []>} : vector<2x32xf32>, vector<32x32xf32>, vector<2x32xf32> -> vector<2x32xf32>
    %cst_127 = arith.constant dense<0.000000e+00> : vector<2x32xf32>
    %358 = tpu.matmul %311, %7, %cst_127 {dimension_numbers = #tpu.dot_dimension_numbers<[1], [0], [0], [1], [0, 0, 1, 1], [], []>} : vector<2x32xf32>, vector<32x32xf32>, vector<2x32xf32> -> vector<2x32xf32>
    %cst_128 = arith.constant dense<0.000000e+00> : vector<2x32xf32>
    %359 = tpu.matmul %311, %11, %cst_128 {dimension_numbers = #tpu.dot_dimension_numbers<[1], [0], [0], [1], [0, 0, 1, 1], [], []>} : vector<2x32xf32>, vector<32x32xf32>, vector<2x32xf32> -> vector<2x32xf32>
    %360 = arith.addf %359, %13 : vector<2x32xf32>
    %361 = vector.extract_strided_slice %356 {offsets = [0, 0, 0], sizes = [1, 2, 32], strides = [1, 1, 1]} : vector<3x2x32xf32> to vector<1x2x32xf32>
    %362 = vector.shape_cast %361 : vector<1x2x32xf32> to vector<2x32xf32>
    %363 = arith.addf %362, %357 : vector<2x32xf32>
    %364 = arith.negf %363 : vector<2x32xf32>
    %365 = math.exp %364 : vector<2x32xf32>
    %cst_129 = arith.constant 1.000000e+00 : f32
    %366 = vector.broadcast %cst_129 : f32 to vector<2x32xf32>
    %367 = arith.addf %366, %365 : vector<2x32xf32>
    %368 = arith.divf %366, %367 : vector<2x32xf32>
    %369 = vector.extract_strided_slice %356 {offsets = [1, 0, 0], sizes = [1, 2, 32], strides = [1, 1, 1]} : vector<3x2x32xf32> to vector<1x2x32xf32>
    %370 = vector.shape_cast %369 : vector<1x2x32xf32> to vector<2x32xf32>
    %371 = arith.addf %370, %358 : vector<2x32xf32>
    %372 = arith.negf %371 : vector<2x32xf32>
    %373 = math.exp %372 : vector<2x32xf32>
    %cst_130 = arith.constant 1.000000e+00 : f32
    %374 = vector.broadcast %cst_130 : f32 to vector<2x32xf32>
    %375 = arith.addf %374, %373 : vector<2x32xf32>
    %376 = arith.divf %374, %375 : vector<2x32xf32>
    %377 = vector.extract_strided_slice %356 {offsets = [2, 0, 0], sizes = [1, 2, 32], strides = [1, 1, 1]} : vector<3x2x32xf32> to vector<1x2x32xf32>
    %378 = vector.shape_cast %377 : vector<1x2x32xf32> to vector<2x32xf32>
    %379 = arith.mulf %368, %360 : vector<2x32xf32>
    %380 = arith.addf %378, %379 : vector<2x32xf32>
    %381 = math.tanh %380 : vector<2x32xf32>
    %cst_131 = arith.constant 1.000000e+00 : f32
    %382 = vector.broadcast %cst_131 : f32 to vector<2x32xf32>
    %383 = arith.subf %382, %376 : vector<2x32xf32>
    %384 = arith.mulf %383, %381 : vector<2x32xf32>
    %385 = arith.mulf %376, %311 : vector<2x32xf32>
    %386 = arith.addf %384, %385 : vector<2x32xf32>
    %387 = arith.index_cast %353 : i32 to index
    %c0_132 = arith.constant 0 : index
    %c0_133 = arith.constant 0 : index
    %388 = vector.load %arg8[%387, %c0_132, %c0_133] : memref<8x2x32xf32, #tpu.memory_space<vmem>>, vector<1x2x32xf32>
    %389 = vector.shape_cast %388 : vector<1x2x32xf32> to vector<2x32xf32>
    %390 = vector.shape_cast %386 : vector<2x32xf32> to vector<1x2x32xf32>
    tpu.vector_store %arg8[%387, %c0_132, %c0_133], %390 {strides = array<i32>} : memref<8x2x32xf32, #tpu.memory_space<vmem>>, vector<1x2x32xf32>,
    %c5_i32 = arith.constant 5 : i32
    %391 = arith.index_cast %c5_i32 : i32 to index
    %c0_134 = arith.constant 0 : index
    %c0_135 = arith.constant 0 : index
    %c0_136 = arith.constant 0 : index
    %392 = vector.load %arg1[%391, %c0_134, %c0_135, %c0_136] : memref<8x3x2x32xf32, #tpu.memory_space<vmem>>, vector<1x3x2x32xf32>
    %393 = vector.shape_cast %392 : vector<1x3x2x32xf32> to vector<3x2x32xf32>
    %cst_137 = arith.constant dense<0.000000e+00> : vector<2x32xf32>
    %394 = tpu.matmul %348, %1, %cst_137 {dimension_numbers = #tpu.dot_dimension_numbers<[1], [0], [0], [1], [0, 0, 1, 1], [], []>} : vector<2x32xf32>, vector<32x32xf32>, vector<2x32xf32> -> vector<2x32xf32>
    %cst_138 = arith.constant dense<0.000000e+00> : vector<2x32xf32>
    %395 = tpu.matmul %348, %5, %cst_138 {dimension_numbers = #tpu.dot_dimension_numbers<[1], [0], [0], [1], [0, 0, 1, 1], [], []>} : vector<2x32xf32>, vector<32x32xf32>, vector<2x32xf32> -> vector<2x32xf32>
    %cst_139 = arith.constant dense<0.000000e+00> : vector<2x32xf32>
    %396 = tpu.matmul %348, %9, %cst_139 {dimension_numbers = #tpu.dot_dimension_numbers<[1], [0], [0], [1], [0, 0, 1, 1], [], []>} : vector<2x32xf32>, vector<32x32xf32>, vector<2x32xf32> -> vector<2x32xf32>
    %397 = arith.addf %396, %12 : vector<2x32xf32>
    %398 = vector.extract_strided_slice %393 {offsets = [0, 0, 0], sizes = [1, 2, 32], strides = [1, 1, 1]} : vector<3x2x32xf32> to vector<1x2x32xf32>
    %399 = vector.shape_cast %398 : vector<1x2x32xf32> to vector<2x32xf32>
    %400 = arith.addf %399, %394 : vector<2x32xf32>
    %401 = arith.negf %400 : vector<2x32xf32>
    %402 = math.exp %401 : vector<2x32xf32>
    %cst_140 = arith.constant 1.000000e+00 : f32
    %403 = vector.broadcast %cst_140 : f32 to vector<2x32xf32>
    %404 = arith.addf %403, %402 : vector<2x32xf32>
    %405 = arith.divf %403, %404 : vector<2x32xf32>
    %406 = vector.extract_strided_slice %393 {offsets = [1, 0, 0], sizes = [1, 2, 32], strides = [1, 1, 1]} : vector<3x2x32xf32> to vector<1x2x32xf32>
    %407 = vector.shape_cast %406 : vector<1x2x32xf32> to vector<2x32xf32>
    %408 = arith.addf %407, %395 : vector<2x32xf32>
    %409 = arith.negf %408 : vector<2x32xf32>
    %410 = math.exp %409 : vector<2x32xf32>
    %cst_141 = arith.constant 1.000000e+00 : f32
    %411 = vector.broadcast %cst_141 : f32 to vector<2x32xf32>
    %412 = arith.addf %411, %410 : vector<2x32xf32>
    %413 = arith.divf %411, %412 : vector<2x32xf32>
    %414 = vector.extract_strided_slice %393 {offsets = [2, 0, 0], sizes = [1, 2, 32], strides = [1, 1, 1]} : vector<3x2x32xf32> to vector<1x2x32xf32>
    %415 = vector.shape_cast %414 : vector<1x2x32xf32> to vector<2x32xf32>
    %416 = arith.mulf %405, %397 : vector<2x32xf32>
    %417 = arith.addf %415, %416 : vector<2x32xf32>
    %418 = math.tanh %417 : vector<2x32xf32>
    %cst_142 = arith.constant 1.000000e+00 : f32
    %419 = vector.broadcast %cst_142 : f32 to vector<2x32xf32>
    %420 = arith.subf %419, %413 : vector<2x32xf32>
    %421 = arith.mulf %420, %418 : vector<2x32xf32>
    %422 = arith.mulf %413, %348 : vector<2x32xf32>
    %423 = arith.addf %421, %422 : vector<2x32xf32>
    %424 = arith.index_cast %c5_i32 : i32 to index
    %c0_143 = arith.constant 0 : index
    %c0_144 = arith.constant 0 : index
    %425 = vector.load %arg7[%424, %c0_143, %c0_144] : memref<8x2x32xf32, #tpu.memory_space<vmem>>, vector<1x2x32xf32>
    %426 = vector.shape_cast %425 : vector<1x2x32xf32> to vector<2x32xf32>
    %427 = vector.shape_cast %423 : vector<2x32xf32> to vector<1x2x32xf32>
    tpu.vector_store %arg7[%424, %c0_143, %c0_144], %427 {strides = array<i32>} : memref<8x2x32xf32, #tpu.memory_space<vmem>>, vector<1x2x32xf32>,
    %c7_i32_145 = arith.constant 7 : i32
    %428 = arith.subi %c7_i32_145, %c5_i32 : i32
    %429 = arith.index_cast %428 : i32 to index
    %c0_146 = arith.constant 0 : index
    %c0_147 = arith.constant 0 : index
    %c0_148 = arith.constant 0 : index
    %430 = vector.load %arg2[%429, %c0_146, %c0_147, %c0_148] : memref<8x3x2x32xf32, #tpu.memory_space<vmem>>, vector<1x3x2x32xf32>
    %431 = vector.shape_cast %430 : vector<1x3x2x32xf32> to vector<3x2x32xf32>
    %cst_149 = arith.constant dense<0.000000e+00> : vector<2x32xf32>
    %432 = tpu.matmul %386, %3, %cst_149 {dimension_numbers = #tpu.dot_dimension_numbers<[1], [0], [0], [1], [0, 0, 1, 1], [], []>} : vector<2x32xf32>, vector<32x32xf32>, vector<2x32xf32> -> vector<2x32xf32>
    %cst_150 = arith.constant dense<0.000000e+00> : vector<2x32xf32>
    %433 = tpu.matmul %386, %7, %cst_150 {dimension_numbers = #tpu.dot_dimension_numbers<[1], [0], [0], [1], [0, 0, 1, 1], [], []>} : vector<2x32xf32>, vector<32x32xf32>, vector<2x32xf32> -> vector<2x32xf32>
    %cst_151 = arith.constant dense<0.000000e+00> : vector<2x32xf32>
    %434 = tpu.matmul %386, %11, %cst_151 {dimension_numbers = #tpu.dot_dimension_numbers<[1], [0], [0], [1], [0, 0, 1, 1], [], []>} : vector<2x32xf32>, vector<32x32xf32>, vector<2x32xf32> -> vector<2x32xf32>
    %435 = arith.addf %434, %13 : vector<2x32xf32>
    %436 = vector.extract_strided_slice %431 {offsets = [0, 0, 0], sizes = [1, 2, 32], strides = [1, 1, 1]} : vector<3x2x32xf32> to vector<1x2x32xf32>
    %437 = vector.shape_cast %436 : vector<1x2x32xf32> to vector<2x32xf32>
    %438 = arith.addf %437, %432 : vector<2x32xf32>
    %439 = arith.negf %438 : vector<2x32xf32>
    %440 = math.exp %439 : vector<2x32xf32>
    %cst_152 = arith.constant 1.000000e+00 : f32
    %441 = vector.broadcast %cst_152 : f32 to vector<2x32xf32>
    %442 = arith.addf %441, %440 : vector<2x32xf32>
    %443 = arith.divf %441, %442 : vector<2x32xf32>
    %444 = vector.extract_strided_slice %431 {offsets = [1, 0, 0], sizes = [1, 2, 32], strides = [1, 1, 1]} : vector<3x2x32xf32> to vector<1x2x32xf32>
    %445 = vector.shape_cast %444 : vector<1x2x32xf32> to vector<2x32xf32>
    %446 = arith.addf %445, %433 : vector<2x32xf32>
    %447 = arith.negf %446 : vector<2x32xf32>
    %448 = math.exp %447 : vector<2x32xf32>
    %cst_153 = arith.constant 1.000000e+00 : f32
    %449 = vector.broadcast %cst_153 : f32 to vector<2x32xf32>
    %450 = arith.addf %449, %448 : vector<2x32xf32>
    %451 = arith.divf %449, %450 : vector<2x32xf32>
    %452 = vector.extract_strided_slice %431 {offsets = [2, 0, 0], sizes = [1, 2, 32], strides = [1, 1, 1]} : vector<3x2x32xf32> to vector<1x2x32xf32>
    %453 = vector.shape_cast %452 : vector<1x2x32xf32> to vector<2x32xf32>
    %454 = arith.mulf %443, %435 : vector<2x32xf32>
    %455 = arith.addf %453, %454 : vector<2x32xf32>
    %456 = math.tanh %455 : vector<2x32xf32>
    %cst_154 = arith.constant 1.000000e+00 : f32
    %457 = vector.broadcast %cst_154 : f32 to vector<2x32xf32>
    %458 = arith.subf %457, %451 : vector<2x32xf32>
    %459 = arith.mulf %458, %456 : vector<2x32xf32>
    %460 = arith.mulf %451, %386 : vector<2x32xf32>
    %461 = arith.addf %459, %460 : vector<2x32xf32>
    %462 = arith.index_cast %428 : i32 to index
    %c0_155 = arith.constant 0 : index
    %c0_156 = arith.constant 0 : index
    %463 = vector.load %arg8[%462, %c0_155, %c0_156] : memref<8x2x32xf32, #tpu.memory_space<vmem>>, vector<1x2x32xf32>
    %464 = vector.shape_cast %463 : vector<1x2x32xf32> to vector<2x32xf32>
    %465 = vector.shape_cast %461 : vector<2x32xf32> to vector<1x2x32xf32>
    tpu.vector_store %arg8[%462, %c0_155, %c0_156], %465 {strides = array<i32>} : memref<8x2x32xf32, #tpu.memory_space<vmem>>, vector<1x2x32xf32>,
    %c6_i32 = arith.constant 6 : i32
    %466 = arith.index_cast %c6_i32 : i32 to index
    %c0_157 = arith.constant 0 : index
    %c0_158 = arith.constant 0 : index
    %c0_159 = arith.constant 0 : index
    %467 = vector.load %arg1[%466, %c0_157, %c0_158, %c0_159] : memref<8x3x2x32xf32, #tpu.memory_space<vmem>>, vector<1x3x2x32xf32>
    %468 = vector.shape_cast %467 : vector<1x3x2x32xf32> to vector<3x2x32xf32>
    %cst_160 = arith.constant dense<0.000000e+00> : vector<2x32xf32>
    %469 = tpu.matmul %423, %1, %cst_160 {dimension_numbers = #tpu.dot_dimension_numbers<[1], [0], [0], [1], [0, 0, 1, 1], [], []>} : vector<2x32xf32>, vector<32x32xf32>, vector<2x32xf32> -> vector<2x32xf32>
    %cst_161 = arith.constant dense<0.000000e+00> : vector<2x32xf32>
    %470 = tpu.matmul %423, %5, %cst_161 {dimension_numbers = #tpu.dot_dimension_numbers<[1], [0], [0], [1], [0, 0, 1, 1], [], []>} : vector<2x32xf32>, vector<32x32xf32>, vector<2x32xf32> -> vector<2x32xf32>
    %cst_162 = arith.constant dense<0.000000e+00> : vector<2x32xf32>
    %471 = tpu.matmul %423, %9, %cst_162 {dimension_numbers = #tpu.dot_dimension_numbers<[1], [0], [0], [1], [0, 0, 1, 1], [], []>} : vector<2x32xf32>, vector<32x32xf32>, vector<2x32xf32> -> vector<2x32xf32>
    %472 = arith.addf %471, %12 : vector<2x32xf32>
    %473 = vector.extract_strided_slice %468 {offsets = [0, 0, 0], sizes = [1, 2, 32], strides = [1, 1, 1]} : vector<3x2x32xf32> to vector<1x2x32xf32>
    %474 = vector.shape_cast %473 : vector<1x2x32xf32> to vector<2x32xf32>
    %475 = arith.addf %474, %469 : vector<2x32xf32>
    %476 = arith.negf %475 : vector<2x32xf32>
    %477 = math.exp %476 : vector<2x32xf32>
    %cst_163 = arith.constant 1.000000e+00 : f32
    %478 = vector.broadcast %cst_163 : f32 to vector<2x32xf32>
    %479 = arith.addf %478, %477 : vector<2x32xf32>
    %480 = arith.divf %478, %479 : vector<2x32xf32>
    %481 = vector.extract_strided_slice %468 {offsets = [1, 0, 0], sizes = [1, 2, 32], strides = [1, 1, 1]} : vector<3x2x32xf32> to vector<1x2x32xf32>
    %482 = vector.shape_cast %481 : vector<1x2x32xf32> to vector<2x32xf32>
    %483 = arith.addf %482, %470 : vector<2x32xf32>
    %484 = arith.negf %483 : vector<2x32xf32>
    %485 = math.exp %484 : vector<2x32xf32>
    %cst_164 = arith.constant 1.000000e+00 : f32
    %486 = vector.broadcast %cst_164 : f32 to vector<2x32xf32>
    %487 = arith.addf %486, %485 : vector<2x32xf32>
    %488 = arith.divf %486, %487 : vector<2x32xf32>
    %489 = vector.extract_strided_slice %468 {offsets = [2, 0, 0], sizes = [1, 2, 32], strides = [1, 1, 1]} : vector<3x2x32xf32> to vector<1x2x32xf32>
    %490 = vector.shape_cast %489 : vector<1x2x32xf32> to vector<2x32xf32>
    %491 = arith.mulf %480, %472 : vector<2x32xf32>
    %492 = arith.addf %490, %491 : vector<2x32xf32>
    %493 = math.tanh %492 : vector<2x32xf32>
    %cst_165 = arith.constant 1.000000e+00 : f32
    %494 = vector.broadcast %cst_165 : f32 to vector<2x32xf32>
    %495 = arith.subf %494, %488 : vector<2x32xf32>
    %496 = arith.mulf %495, %493 : vector<2x32xf32>
    %497 = arith.mulf %488, %423 : vector<2x32xf32>
    %498 = arith.addf %496, %497 : vector<2x32xf32>
    %499 = arith.index_cast %c6_i32 : i32 to index
    %c0_166 = arith.constant 0 : index
    %c0_167 = arith.constant 0 : index
    %500 = vector.load %arg7[%499, %c0_166, %c0_167] : memref<8x2x32xf32, #tpu.memory_space<vmem>>, vector<1x2x32xf32>
    %501 = vector.shape_cast %500 : vector<1x2x32xf32> to vector<2x32xf32>
    %502 = vector.shape_cast %498 : vector<2x32xf32> to vector<1x2x32xf32>
    tpu.vector_store %arg7[%499, %c0_166, %c0_167], %502 {strides = array<i32>} : memref<8x2x32xf32, #tpu.memory_space<vmem>>, vector<1x2x32xf32>,
    %c7_i32_168 = arith.constant 7 : i32
    %503 = arith.subi %c7_i32_168, %c6_i32 : i32
    %504 = arith.index_cast %503 : i32 to index
    %c0_169 = arith.constant 0 : index
    %c0_170 = arith.constant 0 : index
    %c0_171 = arith.constant 0 : index
    %505 = vector.load %arg2[%504, %c0_169, %c0_170, %c0_171] : memref<8x3x2x32xf32, #tpu.memory_space<vmem>>, vector<1x3x2x32xf32>
    %506 = vector.shape_cast %505 : vector<1x3x2x32xf32> to vector<3x2x32xf32>
    %cst_172 = arith.constant dense<0.000000e+00> : vector<2x32xf32>
    %507 = tpu.matmul %461, %3, %cst_172 {dimension_numbers = #tpu.dot_dimension_numbers<[1], [0], [0], [1], [0, 0, 1, 1], [], []>} : vector<2x32xf32>, vector<32x32xf32>, vector<2x32xf32> -> vector<2x32xf32>
    %cst_173 = arith.constant dense<0.000000e+00> : vector<2x32xf32>
    %508 = tpu.matmul %461, %7, %cst_173 {dimension_numbers = #tpu.dot_dimension_numbers<[1], [0], [0], [1], [0, 0, 1, 1], [], []>} : vector<2x32xf32>, vector<32x32xf32>, vector<2x32xf32> -> vector<2x32xf32>
    %cst_174 = arith.constant dense<0.000000e+00> : vector<2x32xf32>
    %509 = tpu.matmul %461, %11, %cst_174 {dimension_numbers = #tpu.dot_dimension_numbers<[1], [0], [0], [1], [0, 0, 1, 1], [], []>} : vector<2x32xf32>, vector<32x32xf32>, vector<2x32xf32> -> vector<2x32xf32>
    %510 = arith.addf %509, %13 : vector<2x32xf32>
    %511 = vector.extract_strided_slice %506 {offsets = [0, 0, 0], sizes = [1, 2, 32], strides = [1, 1, 1]} : vector<3x2x32xf32> to vector<1x2x32xf32>
    %512 = vector.shape_cast %511 : vector<1x2x32xf32> to vector<2x32xf32>
    %513 = arith.addf %512, %507 : vector<2x32xf32>
    %514 = arith.negf %513 : vector<2x32xf32>
    %515 = math.exp %514 : vector<2x32xf32>
    %cst_175 = arith.constant 1.000000e+00 : f32
    %516 = vector.broadcast %cst_175 : f32 to vector<2x32xf32>
    %517 = arith.addf %516, %515 : vector<2x32xf32>
    %518 = arith.divf %516, %517 : vector<2x32xf32>
    %519 = vector.extract_strided_slice %506 {offsets = [1, 0, 0], sizes = [1, 2, 32], strides = [1, 1, 1]} : vector<3x2x32xf32> to vector<1x2x32xf32>
    %520 = vector.shape_cast %519 : vector<1x2x32xf32> to vector<2x32xf32>
    %521 = arith.addf %520, %508 : vector<2x32xf32>
    %522 = arith.negf %521 : vector<2x32xf32>
    %523 = math.exp %522 : vector<2x32xf32>
    %cst_176 = arith.constant 1.000000e+00 : f32
    %524 = vector.broadcast %cst_176 : f32 to vector<2x32xf32>
    %525 = arith.addf %524, %523 : vector<2x32xf32>
    %526 = arith.divf %524, %525 : vector<2x32xf32>
    %527 = vector.extract_strided_slice %506 {offsets = [2, 0, 0], sizes = [1, 2, 32], strides = [1, 1, 1]} : vector<3x2x32xf32> to vector<1x2x32xf32>
    %528 = vector.shape_cast %527 : vector<1x2x32xf32> to vector<2x32xf32>
    %529 = arith.mulf %518, %510 : vector<2x32xf32>
    %530 = arith.addf %528, %529 : vector<2x32xf32>
    %531 = math.tanh %530 : vector<2x32xf32>
    %cst_177 = arith.constant 1.000000e+00 : f32
    %532 = vector.broadcast %cst_177 : f32 to vector<2x32xf32>
    %533 = arith.subf %532, %526 : vector<2x32xf32>
    %534 = arith.mulf %533, %531 : vector<2x32xf32>
    %535 = arith.mulf %526, %461 : vector<2x32xf32>
    %536 = arith.addf %534, %535 : vector<2x32xf32>
    %537 = arith.index_cast %503 : i32 to index
    %c0_178 = arith.constant 0 : index
    %c0_179 = arith.constant 0 : index
    %538 = vector.load %arg8[%537, %c0_178, %c0_179] : memref<8x2x32xf32, #tpu.memory_space<vmem>>, vector<1x2x32xf32>
    %539 = vector.shape_cast %538 : vector<1x2x32xf32> to vector<2x32xf32>
    %540 = vector.shape_cast %536 : vector<2x32xf32> to vector<1x2x32xf32>
    tpu.vector_store %arg8[%537, %c0_178, %c0_179], %540 {strides = array<i32>} : memref<8x2x32xf32, #tpu.memory_space<vmem>>, vector<1x2x32xf32>,
    %c7_i32_180 = arith.constant 7 : i32
    %541 = arith.index_cast %c7_i32_180 : i32 to index
    %c0_181 = arith.constant 0 : index
    %c0_182 = arith.constant 0 : index
    %c0_183 = arith.constant 0 : index
    %542 = vector.load %arg1[%541, %c0_181, %c0_182, %c0_183] : memref<8x3x2x32xf32, #tpu.memory_space<vmem>>, vector<1x3x2x32xf32>
    %543 = vector.shape_cast %542 : vector<1x3x2x32xf32> to vector<3x2x32xf32>
    %cst_184 = arith.constant dense<0.000000e+00> : vector<2x32xf32>
    %544 = tpu.matmul %498, %1, %cst_184 {dimension_numbers = #tpu.dot_dimension_numbers<[1], [0], [0], [1], [0, 0, 1, 1], [], []>} : vector<2x32xf32>, vector<32x32xf32>, vector<2x32xf32> -> vector<2x32xf32>
    %cst_185 = arith.constant dense<0.000000e+00> : vector<2x32xf32>
    %545 = tpu.matmul %498, %5, %cst_185 {dimension_numbers = #tpu.dot_dimension_numbers<[1], [0], [0], [1], [0, 0, 1, 1], [], []>} : vector<2x32xf32>, vector<32x32xf32>, vector<2x32xf32> -> vector<2x32xf32>
    %cst_186 = arith.constant dense<0.000000e+00> : vector<2x32xf32>
    %546 = tpu.matmul %498, %9, %cst_186 {dimension_numbers = #tpu.dot_dimension_numbers<[1], [0], [0], [1], [0, 0, 1, 1], [], []>} : vector<2x32xf32>, vector<32x32xf32>, vector<2x32xf32> -> vector<2x32xf32>
    %547 = arith.addf %546, %12 : vector<2x32xf32>
    %548 = vector.extract_strided_slice %543 {offsets = [0, 0, 0], sizes = [1, 2, 32], strides = [1, 1, 1]} : vector<3x2x32xf32> to vector<1x2x32xf32>
    %549 = vector.shape_cast %548 : vector<1x2x32xf32> to vector<2x32xf32>
    %550 = arith.addf %549, %544 : vector<2x32xf32>
    %551 = arith.negf %550 : vector<2x32xf32>
    %552 = math.exp %551 : vector<2x32xf32>
    %cst_187 = arith.constant 1.000000e+00 : f32
    %553 = vector.broadcast %cst_187 : f32 to vector<2x32xf32>
    %554 = arith.addf %553, %552 : vector<2x32xf32>
    %555 = arith.divf %553, %554 : vector<2x32xf32>
    %556 = vector.extract_strided_slice %543 {offsets = [1, 0, 0], sizes = [1, 2, 32], strides = [1, 1, 1]} : vector<3x2x32xf32> to vector<1x2x32xf32>
    %557 = vector.shape_cast %556 : vector<1x2x32xf32> to vector<2x32xf32>
    %558 = arith.addf %557, %545 : vector<2x32xf32>
    %559 = arith.negf %558 : vector<2x32xf32>
    %560 = math.exp %559 : vector<2x32xf32>
    %cst_188 = arith.constant 1.000000e+00 : f32
    %561 = vector.broadcast %cst_188 : f32 to vector<2x32xf32>
    %562 = arith.addf %561, %560 : vector<2x32xf32>
    %563 = arith.divf %561, %562 : vector<2x32xf32>
    %564 = vector.extract_strided_slice %543 {offsets = [2, 0, 0], sizes = [1, 2, 32], strides = [1, 1, 1]} : vector<3x2x32xf32> to vector<1x2x32xf32>
    %565 = vector.shape_cast %564 : vector<1x2x32xf32> to vector<2x32xf32>
    %566 = arith.mulf %555, %547 : vector<2x32xf32>
    %567 = arith.addf %565, %566 : vector<2x32xf32>
    %568 = math.tanh %567 : vector<2x32xf32>
    %cst_189 = arith.constant 1.000000e+00 : f32
    %569 = vector.broadcast %cst_189 : f32 to vector<2x32xf32>
    %570 = arith.subf %569, %563 : vector<2x32xf32>
    %571 = arith.mulf %570, %568 : vector<2x32xf32>
    %572 = arith.mulf %563, %498 : vector<2x32xf32>
    %573 = arith.addf %571, %572 : vector<2x32xf32>
    %574 = arith.index_cast %c7_i32_180 : i32 to index
    %c0_190 = arith.constant 0 : index
    %c0_191 = arith.constant 0 : index
    %575 = vector.load %arg7[%574, %c0_190, %c0_191] : memref<8x2x32xf32, #tpu.memory_space<vmem>>, vector<1x2x32xf32>
    %576 = vector.shape_cast %575 : vector<1x2x32xf32> to vector<2x32xf32>
    %577 = vector.shape_cast %573 : vector<2x32xf32> to vector<1x2x32xf32>
    tpu.vector_store %arg7[%574, %c0_190, %c0_191], %577 {strides = array<i32>} : memref<8x2x32xf32, #tpu.memory_space<vmem>>, vector<1x2x32xf32>,
    %c7_i32_192 = arith.constant 7 : i32
    %578 = arith.subi %c7_i32_192, %c7_i32_180 : i32
    %579 = arith.index_cast %578 : i32 to index
    %c0_193 = arith.constant 0 : index
    %c0_194 = arith.constant 0 : index
    %c0_195 = arith.constant 0 : index
    %580 = vector.load %arg2[%579, %c0_193, %c0_194, %c0_195] : memref<8x3x2x32xf32, #tpu.memory_space<vmem>>, vector<1x3x2x32xf32>
    %581 = vector.shape_cast %580 : vector<1x3x2x32xf32> to vector<3x2x32xf32>
    %cst_196 = arith.constant dense<0.000000e+00> : vector<2x32xf32>
    %582 = tpu.matmul %536, %3, %cst_196 {dimension_numbers = #tpu.dot_dimension_numbers<[1], [0], [0], [1], [0, 0, 1, 1], [], []>} : vector<2x32xf32>, vector<32x32xf32>, vector<2x32xf32> -> vector<2x32xf32>
    %cst_197 = arith.constant dense<0.000000e+00> : vector<2x32xf32>
    %583 = tpu.matmul %536, %7, %cst_197 {dimension_numbers = #tpu.dot_dimension_numbers<[1], [0], [0], [1], [0, 0, 1, 1], [], []>} : vector<2x32xf32>, vector<32x32xf32>, vector<2x32xf32> -> vector<2x32xf32>
    %cst_198 = arith.constant dense<0.000000e+00> : vector<2x32xf32>
    %584 = tpu.matmul %536, %11, %cst_198 {dimension_numbers = #tpu.dot_dimension_numbers<[1], [0], [0], [1], [0, 0, 1, 1], [], []>} : vector<2x32xf32>, vector<32x32xf32>, vector<2x32xf32> -> vector<2x32xf32>
    %585 = arith.addf %584, %13 : vector<2x32xf32>
    %586 = vector.extract_strided_slice %581 {offsets = [0, 0, 0], sizes = [1, 2, 32], strides = [1, 1, 1]} : vector<3x2x32xf32> to vector<1x2x32xf32>
    %587 = vector.shape_cast %586 : vector<1x2x32xf32> to vector<2x32xf32>
    %588 = arith.addf %587, %582 : vector<2x32xf32>
    %589 = arith.negf %588 : vector<2x32xf32>
    %590 = math.exp %589 : vector<2x32xf32>
    %cst_199 = arith.constant 1.000000e+00 : f32
    %591 = vector.broadcast %cst_199 : f32 to vector<2x32xf32>
    %592 = arith.addf %591, %590 : vector<2x32xf32>
    %593 = arith.divf %591, %592 : vector<2x32xf32>
    %594 = vector.extract_strided_slice %581 {offsets = [1, 0, 0], sizes = [1, 2, 32], strides = [1, 1, 1]} : vector<3x2x32xf32> to vector<1x2x32xf32>
    %595 = vector.shape_cast %594 : vector<1x2x32xf32> to vector<2x32xf32>
    %596 = arith.addf %595, %583 : vector<2x32xf32>
    %597 = arith.negf %596 : vector<2x32xf32>
    %598 = math.exp %597 : vector<2x32xf32>
    %cst_200 = arith.constant 1.000000e+00 : f32
    %599 = vector.broadcast %cst_200 : f32 to vector<2x32xf32>
    %600 = arith.addf %599, %598 : vector<2x32xf32>
    %601 = arith.divf %599, %600 : vector<2x32xf32>
    %602 = vector.extract_strided_slice %581 {offsets = [2, 0, 0], sizes = [1, 2, 32], strides = [1, 1, 1]} : vector<3x2x32xf32> to vector<1x2x32xf32>
    %603 = vector.shape_cast %602 : vector<1x2x32xf32> to vector<2x32xf32>
    %604 = arith.mulf %593, %585 : vector<2x32xf32>
    %605 = arith.addf %603, %604 : vector<2x32xf32>
    %606 = math.tanh %605 : vector<2x32xf32>
    %cst_201 = arith.constant 1.000000e+00 : f32
    %607 = vector.broadcast %cst_201 : f32 to vector<2x32xf32>
    %608 = arith.subf %607, %601 : vector<2x32xf32>
    %609 = arith.mulf %608, %606 : vector<2x32xf32>
    %610 = arith.mulf %601, %536 : vector<2x32xf32>
    %611 = arith.addf %609, %610 : vector<2x32xf32>
    %612 = arith.index_cast %578 : i32 to index
    %c0_202 = arith.constant 0 : index
    %c0_203 = arith.constant 0 : index
    %613 = vector.load %arg8[%612, %c0_202, %c0_203] : memref<8x2x32xf32, #tpu.memory_space<vmem>>, vector<1x2x32xf32>
    %614 = vector.shape_cast %613 : vector<1x2x32xf32> to vector<2x32xf32>
    %615 = vector.shape_cast %611 : vector<2x32xf32> to vector<1x2x32xf32>
    tpu.vector_store %arg8[%612, %c0_202, %c0_203], %615 {strides = array<i32>} : memref<8x2x32xf32, #tpu.memory_space<vmem>>, vector<1x2x32xf32>,
    %c8_i32 = arith.constant 8 : i32
    return
  }
  func.func @transform_0(%arg0: i32) -> (i32, i32, i32, i32) {
    %c0_i32 = arith.constant 0 : i32
    %c0_i32_0 = arith.constant 0 : i32
    %c0_i32_1 = arith.constant 0 : i32
    %c0_i32_2 = arith.constant 0 : i32
    %c0_i32_3 = arith.constant 0 : i32
    return %c0_i32, %c0_i32_0, %c0_i32_1, %c0_i32_2 : i32, i32, i32, i32
  }
  func.func @transform_1(%arg0: i32) -> (i32, i32, i32, i32) {
    %c0_i32 = arith.constant 0 : i32
    %c0_i32_0 = arith.constant 0 : i32
    %c0_i32_1 = arith.constant 0 : i32
    %c0_i32_2 = arith.constant 0 : i32
    %c0_i32_3 = arith.constant 0 : i32
    return %c0_i32, %c0_i32_0, %c0_i32_1, %c0_i32_2 : i32, i32, i32, i32
  }
  func.func @transform_2(%arg0: i32) -> (i32, i32, i32) {
    %c0_i32 = arith.constant 0 : i32
    %c0_i32_0 = arith.constant 0 : i32
    %c0_i32_1 = arith.constant 0 : i32
    %c0_i32_2 = arith.constant 0 : i32
    return %c0_i32, %c0_i32_0, %c0_i32_1 : i32, i32, i32
  }
  func.func @transform_3(%arg0: i32) -> (i32, i32, i32) {
    %c0_i32 = arith.constant 0 : i32
    %c0_i32_0 = arith.constant 0 : i32
    %c0_i32_1 = arith.constant 0 : i32
    %c0_i32_2 = arith.constant 0 : i32
    return %c0_i32, %c0_i32_0, %c0_i32_1 : i32, i32, i32
  }
  func.func @transform_4(%arg0: i32) -> (i32, i32) {
    %c0_i32 = arith.constant 0 : i32
    %c0_i32_0 = arith.constant 0 : i32
    %c0_i32_1 = arith.constant 0 : i32
    return %c0_i32, %c0_i32_0 : i32, i32
  }
  func.func @transform_5(%arg0: i32) -> (i32, i32) {
    %c0_i32 = arith.constant 0 : i32
    %c0_i32_0 = arith.constant 0 : i32
    %c0_i32_1 = arith.constant 0 : i32
    return %c0_i32, %c0_i32_0 : i32, i32
  }
  func.func @transform_6(%arg0: i32) -> (i32, i32, i32) {
    %c0_i32 = arith.constant 0 : i32
    %c0_i32_0 = arith.constant 0 : i32
    %c0_i32_1 = arith.constant 0 : i32
    %c0_i32_2 = arith.constant 0 : i32
    return %c0_i32, %c0_i32_0, %c0_i32_1 : i32, i32, i32
  }
  func.func @transform_7(%arg0: i32) -> (i32, i32, i32) {
    %c0_i32 = arith.constant 0 : i32
    %c0_i32_0 = arith.constant 0 : i32
    %c0_i32_1 = arith.constant 0 : i32
    %c0_i32_2 = arith.constant 0 : i32
    return %c0_i32, %c0_i32_0, %c0_i32_1 : i32, i32, i32
  }
}

module attributes {stable_mosaic.version = 11 : i64} {
  func.func @_matmul_bias_kernel(%arg0: i32, %arg1: memref<16x64xf32, #tpu.memory_space<vmem>>, %arg2: memref<64x128xf32, #tpu.memory_space<vmem>>, %arg3: memref<1x128xf32, #tpu.memory_space<vmem>>, %arg4: memref<16x128xf32, #tpu.memory_space<vmem>>) attributes {dimension_semantics = [#tpu.dimension_semantics<arbitrary>], iteration_bounds = array<i64: 1>, scalar_prefetch = 0 : i64, scratch_operands = 0 : i64, tpu.core_type = #tpu.core_type<tc>, window_params = [{pipeline_mode = #tpu.pipeline_mode<synchronous>, transform_indices = @transform_0, window_bounds = array<i64: 16, 64>}, {pipeline_mode = #tpu.pipeline_mode<synchronous>, transform_indices = @transform_1, window_bounds = array<i64: 64, 128>}, {pipeline_mode = #tpu.pipeline_mode<synchronous>, transform_indices = @transform_2, window_bounds = array<i64: 1, 128>}, {pipeline_mode = #tpu.pipeline_mode<synchronous>, transform_indices = @transform_3, window_bounds = array<i64: 16, 128>}]} {
    %c0 = arith.constant 0 : index
    %c0_0 = arith.constant 0 : index
    %0 = vector.load %arg1[%c0, %c0_0] : memref<16x64xf32, #tpu.memory_space<vmem>>, vector<16x64xf32>
    %c0_1 = arith.constant 0 : index
    %c0_2 = arith.constant 0 : index
    %1 = vector.load %arg2[%c0_1, %c0_2] : memref<64x128xf32, #tpu.memory_space<vmem>>, vector<64x128xf32>
    %cst = arith.constant dense<0.000000e+00> : vector<16x128xf32>
    %2 = tpu.matmul %0, %1, %cst {dimension_numbers = #tpu.dot_dimension_numbers<[1], [0], [0], [1], [0, 0, 1, 1], [], []>} : vector<16x64xf32>, vector<64x128xf32>, vector<16x128xf32> -> vector<16x128xf32>
    %c0_3 = arith.constant 0 : index
    %c0_4 = arith.constant 0 : index
    %3 = vector.load %arg3[%c0_3, %c0_4] : memref<1x128xf32, #tpu.memory_space<vmem>>, vector<1x128xf32>
    %4 = vector.broadcast %3 : vector<1x128xf32> to vector<16x128xf32>
    %5 = arith.addf %2, %4 : vector<16x128xf32>
    %c0_5 = arith.constant 0 : index
    %c0_6 = arith.constant 0 : index
    %6 = vector.load %arg4[%c0_5, %c0_6] : memref<16x128xf32, #tpu.memory_space<vmem>>, vector<16x128xf32>
    tpu.vector_store %arg4[%c0_5, %c0_6], %5 {strides = array<i32>} : memref<16x128xf32, #tpu.memory_space<vmem>>, vector<16x128xf32>,
    return
  }
  func.func @transform_0(%arg0: i32) -> (i32, i32) {
    %c0_i32 = arith.constant 0 : i32
    %c0_i32_0 = arith.constant 0 : i32
    %c0_i32_1 = arith.constant 0 : i32
    return %c0_i32, %c0_i32_0 : i32, i32
  }
  func.func @transform_1(%arg0: i32) -> (i32, i32) {
    %c0_i32 = arith.constant 0 : i32
    %c0_i32_0 = arith.constant 0 : i32
    %c0_i32_1 = arith.constant 0 : i32
    return %c0_i32, %c0_i32_0 : i32, i32
  }
  func.func @transform_2(%arg0: i32) -> (i32, i32) {
    %c0_i32 = arith.constant 0 : i32
    %c0_i32_0 = arith.constant 0 : i32
    %c0_i32_1 = arith.constant 0 : i32
    return %c0_i32, %c0_i32_0 : i32, i32
  }
  func.func @transform_3(%arg0: i32) -> (i32, i32) {
    %c0_i32 = arith.constant 0 : i32
    %c0_i32_0 = arith.constant 0 : i32
    %c0_i32_1 = arith.constant 0 : i32
    return %c0_i32, %c0_i32_0 : i32, i32
  }
}

</mosaic_0001>

<bundles_post_ra>
// kernel: sequence_predictor_forward.7
= control target key start
LH: loop header
LB: loop body
LE: loop exit
PB: predicated region body
PF: predicated region fallthrough
CT: control target
= control target key end

     0   :  { %v155_v3 = vmov 0.0   ;;  %vm44_vm0 = vcmask 523264   ;;  %v34_v19 = vlaneseq  ;;  %s249_s1 = inlined_call_operand.vmem [shape: f32[64,192], index: 1, kind: input, shape index: {}]   ;;  %s250_s0 = inlined_call_operand.vmem [shape: f32[16,64], index: 0, kind: input, shape index: {}]   ;;  %s251_s2 = inlined_call_operand.vmem [shape: f32[1,192], index: 2, kind: input, shape index: {}]   ;;  %s252_s3 = inlined_call_operand.vmem [shape: f32[16,192], index: 3, kind: output, shape index: {}]  }
   0x1   :  { %v31_v0 = vld [vmem:[%s249_s1 + $0x78] sm:$0xff]  ;;  %v30_v1 = vld [vmem:[%s249_s1 + $0x70] sm:$0xff]  ;;  %v29_v2 = vld [vmem:[%s249_s1 + $0x68] sm:$0xff]  ;;  %115 = vmatprep.mubr.f32.mxu0 %v155_v3  ;;  %121 = vmatprep.mubr.f32.mxu1 %v155_v3 }
   0x2   :  { %67 = vmatprep.subr.mxu0 %v31_v0  ;;  %138 = vmatprep.subr.mxu1 %v31_v0  ;;  %v28_v4 = vld [vmem:[%s249_s1 + $0x60] sm:$0xff]  ;;  %v27_v5 = vld [vmem:[%s249_s1 + $0x58] sm:$0xff]  ;;  %v26_v6 = vld [vmem:[%s249_s1 + $0x50] sm:$0xff]  ;;  %v35_v20 = vshrl.u32 %v34_v19, 7 }
   0x3   :  { %68 = vmatpush1.msra.mxu0 %v30_v1  ;;  %146 = vmatpush1.msra.mxu1 %v30_v1  ;;  %v25_v7 = vld [vmem:[%s249_s1 + $0x48] sm:$0xff]  ;;  %v24_v8 = vld [vmem:[%s249_s1 + $0x40] sm:$0xff]  ;;  %v23_v9 = vld [vmem:[%s249_s1 + $0x38] sm:$0xff] }
   0x4   :  { %69 = vmatprep.subr.mxu0 %v29_v2  ;;  %139 = vmatprep.subr.mxu1 %v29_v2  ;;  %v22_v10 = vld [vmem:[%s249_s1 + $0x30] sm:$0xff]  ;;  %v21_v11 = vld [vmem:[%s249_s1 + $0x28] sm:$0xff]  ;;  %v20_v12 = vld [vmem:[%s249_s1 + $0x20] sm:$0xff]  ;;  %v36_v21 = vsub.s32 0, %v35_v20  ;;  %v40_v23 = vsub.s32 1, %v35_v20 }
   0x5   :  { %70 = vmatpush1.msra.mxu0 %v28_v4  ;;  %147 = vmatpush1.msra.mxu1 %v28_v4  ;;  %v19_v13 = vld [vmem:[%s249_s1 + $0x18] sm:$0xff]  ;;  %v18_v14 = vld [vmem:[%s249_s1 + $0x10] sm:$0xff]  ;;  %v17_v15 = vld [vmem:[%s249_s1 + $0x8] sm:$0xff] }
   0x6   :  { %71 = vmatprep.subr.mxu0 %v27_v5  ;;  %140 = vmatprep.subr.mxu1 %v27_v5  ;;  %v16_v16 = vld [vmem:[%s249_s1] sm:$0xff]  ;;  %v15_v18 = vld [vmem:[%s250_s0 + $0x8] sm:$0xff] }
   0x7   :  { %72 = vmatpush1.msra.mxu0 %v26_v6  ;;  %148 = vmatpush1.msra.mxu1 %v26_v6  ;;  %v14_v17 = vld [vmem:[%s250_s0] sm:$0xff] }
   0x8   :  { %73 = vmatprep.subr.mxu0 %v25_v7  ;;  %141 = vmatprep.subr.mxu1 %v25_v7  ;;  %v32_v22 = vld [vmem:[%s251_s2] sm:$0x3] }
   0x9   :  { %74 = vmatpush1.msra.mxu0 %v24_v8  ;;  %149 = vmatpush1.msra.mxu1 %v24_v8  ;;  %v37_v24 = vrot.slane %v32_v22, %v36_v21  ;;  %v41_v25 = vrot.slane %v32_v22, %v40_v23 }
   0xa   :  { %75 = vmatprep.subr.mxu0 %v23_v9  ;;  %142 = vmatprep.subr.mxu1 %v23_v9 }
   0xb   :  { %76 = vmatpush1.msra.mxu0 %v22_v10  ;;  %150 = vmatpush1.msra.mxu1 %v22_v10 }
   0xc   :  { %77 = vmatprep.subr.mxu0 %v21_v11  ;;  %143 = vmatprep.subr.mxu1 %v21_v11 }
   0xd   :  { %78 = vmatpush1.msra.mxu0 %v20_v12  ;;  %151 = vmatpush1.msra.mxu1 %v20_v12 }
   0xe   :  { %79 = vmatprep.subr.mxu0 %v19_v13  ;;  %144 = vmatprep.subr.mxu1 %v19_v13 }
   0xf   :  { %80 = vmatpush1.msra.mxu0 %v18_v14  ;;  %152 = vmatpush1.msra.mxu1 %v18_v14 }
  0x10   :  { %81 = vmatprep.subr.mxu0 %v17_v15  ;;  %145 = vmatprep.subr.mxu1 %v17_v15 }
  0x11   :  { %82 = vmatpush1.msra.mxu0 %v16_v16  ;;  %153 = vmatpush1.msra.mxu1 %v16_v16 }
  0x12   :  { %136 = vmatmul.mubr.msk.f32.vlgmr.msra.gmra.mxu0 %vm44_vm0, %v14_v17  ;;  %137 = vmatmul.mubr.msk.f32.vlgmr.msra.gmra.mxu1 %vm44_vm0, %v15_v18 }
  0xd2   :  { %v117_v26 = vpop.f32.mrf.mxu0  ;;  %v123_v27 = vpop.f32.mrf.mxu1 }
  0xd3   :  { %v118_v28 = vadd.f32 %v117_v26, %v37_v24  ;;  %v124_v29 = vadd.f32 %v123_v27, %v37_v24 }
  0xd4   :  { %v119_v30 = vpop.f32.mrf.mxu0  ;;  %v125_v31 = vpop.f32.mrf.mxu1 }
  0xd5   :  { %128 = vst [vmem:[%s252_s3] sm:$0xff] %v118_v28  ;;  %130 = vst [vmem:[%s252_s3 + $0x10] sm:$0xff] %v124_v29  ;;  %v120_v32 = vadd.f32 %v119_v30, %v41_v25  ;;  %v126_v33 = vadd.f32 %v125_v31, %v41_v25 }
  0xd7   :  { %129 = vst.msk [vmem:[%s252_s3 + $0x8] sm:$0xff] %vm44_vm0, %v120_v32  ;;  %131 = vst.msk [vmem:[%s252_s3 + $0x18] sm:$0xff] %vm44_vm0, %v126_v33 }

// kernel: sequence_predictor_forward.9
= control target key start
LH: loop header
LB: loop body
LE: loop exit
PB: predicated region body
PF: predicated region fallthrough
CT: control target
= control target key end

     0   :  { %vm32_vm0 = vcmask 523264   ;;  %s250_s0 = inlined_call_operand.vmem [shape: f32[16,64], index: 0, kind: input, shape index: {}]   ;;  %s251_s1 = inlined_call_operand.vmem [shape: f32[64,128], index: 1, kind: input, shape index: {}]   ;;  %s252_s2 = inlined_call_operand.vmem [shape: f32[1,128], index: 2, kind: input, shape index: {}]   ;;  %s253_s3 = inlined_call_operand.hbm [shape: f32[16,128], index: 3, kind: output, shape index: {}]  }
   0x1   :  { %v24_v0 = vld [vmem:[%s251_s1 + $0x38] sm:$0xff]  ;;  %v23_v1 = vld [vmem:[%s251_s1 + $0x30] sm:$0xff]  ;;  %v22_v2 = vld [vmem:[%s251_s1 + $0x28] sm:$0xff] }
   0x2   :  { %145 = vmatprep.subr.mxu0 %v24_v0  ;;  %v15_v3 = vld [vmem:[%s250_s0] sm:$0xff] }
   0x3   :  { %146 = vmatpush3.msra.mxu0 %v24_v0  ;;  %161 = vmatprep.mubr.msk.f32.mxu0 %vm32_vm0, %v15_v3 }
   0x4   :  { %147 = vmatprep.subr.mxu0 %v23_v1 }
   0x5   :  { %8 = vsyncpa [#allocation3], 0  ;;  %148 = vmatpush3.msra.mxu0 %v23_v1  ;;  %v21_v4 = vld [vmem:[%s251_s1 + $0x20] sm:$0xff]  ;;  %v20_v5 = vld [vmem:[%s251_s1 + $0x18] sm:$0xff]  ;;  %s189_s7 = smov [#allocation2]  }
   0x6   :  { %149 = vmatprep.subr.mxu0 %v22_v2  ;;  %v19_v6 = vld [vmem:[%s251_s1 + $0x10] sm:$0xff]  ;;  %v18_v7 = vld [vmem:[%s251_s1 + $0x8] sm:$0xff]  ;;  %v17_v8 = vld [vmem:[%s251_s1] sm:$0xff]  ;;  %s121_s8 = sshll.u32 %s189_s7, 4  ;;  %s122_s8 = int_to_ptr.vmem [resolvable:$true] %s121_s8 }
   0x7   :  { %150 = vmatpush3.msra.mxu0 %v22_v2  ;;  %v16_v9 = vld [vmem:[%s250_s0 + $0x8] sm:$0xff]  ;;  %v132_v10 = vld [vmem:[%s252_s2] ss:$0 sm:$0xff]  ;;  %s167_s1 = scalar_lea.vmem %s122_s8, 256  ;;  %p172_p1 = scmp.lt.s32.totalorder %s122_s8, %s122_s8 }
   0x8   :  { %151 = vmatprep.subr.mxu0 %v21_v4  ;;  %p168_p0 = scmp.ne.s32.totalorder %s122_s8, %s167_s1  ;;  %p173_p2 = scmp.lt.s32.totalorder %s167_s1, %s167_s1 }
   0x9   :  { %152 = vmatpush3.msra.mxu0 %v21_v4 }
   0xa   :  { %153 = vmatprep.subr.mxu0 %v20_v5  ;;  %p174_p3 = por %p173_p2, %p172_p1 }
   0xb   :  { %154 = vmatpush3.msra.mxu0 %v20_v5 }
   0xc   :  { %155 = vmatprep.subr.mxu0 %v19_v6  ;;  %p175_p4 = pnand %p174_p3, %p168_p0 }
   0xd   :  { %156 = vmatpush3.msra.mxu0 %v19_v6 }
   0xe   :  { %157 = vmatprep.subr.mxu0 %v18_v7 }
   0xf   :  { %158 = vmatpush3.msra.mxu0 %v18_v7 }
  0x10   :  { %159 = vmatprep.subr.mxu0 %v17_v8 }
  0x11   :  { %160 = vmatpush3.msra.mxu0 %v17_v8 }
  0x12   :  { %162 = vmatmul.mubr.msk.f32.vlgmr.msra.gmra.mxu0 %vm32_vm0, %v16_v9 }
  0xd2   :  { %v163_v11 = vpop.f32.mrf.mxu0 }
  0xd3   :  { %v111_v12 = vadd.f32 %v163_v11, %v132_v10 }
  0xd4   :  { %v105_v13 = vpop.f32.mrf.mxu0 }
  0xd5   :  { %115 = vst [vmem:[#allocation2 + $0x8] sm:$0xff] %v111_v12  ;;  %v106_v14 = vadd.f32 %v132_v10, %v105_v13 }
  0xd7   :  { %114 = vst [vmem:[#allocation2] sm:$0xff] %v106_v14 }
  0xd8   :  { %178 = shalt.err (!%p175_p4)
}
  0xd9   :  { %s190_s0 = smov 128   ;;  %s191_s9 = smov 8  }
  0xda   :  { %127 = dma.vmem_to_hbm [thread:$0]  %s122_s8, 256, %s253_s3, [#allocation3], %s190_s0, %s190_s0, %s191_s9  }
  0xdb   :  { %187 = dma.done.wait [#allocation3], 256  }
  0xdc   :  { %188 = vsyncadd [#allocation3], 4294967040 }
  0xdd   :  { %131 = vsyncpa [#allocation3], 1 }

// kernel: sequence_predictor_forward.5
= control target key start
LH: loop header
LB: loop body
LE: loop exit
PB: predicated region body
PF: predicated region fallthrough
CT: control target
= control target key end

     0   :  { %v132_v3 = vmov 0.0   ;;  %vm32_vm0 = vcmask 130048   ;;  %v22_v7 = vlaneseq  ;;  %vm117_vm1 = vcmask 523264   ;;  %s186_s1 = inlined_call_operand.vmem [shape: f32[16,192], index: 1, kind: input, shape index: {}]   ;;  %s187_s0 = inlined_call_operand.vmem [shape: f32[16,16], index: 0, kind: input, shape index: {}]   ;;  %s188_s2 = inlined_call_operand.vmem [shape: f32[1,192], index: 2, kind: input, shape index: {}]   ;;  %s189_s3 = inlined_call_operand.vmem [shape: f32[16,192], index: 3, kind: output, shape index: {}]  }
   0x1   :  { %v19_v0 = vld [vmem:[%s186_s1 + $0x18] sm:$0xff]  ;;  %v18_v1 = vld [vmem:[%s186_s1 + $0x10] sm:$0xff]  ;;  %v17_v2 = vld [vmem:[%s186_s1 + $0x8] sm:$0xff]  ;;  %103 = vmatprep.mubr.f32.mxu0 %v132_v3  ;;  %109 = vmatprep.mubr.f32.mxu1 %v132_v3 }
   0x2   :  { %67 = vmatprep.subr.mxu0 %v19_v0  ;;  %127 = vmatprep.subr.mxu1 %v19_v0  ;;  %v16_v4 = vld [vmem:[%s186_s1] sm:$0xff]  ;;  %v15_v6 = vld [vmem:[%s187_s0 + $0x8] sm:$0xff]  ;;  %v23_v8 = vshrl.u32 %v22_v7, 7 }
   0x3   :  { %68 = vmatpush1.msra.mxu0 %v18_v1  ;;  %129 = vmatpush1.msra.mxu1 %v18_v1  ;;  %v14_v5 = vld [vmem:[%s187_s0] sm:$0xff] }
   0x4   :  { %69 = vmatprep.subr.mxu0 %v17_v2  ;;  %128 = vmatprep.subr.mxu1 %v17_v2  ;;  %v24_v9 = vsub.s32 0, %v23_v8  ;;  %v20_v10 = vld [vmem:[%s188_s2] sm:$0x3]  ;;  %v28_v11 = vsub.s32 1, %v23_v8 }
   0x5   :  { %70 = vmatpush1.msra.mxu0 %v16_v4  ;;  %130 = vmatpush1.msra.mxu1 %v16_v4 }
   0x6   :  { %125 = vmatmul.mubr.msk.f32.vlgmr.msra.gmra.mxu0 %vm32_vm0, %v14_v5  ;;  %126 = vmatmul.mubr.msk.f32.vlgmr.msra.gmra.mxu1 %vm32_vm0, %v15_v6  ;;  %v25_v12 = vrot.slane %v20_v10, %v24_v9  ;;  %v29_v13 = vrot.slane %v20_v10, %v28_v11 }
  0xc6   :  { %v105_v14 = vpop.f32.mrf.mxu0  ;;  %v111_v15 = vpop.f32.mrf.mxu1 }
  0xc7   :  { %v106_v16 = vadd.f32 %v105_v14, %v25_v12  ;;  %v112_v17 = vadd.f32 %v111_v15, %v25_v12 }
  0xc8   :  { %v107_v18 = vpop.f32.mrf.mxu0  ;;  %v113_v19 = vpop.f32.mrf.mxu1 }
  0xc9   :  { %116 = vst [vmem:[%s189_s3] sm:$0xff] %v106_v16  ;;  %119 = vst [vmem:[%s189_s3 + $0x10] sm:$0xff] %v112_v17  ;;  %v108_v20 = vadd.f32 %v107_v18, %v29_v13  ;;  %v114_v21 = vadd.f32 %v113_v19, %v29_v13 }
  0xcb   :  { %118 = vst.msk [vmem:[%s189_s3 + $0x8] sm:$0xff] %vm117_vm1, %v108_v20  ;;  %120 = vst.msk [vmem:[%s189_s3 + $0x18] sm:$0xff] %vm117_vm1, %v114_v21 }

// kernel: sequence_predictor_forward.6
= control target key start
LH: loop header
LB: loop body
LE: loop exit
PB: predicated region body
PF: predicated region fallthrough
CT: control target
= control target key end

     0   :  { %v5000_v0 = vmov 0.0   ;;  %vm5001_vm0 = vmmov 0   ;;  %vm58_vm1 = vcmask 261120   ;;  %vm293_vm2 = vcmask 254976   ;;  %s6152_s2 = inlined_call_operand.vmem [shape: f32[3,32,32], index: 2, kind: input, shape index: {}]   ;;  %s6153_s3 = inlined_call_operand.vmem [shape: f32[3,32,32], index: 3, kind: input, shape index: {}]   ;;  %s6154_s0 = inlined_call_operand.vmem [shape: f32[8,3,2,32], index: 0, kind: input, shape index: {}]   ;;  %s6155_s1 = inlined_call_operand.vmem [shape: f32[8,3,2,32], index: 1, kind: input, shape index: {}]   ;;  %s6156_s4 = inlined_call_operand.vmem [shape: f32[2,32], index: 4, kind: input, shape index: {}]   ;;  %s6157_s5 = inlined_call_operand.vmem [shape: f32[2,32], index: 5, kind: input, shape index: {}]   ;;  %s6158_s6 = inlined_call_operand.vmem [shape: f32[8,2,32], index: 6, kind: output, shape index: {0}]   ;;  %s6159_s7 = inlined_call_operand.vmem [shape: f32[8,2,32], index: 7, kind: output, shape index: {1}]  }
   0x1   :  { %4284 = vmatprep.subr.mxu0 %v5000_v0  ;;  %4295 = vmatprep.subr.mxu1 %v5000_v0  ;;  %v5047_v1 = vld [vmem:[%s6152_s2 + $0x18] sm:$0xff]  ;;  %v5057_v3 = vld [vmem:[%s6152_s2 + $0x10] sm:$0xff]  ;;  %v5071_v5 = vld [vmem:[%s6152_s2 + $0x8] sm:$0xff] }
   0x2   :  { %v5052_v2 = vld [vmem:[%s6152_s2 + $0x38] sm:$0xff]  ;;  %4285 = vmatpush3.msra.mxu0 %v5047_v1  ;;  %v5064_v4 = vld [vmem:[%s6152_s2 + $0x30] sm:$0xff]  ;;  %v5076_v6 = vld [vmem:[%s6152_s2 + $0x28] sm:$0xff]  ;;  %4292 = vmatprep.mubr.msk.f32.mxu0 %vm5001_vm0, %v5000_v0 }
   0x3   :  { %4296 = vmatpush3.msra.mxu1 %v5052_v2  ;;  %4286 = vmatprep.subr.mxu0 %v5000_v0  ;;  %v5085_v7 = vld [vmem:[%s6152_s2] sm:$0xff]  ;;  %v5105_v9 = vld [vmem:[%s6153_s3 + $0x18] sm:$0xff]  ;;  %v5118_v11 = vld [vmem:[%s6153_s3 + $0x10] sm:$0xff] }
   0x4   :  { %4297 = vmatprep.subr.mxu1 %v5000_v0  ;;  %4287 = vmatpush3.msra.mxu0 %v5057_v3  ;;  %v5092_v8 = vld [vmem:[%s6152_s2 + $0x20] sm:$0xff]  ;;  %v5110_v10 = vld [vmem:[%s6152_s2 + $0x58] sm:$0xff]  ;;  %v5126_v12 = vld [vmem:[%s6152_s2 + $0x50] sm:$0xff] }
   0x5   :  { %4298 = vmatpush3.msra.mxu1 %v5064_v4  ;;  %4288 = vmatprep.subr.mxu0 %v5000_v0  ;;  %v5132_v13 = vld [vmem:[%s6153_s3 + $0x8] sm:$0xff]  ;;  %v5147_v15 = vld [vmem:[%s6153_s3] sm:$0xff]  ;;  %v5166_v17 = vld [vmem:[%s6153_s3 + $0x38] sm:$0xff] }
   0x6   :  { %4299 = vmatprep.subr.mxu1 %v5000_v0  ;;  %4289 = vmatpush3.msra.mxu0 %v5071_v5  ;;  %v5141_v14 = vld [vmem:[%s6152_s2 + $0x48] sm:$0xff]  ;;  %v5155_v16 = vld [vmem:[%s6152_s2 + $0x40] sm:$0xff]  ;;  %v5174_v18 = vld [vmem:[%s6153_s3 + $0x58] sm:$0xff] }
   0x7   :  { %4300 = vmatpush3.msra.mxu1 %v5076_v6  ;;  %4290 = vmatprep.subr.mxu0 %v5000_v0  ;;  %v5180_v19 = vld [vmem:[%s6153_s3 + $0x30] sm:$0xff]  ;;  %v5195_v21 = vld [vmem:[%s6153_s3 + $0x28] sm:$0xff]  ;;  %v5209_v23 = vld [vmem:[%s6153_s3 + $0x20] sm:$0xff] }
   0x8   :  { %4301 = vmatprep.subr.mxu1 %v5000_v0  ;;  %4291 = vmatpush3.msra.mxu0 %v5085_v7  ;;  %v5189_v20 = vld [vmem:[%s6153_s3 + $0x50] sm:$0xff]  ;;  %v5203_v22 = vld [vmem:[%s6153_s3 + $0x48] sm:$0xff]  ;;  %v5217_v24 = vld [vmem:[%s6153_s3 + $0x40] sm:$0xff] }
   0x9   :  { %4302 = vmatpush3.msra.mxu1 %v5092_v8  ;;  %4303 = vmatprep.mubr.msk.f32.mxu1 %vm5001_vm0, %v5000_v0  ;;  %v55_v25 = vld [vmem:[%s6154_s0] sm:$0x3]  ;;  %v56_v32 = vld [vmem:[%s6154_s0 + $0x2] sm:$0x3]  ;;  %v3916_v34 = vld [vmem:[%s6155_s1 + $0x2a] sm:$0x3] }
   0xa   :  { %4293 = vmatmul.mubr.f32.vlgmr.msra.gmra.mxu0 %v5000_v0  ;;  %4304 = vmatmul.mubr.f32.vlgmr.msra.gmra.mxu1 %v5000_v0  ;;  %v3917_v42 = vld [vmem:[%s6155_s1 + $0x2c] sm:$0x3]  ;;  %v5265_v54 = vld [vmem:[%s6156_s4] sm:$0x3]  ;;  %v57_v58 = vld [vmem:[%s6154_s0 + $0x4] sm:$0x3] }
   0xb   :  { %4317 = vmatprep.subr.mxu1 %v5000_v0  ;;  %4306 = vmatprep.subr.mxu0 %v5000_v0  ;;  %v5274_v62 = vld [vmem:[%s6157_s5] sm:$0x3] }
   0xc   :  { %4318 = vmatpush3.msra.mxu1 %v5105_v9  ;;  %4307 = vmatpush3.msra.mxu0 %v5110_v10 }
   0xd   :  { %4319 = vmatprep.subr.mxu1 %v5000_v0  ;;  %4325 = vmatprep.mubr.msk.f32.mxu1 %vm5001_vm0, %v5000_v0 }
   0xe   :  { %4320 = vmatpush3.msra.mxu1 %v5118_v11  ;;  %4308 = vmatprep.subr.mxu0 %v5000_v0 }
   0xf   :  { %4321 = vmatprep.subr.mxu1 %v5000_v0  ;;  %4309 = vmatpush3.msra.mxu0 %v5126_v12 }
  0x10   :  { %4322 = vmatpush3.msra.mxu1 %v5132_v13  ;;  %4310 = vmatprep.subr.mxu0 %v5000_v0 }
  0x11   :  { %4323 = vmatprep.subr.mxu1 %v5000_v0  ;;  %4311 = vmatpush3.msra.mxu0 %v5141_v14 }
  0x12   :  { %4324 = vmatpush3.msra.mxu1 %v5147_v15  ;;  %4312 = vmatprep.subr.mxu0 %v5000_v0 }
  0x13   :  { %4326 = vmatmul.mubr.f32.vlgmr.msra.gmra.mxu1 %v5000_v0  ;;  %4313 = vmatpush3.msra.mxu0 %v5155_v16 }
  0x14   :  { %4314 = vmatprep.mubr.msk.f32.mxu0 %vm5001_vm0, %v5000_v0  ;;  %4328 = vmatprep.subr.mxu0 %v5000_v0 }
  0x15   :  { %4315 = vmatmul.mubr.f32.vlgmr.msra.gmra.mxu0 %v5000_v0  ;;  %4339 = vmatprep.subr.mxu1 %v5000_v0 }
  0x16   :  { %4329 = vmatpush3.msra.mxu0 %v5166_v17  ;;  %4336 = vmatprep.mubr.msk.f32.mxu0 %vm5001_vm0, %v5000_v0 }
  0x17   :  { %4330 = vmatprep.subr.mxu0 %v5000_v0  ;;  %4340 = vmatpush3.msra.mxu1 %v5174_v18 }
  0x18   :  { %4331 = vmatpush3.msra.mxu0 %v5180_v19  ;;  %4341 = vmatprep.subr.mxu1 %v5000_v0 }
  0x19   :  { %4332 = vmatprep.subr.mxu0 %v5000_v0  ;;  %4342 = vmatpush3.msra.mxu1 %v5189_v20 }
  0x1a   :  { %4333 = vmatpush3.msra.mxu0 %v5195_v21  ;;  %4343 = vmatprep.subr.mxu1 %v5000_v0 }
  0x1b   :  { %4334 = vmatprep.subr.mxu0 %v5000_v0  ;;  %4344 = vmatpush3.msra.mxu1 %v5203_v22 }
  0x1c   :  { %4335 = vmatpush3.msra.mxu0 %v5209_v23  ;;  %4345 = vmatprep.subr.mxu1 %v5000_v0 }
  0x1d   :  { %4337 = vmatmul.mubr.f32.vlgmr.msra.gmra.mxu0 %v5000_v0  ;;  %4346 = vmatpush3.msra.mxu1 %v5217_v24 }
  0x1e   :  { %4347 = vmatprep.mubr.msk.f32.mxu1 %vm5001_vm0, %v5000_v0  ;;  %4350 = vmatprep.subr.mxu0 %v5000_v0 }
  0x1f   :  { %4348 = vmatmul.mubr.f32.vlgmr.msra.gmra.mxu1 %v5000_v0  ;;  %4361 = vmatprep.subr.mxu1 %v5000_v0 }
  0x20   :  { %4351 = vmatpush3.msra.mxu0 %v5047_v1  ;;  %4362 = vmatpush3.msra.mxu1 %v5052_v2 }
  0x21   :  { %4352 = vmatprep.subr.mxu0 %v5000_v0  ;;  %4363 = vmatprep.subr.mxu1 %v5000_v0 }
  0x22   :  { %4353 = vmatpush3.msra.mxu0 %v5057_v3  ;;  %4364 = vmatpush3.msra.mxu1 %v5064_v4 }
  0x23   :  { %4354 = vmatprep.subr.mxu0 %v5000_v0  ;;  %4365 = vmatprep.subr.mxu1 %v5000_v0 }
  0x24   :  { %4355 = vmatpush3.msra.mxu0 %v5071_v5  ;;  %4366 = vmatpush3.msra.mxu1 %v5076_v6 }
  0x25   :  { %4356 = vmatprep.subr.mxu0 %v5000_v0  ;;  %4367 = vmatprep.subr.mxu1 %v5000_v0 }
  0x26   :  { %4357 = vmatpush3.msra.mxu0 %v5085_v7  ;;  %4368 = vmatpush3.msra.mxu1 %v5092_v8 }
  0x27   :  { %4358 = vmatprep.mubr.msk.f32.mxu0 %vm5001_vm0, %v5000_v0  ;;  %4369 = vmatprep.mubr.msk.f32.mxu1 %vm5001_vm0, %v5000_v0 }
  0x28   :  { %4372 = vmatprep.subr.mxu0 %v5000_v0  ;;  %4383 = vmatprep.subr.mxu1 %v5000_v0 }
  0xca   :  { %v128_v26 = vpop.f32.mrf.mxu0  ;;  %v198_v27 = vpop.f32.mrf.mxu1 }
  0xcb   :  { %v272_v28 = vadd.f32 %v128_v26, %v55_v25  ;;  %v279_v33 = vadd.f32 %v198_v27, %v56_v32  ;;  %v3918_v27 = vld [vmem:[%s6155_s1 + $0x2e] sm:$0x3] }
  0xcc   :  { %v4294_v29 = vpop.f32.mrf.mxu0  ;;  %v4305_v30 = vpop.f32.mrf.mxu1 }
  0xcd   :  { %v3914_v31 = vmul.f32 -1.442695, %v272_v28  ;;  %v3915_v37 = vmul.f32 -1.442695, %v279_v33 }
  0xcf   :  { %4814 = vpow2.f32 %v3914_v31 }
  0xd3   :  { %v365_v35 = vpop.f32.mrf.mxu1 }
  0xd4   :  { %v509_v36 = vadd.f32 %v3916_v34, %v365_v35 }
  0xd5   :  { %v4327_v38 = vpop.f32.mrf.mxu1  ;;  %v268_v39 = vpop.f32.mrf.mxu0 }
  0xd6   :  { %v3919_v40 = vmul.f32 -1.442695, %v509_v36  ;;  %v269_v56 = vadd.f32 %v268_v39, %v5265_v54 }
  0xd7   :  { %v4316_v41 = vpop.f32.mrf.mxu0 }
  0xd8   :  { %4816 = vpow2.f32 %v3919_v40 }
  0xd9   :  { %4818 = vpow2.f32 %v3915_v37 }
  0xdc   :  { %v4815_v43 = vpop.eup %4814 }
  0xdd   :  { %v276_v44 = vadd.f32 1.0, %v4815_v43  ;;  %v435_v45 = vpop.f32.mrf.mxu0 }
  0xde   :  { %v516_v46 = vadd.f32 %v3917_v42, %v435_v45  ;;  %v3922_v42 = vld [vmem:[%s6154_s0 + $0x6] sm:$0x3] }
  0xdf   :  { %4820 = vrcp.f32 %v276_v44  ;;  %v4338_v47 = vpop.f32.mrf.mxu0  ;;  %v505_v48 = vpop.f32.mrf.mxu1 }
  0xe0   :  { %v3920_v49 = vmul.f32 -1.442695, %v516_v46  ;;  %v506_v25 = vadd.f32 %v505_v48, %v5274_v62 }
  0xe1   :  { %v4349_v50 = vpop.f32.mrf.mxu1 }
  0xe2   :  { %4822 = vpow2.f32 %v3920_v49  ;;  %v3923_v49 = vld [vmem:[%s6154_s0 + $0x8] sm:$0x3] }
  0xe5   :  { %v4817_v51 = vpop.eup %4816 }
  0xe6   :  { %v4819_v52 = vpop.eup %4818  ;;  %v513_v53 = vadd.f32 1.0, %v4817_v51 }
  0xe7   :  { %v283_v55 = vadd.f32 1.0, %v4819_v52  ;;  %v3931_v52 = vld [vmem:[%s6155_s1 + $0x24] sm:$0x3] }
  0xe8   :  { %4824 = vrcp.f32 %v513_v53 }
  0xe9   :  { %4826 = vrcp.f32 %v283_v55 }
  0xec   :  { %v4821_v57 = vpop.eup %4820 }
  0xed   :  { %v286_v59 = vmul.f32 %v4821_v57, %v269_v56 }
  0xef   :  { %v4823_v60 = vpop.eup %4822  ;;  %v287_v61 = vadd.f32 %v286_v59, %v57_v58 }
  0xf0   :  { %v520_v63 = vadd.f32 1.0, %v4823_v60  ;;  %v3932_v60 = vld [vmem:[%s6155_s1 + $0x26] sm:$0x3] }
  0xf1   :  { %4828 = vtanh.f32 %v287_v61 }
  0xf2   :  { %4830 = vrcp.f32 %v520_v63 }
  0xf5   :  { %v4825_v26 = vpop.eup %4824 }
  0xf6   :  { %v523_v28 = vmul.f32 %v4825_v26, %v506_v25  ;;  %v4827_v30 = vpop.eup %4826 }
  0xf7   :  { %v289_v31 = vsub.f32 1.0, %v4827_v30  ;;  %v291_v34 = vmul.f32 0.0, %v4827_v30 }
  0xf8   :  { %v524_v29 = vadd.f32 %v3918_v27, %v523_v28 }
  0xfa   :  { %4832 = vtanh.f32 %v524_v29 }
  0xfe   :  { %v4829_v32 = vpop.eup %4828 }
  0xff   :  { %v290_v33 = vmul.f32 %v4829_v32, %v289_v31  ;;  %v4831_v35 = vpop.eup %4830 }
 0x100   :  { %v526_v37 = vsub.f32 1.0, %v4831_v35  ;;  %v528_v40 = vmul.f32 0.0, %v4831_v35 }
 0x101   :  { %v5280_v36 = vadd.f32 %v291_v34, %v290_v33 }
 0x103   :  { %294 = vst.msk [vmem:[%s6158_s6] sm:$0x3] %vm293_vm2, %v5280_v36  ;;  %4359 = vmatmul.mubr.msk.f32.vlgmr.msra.gmra.mxu0 %vm58_vm1, %v5280_v36  ;;  %4370 = vmatmul.mubr.msk.f32.vlgmr.msra.gmra.mxu1 %vm58_vm1, %v5280_v36 }
 0x104   :  { %4373 = vmatpush3.msra.mxu0 %v5110_v10  ;;  %4384 = vmatpush3.msra.mxu1 %v5105_v9 }
 0x105   :  { %4374 = vmatprep.subr.mxu0 %v5000_v0  ;;  %4385 = vmatprep.subr.mxu1 %v5000_v0 }
 0x106   :  { %4375 = vmatpush3.msra.mxu0 %v5126_v12  ;;  %4386 = vmatpush3.msra.mxu1 %v5118_v11 }
 0x107   :  { %v4833_v38 = vpop.eup %4832  ;;  %4376 = vmatprep.subr.mxu0 %v5000_v0  ;;  %4387 = vmatprep.subr.mxu1 %v5000_v0 }
 0x108   :  { %4377 = vmatpush3.msra.mxu0 %v5141_v14  ;;  %4388 = vmatpush3.msra.mxu1 %v5132_v13  ;;  %v527_v39 = vmul.f32 %v4833_v38, %v526_v37  ;;  %v3924_v38 = vld [vmem:[%s6154_s0 + $0xa] sm:$0x3] }
 0x109   :  { %4378 = vmatprep.subr.mxu0 %v5000_v0  ;;  %4389 = vmatprep.subr.mxu1 %v5000_v0 }
 0x10a   :  { %4379 = vmatpush3.msra.mxu0 %v5155_v16  ;;  %4380 = vmatprep.mubr.msk.f32.mxu0 %vm5001_vm0, %v5000_v0  ;;  %v5306_v41 = vadd.f32 %v528_v40, %v527_v39 }
 0x10b   :  { %4390 = vmatpush3.msra.mxu1 %v5147_v15  ;;  %4381 = vmatmul.mubr.msk.f32.vlgmr.msra.gmra.mxu0 %vm58_vm1, %v5280_v36 }
 0x10c   :  { %4391 = vmatprep.mubr.msk.f32.mxu1 %vm5001_vm0, %v5000_v0  ;;  %4394 = vmatprep.subr.mxu0 %v5000_v0  ;;  %3921 = vst.msk [vmem:[%s6159_s7 + $0xe] sm:$0x3] %vm293_vm2, %v5306_v41 }
 0x10d   :  { %4405 = vmatprep.subr.mxu1 %v5000_v0  ;;  %4392 = vmatmul.mubr.msk.f32.vlgmr.msra.gmra.mxu1 %vm58_vm1, %v5306_v41 }
 0x10e   :  { %4395 = vmatpush3.msra.mxu0 %v5166_v17  ;;  %4406 = vmatpush3.msra.mxu1 %v5174_v18 }
 0x10f   :  { %4396 = vmatprep.subr.mxu0 %v5000_v0  ;;  %4407 = vmatprep.subr.mxu1 %v5000_v0 }
 0x110   :  { %4397 = vmatpush3.msra.mxu0 %v5180_v19  ;;  %4408 = vmatpush3.msra.mxu1 %v5189_v20 }
 0x111   :  { %4398 = vmatprep.subr.mxu0 %v5000_v0  ;;  %4409 = vmatprep.subr.mxu1 %v5000_v0 }
 0x112   :  { %4399 = vmatpush3.msra.mxu0 %v5195_v21  ;;  %4410 = vmatpush3.msra.mxu1 %v5203_v22 }
 0x113   :  { %4400 = vmatprep.subr.mxu0 %v5000_v0  ;;  %4411 = vmatprep.subr.mxu1 %v5000_v0 }
 0x114   :  { %4401 = vmatpush3.msra.mxu0 %v5209_v23  ;;  %4402 = vmatprep.mubr.msk.f32.mxu0 %vm5001_vm0, %v5000_v0 }
 0x115   :  { %4412 = vmatpush3.msra.mxu1 %v5217_v24  ;;  %4413 = vmatprep.mubr.msk.f32.mxu1 %vm5001_vm0, %v5000_v0 }
 0x116   :  { %4403 = vmatmul.mubr.msk.f32.vlgmr.msra.gmra.mxu0 %vm58_vm1, %v5306_v41  ;;  %4414 = vmatmul.mubr.msk.f32.vlgmr.msra.gmra.mxu1 %vm58_vm1, %v5306_v41 }
 0x117   :  { %4416 = vmatprep.subr.mxu0 %v5000_v0  ;;  %4427 = vmatprep.subr.mxu1 %v5000_v0 }
 0x118   :  { %4417 = vmatpush3.msra.mxu0 %v5047_v1  ;;  %4428 = vmatpush3.msra.mxu1 %v5052_v2 }
 0x119   :  { %4418 = vmatprep.subr.mxu0 %v5000_v0  ;;  %4429 = vmatprep.subr.mxu1 %v5000_v0 }
 0x11a   :  { %4419 = vmatpush3.msra.mxu0 %v5057_v3  ;;  %4430 = vmatpush3.msra.mxu1 %v5064_v4 }
 0x11b   :  { %4420 = vmatprep.subr.mxu0 %v5000_v0  ;;  %4431 = vmatprep.subr.mxu1 %v5000_v0 }
 0x11c   :  { %4421 = vmatpush3.msra.mxu0 %v5071_v5  ;;  %4432 = vmatpush3.msra.mxu1 %v5076_v6 }
 0x11d   :  { %4422 = vmatprep.subr.mxu0 %v5000_v0  ;;  %4433 = vmatprep.subr.mxu1 %v5000_v0 }
 0x11e   :  { %4423 = vmatpush3.msra.mxu0 %v5085_v7  ;;  %4434 = vmatpush3.msra.mxu1 %v5092_v8 }
 0x11f   :  { %4424 = vmatprep.mubr.msk.f32.mxu0 %vm5001_vm0, %v5000_v0  ;;  %4435 = vmatprep.mubr.msk.f32.mxu1 %vm5001_vm0, %v5000_v0 }
 0x120   :  { %4438 = vmatprep.subr.mxu0 %v5000_v0  ;;  %4449 = vmatprep.subr.mxu1 %v5000_v0 }
 0x1c3   :  { %v605_v43 = vpop.f32.mrf.mxu0  ;;  %v675_v44 = vpop.f32.mrf.mxu1 }
 0x1c4   :  { %v749_v45 = vadd.f32 %v3922_v42, %v605_v43  ;;  %v756_v50 = vadd.f32 %v3923_v49, %v675_v44 }
 0x1c5   :  { %v4360_v46 = vpop.f32.mrf.mxu0  ;;  %v4371_v47 = vpop.f32.mrf.mxu1 }
 0x1c6   :  { %v3928_v48 = vmul.f32 -1.442695, %v749_v45  ;;  %v3929_v53 = vmul.f32 -1.442695, %v756_v50  ;;  %v3933_v46 = vld [vmem:[%s6155_s1 + $0x28] sm:$0x3] }
 0x1c8   :  { %4834 = vpow2.f32 %v3928_v48 }
 0x1c9   :  { %4836 = vpow2.f32 %v3929_v53 }
 0x1cb   :  { %v745_v51 = vpop.f32.mrf.mxu0 }
 0x1cc   :  { %v746_v35 = vadd.f32 %v745_v51, %v5265_v54 }
 0x1cd   :  { %v845_v55 = vpop.f32.mrf.mxu1  ;;  %v4382_v56 = vpop.f32.mrf.mxu0 }
 0x1ce   :  { %v989_v57 = vadd.f32 %v3931_v52, %v845_v55 }
 0x1cf   :  { %v4393_v58 = vpop.f32.mrf.mxu1 }
 0x1d0   :  { %v3937_v59 = vmul.f32 -1.442695, %v989_v57 }
 0x1d2   :  { %4838 = vpow2.f32 %v3937_v59 }
 0x1d5   :  { %v4835_v61 = vpop.eup %4834 }
 0x1d6   :  { %v753_v63 = vadd.f32 1.0, %v4835_v61  ;;  %v915_v25 = vpop.f32.mrf.mxu0  ;;  %v985_v26 = vpop.f32.mrf.mxu1 }
 0x1d7   :  { %v996_v27 = vadd.f32 %v3932_v60, %v915_v25  ;;  %v4837_v31 = vpop.eup %4836  ;;  %v986_v44 = vadd.f32 %v985_v26, %v5274_v62 }
 0x1d8   :  { %4840 = vrcp.f32 %v753_v63  ;;  %v4404_v28 = vpop.f32.mrf.mxu0  ;;  %v4415_v29 = vpop.f32.mrf.mxu1  ;;  %v760_v34 = vadd.f32 1.0, %v4837_v31 }
 0x1d9   :  { %v3938_v30 = vmul.f32 -1.442695, %v996_v27  ;;  %v3941_v29 = vld [vmem:[%s6154_s0 + $0xe] sm:$0x3] }
 0x1db   :  { %4842 = vpow2.f32 %v3938_v30 }
 0x1df   :  { %v4839_v32 = vpop.eup %4838 }
 0x1e0   :  { %v993_v33 = vadd.f32 1.0, %v4839_v32  ;;  %v3949_v32 = vld [vmem:[%s6155_s1 + $0x1e] sm:$0x3] }
 0x1e2   :  { %4844 = vrcp.f32 %v993_v33 }
 0x1e3   :  { %4846 = vrcp.f32 %v760_v34 }
 0x1e5   :  { %v4841_v37 = vpop.eup %4840 }
 0x1e6   :  { %v763_v39 = vmul.f32 %v4841_v37, %v746_v35 }
 0x1e8   :  { %v764_v40 = vadd.f32 %v3924_v38, %v763_v39  ;;  %v4843_v42 = vpop.eup %4842 }
 0x1e9   :  { %v1000_v43 = vadd.f32 1.0, %v4843_v42 }
 0x1ea   :  { %4848 = vtanh.f32 %v764_v40  ;;  %v3950_v40 = vld [vmem:[%s6155_s1 + $0x20] sm:$0x3] }
 0x1eb   :  { %4850 = vrcp.f32 %v1000_v43 }
 0x1ef   :  { %v4845_v45 = vpop.eup %4844 }
 0x1f0   :  { %v1003_v47 = vmul.f32 %v4845_v45, %v986_v44  ;;  %v4847_v49 = vpop.eup %4846 }
 0x1f1   :  { %v766_v50 = vsub.f32 1.0, %v4847_v49  ;;  %v768_v53 = vmul.f32 %v4847_v49, %v5280_v36 }
 0x1f2   :  { %v1004_v48 = vadd.f32 %v3933_v46, %v1003_v47 }
 0x1f4   :  { %4852 = vtanh.f32 %v1004_v48 }
 0x1f7   :  { %v4849_v51 = vpop.eup %4848 }
 0x1f8   :  { %v767_v52 = vmul.f32 %v4849_v51, %v766_v50  ;;  %v4851_v56 = vpop.eup %4850 }
 0x1f9   :  { %v1006_v36 = vsub.f32 1.0, %v4851_v56  ;;  %v1008_v59 = vmul.f32 %v4851_v56, %v5306_v41  ;;  %v3940_v41 = vld [vmem:[%s6154_s0 + $0xc] sm:$0x3] }
 0x1fa   :  { %v5387_v55 = vadd.f32 %v768_v53, %v767_v52 }
 0x1fc   :  { %3930 = vst.msk [vmem:[%s6158_s6 + $0x2] sm:$0x3] %vm293_vm2, %v5387_v55  ;;  %4425 = vmatmul.mubr.msk.f32.vlgmr.msra.gmra.mxu0 %vm58_vm1, %v5387_v55  ;;  %4436 = vmatmul.mubr.msk.f32.vlgmr.msra.gmra.mxu1 %vm58_vm1, %v5387_v55 }
 0x1fd   :  { %4439 = vmatpush3.msra.mxu0 %v5110_v10  ;;  %4450 = vmatpush3.msra.mxu1 %v5105_v9 }
 0x1fe   :  { %4440 = vmatprep.subr.mxu0 %v5000_v0  ;;  %4451 = vmatprep.subr.mxu1 %v5000_v0 }
 0x1ff   :  { %4441 = vmatpush3.msra.mxu0 %v5126_v12  ;;  %4452 = vmatpush3.msra.mxu1 %v5118_v11 }
 0x200   :  { %4442 = vmatprep.subr.mxu0 %v5000_v0  ;;  %4453 = vmatprep.subr.mxu1 %v5000_v0 }
 0x201   :  { %v4853_v57 = vpop.eup %4852  ;;  %4443 = vmatpush3.msra.mxu0 %v5141_v14  ;;  %4454 = vmatpush3.msra.mxu1 %v5132_v13 }
 0x202   :  { %4444 = vmatprep.subr.mxu0 %v5000_v0  ;;  %4455 = vmatprep.subr.mxu1 %v5000_v0  ;;  %v1007_v58 = vmul.f32 %v4853_v57, %v1006_v36  ;;  %v3942_v57 = vld [vmem:[%s6154_s0 + $0x10] sm:$0x3] }
 0x203   :  { %4445 = vmatpush3.msra.mxu0 %v5155_v16  ;;  %4446 = vmatprep.mubr.msk.f32.mxu0 %vm5001_vm0, %v5000_v0 }
 0x204   :  { %4456 = vmatpush3.msra.mxu1 %v5147_v15  ;;  %4447 = vmatmul.mubr.msk.f32.vlgmr.msra.gmra.mxu0 %vm58_vm1, %v5387_v55  ;;  %v5417_v60 = vadd.f32 %v1008_v59, %v1007_v58 }
 0x205   :  { %4457 = vmatprep.mubr.msk.f32.mxu1 %vm5001_vm0, %v5000_v0  ;;  %4460 = vmatprep.subr.mxu0 %v5000_v0 }
 0x206   :  { %4471 = vmatprep.subr.mxu1 %v5000_v0  ;;  %3939 = vst.msk [vmem:[%s6159_s7 + $0xc] sm:$0x3] %vm293_vm2, %v5417_v60  ;;  %4458 = vmatmul.mubr.msk.f32.vlgmr.msra.gmra.mxu1 %vm58_vm1, %v5417_v60 }
 0x207   :  { %4461 = vmatpush3.msra.mxu0 %v5166_v17  ;;  %4472 = vmatpush3.msra.mxu1 %v5174_v18 }
 0x208   :  { %4462 = vmatprep.subr.mxu0 %v5000_v0  ;;  %4473 = vmatprep.subr.mxu1 %v5000_v0 }
 0x209   :  { %4463 = vmatpush3.msra.mxu0 %v5180_v19  ;;  %4474 = vmatpush3.msra.mxu1 %v5189_v20 }
 0x20a   :  { %4464 = vmatprep.subr.mxu0 %v5000_v0  ;;  %4475 = vmatprep.subr.mxu1 %v5000_v0 }
 0x20b   :  { %4465 = vmatpush3.msra.mxu0 %v5195_v21  ;;  %4476 = vmatpush3.msra.mxu1 %v5203_v22 }
 0x20c   :  { %4466 = vmatprep.subr.mxu0 %v5000_v0  ;;  %4477 = vmatprep.subr.mxu1 %v5000_v0 }
 0x20d   :  { %4467 = vmatpush3.msra.mxu0 %v5209_v23  ;;  %4468 = vmatprep.mubr.msk.f32.mxu0 %vm5001_vm0, %v5000_v0 }
 0x20e   :  { %4478 = vmatpush3.msra.mxu1 %v5217_v24  ;;  %4479 = vmatprep.mubr.msk.f32.mxu1 %vm5001_vm0, %v5000_v0 }
 0x20f   :  { %4469 = vmatmul.mubr.msk.f32.vlgmr.msra.gmra.mxu0 %vm58_vm1, %v5417_v60  ;;  %4480 = vmatmul.mubr.msk.f32.vlgmr.msra.gmra.mxu1 %vm58_vm1, %v5417_v60 }
 0x210   :  { %4482 = vmatprep.subr.mxu0 %v5000_v0  ;;  %4493 = vmatprep.subr.mxu1 %v5000_v0 }
 0x211   :  { %4483 = vmatpush3.msra.mxu0 %v5047_v1  ;;  %4494 = vmatpush3.msra.mxu1 %v5052_v2 }
 0x212   :  { %4484 = vmatprep.subr.mxu0 %v5000_v0  ;;  %4495 = vmatprep.subr.mxu1 %v5000_v0 }
 0x213   :  { %4485 = vmatpush3.msra.mxu0 %v5057_v3  ;;  %4496 = vmatpush3.msra.mxu1 %v5064_v4 }
 0x214   :  { %4486 = vmatprep.subr.mxu0 %v5000_v0  ;;  %4497 = vmatprep.subr.mxu1 %v5000_v0 }
 0x215   :  { %4487 = vmatpush3.msra.mxu0 %v5071_v5  ;;  %4498 = vmatpush3.msra.mxu1 %v5076_v6 }
 0x216   :  { %4488 = vmatprep.subr.mxu0 %v5000_v0  ;;  %4499 = vmatprep.subr.mxu1 %v5000_v0 }
 0x217   :  { %4489 = vmatpush3.msra.mxu0 %v5085_v7  ;;  %4500 = vmatpush3.msra.mxu1 %v5092_v8 }
 0x218   :  { %4490 = vmatprep.mubr.msk.f32.mxu0 %vm5001_vm0, %v5000_v0  ;;  %4501 = vmatprep.mubr.msk.f32.mxu1 %vm5001_vm0, %v5000_v0 }
 0x219   :  { %4504 = vmatprep.subr.mxu0 %v5000_v0  ;;  %4515 = vmatprep.subr.mxu1 %v5000_v0 }
 0x2bc   :  { %v1085_v61 = vpop.f32.mrf.mxu0  ;;  %v1155_v63 = vpop.f32.mrf.mxu1 }
 0x2bd   :  { %v1229_v25 = vadd.f32 %v3940_v41, %v1085_v61  ;;  %v1236_v30 = vadd.f32 %v3941_v29, %v1155_v63 }
 0x2be   :  { %v4426_v26 = vpop.f32.mrf.mxu0  ;;  %v4437_v27 = vpop.f32.mrf.mxu1 }
 0x2bf   :  { %v3946_v28 = vmul.f32 -1.442695, %v1229_v25  ;;  %v3947_v33 = vmul.f32 -1.442695, %v1236_v30  ;;  %v3951_v26 = vld [vmem:[%s6155_s1 + $0x22] sm:$0x3] }
 0x2c1   :  { %4854 = vpow2.f32 %v3946_v28 }
 0x2c2   :  { %4856 = vpow2.f32 %v3947_v33 }
 0x2c4   :  { %v1225_v31 = vpop.f32.mrf.mxu0 }
 0x2c5   :  { %v1226_v56 = vadd.f32 %v1225_v31, %v5265_v54 }
 0x2c6   :  { %v1325_v34 = vpop.f32.mrf.mxu1  ;;  %v4448_v35 = vpop.f32.mrf.mxu0 }
 0x2c7   :  { %v1469_v37 = vadd.f32 %v3949_v32, %v1325_v34 }
 0x2c8   :  { %v4459_v38 = vpop.f32.mrf.mxu1 }
 0x2c9   :  { %v3955_v39 = vmul.f32 -1.442695, %v1469_v37 }
 0x2cb   :  { %4858 = vpow2.f32 %v3955_v39 }
 0x2ce   :  { %v4855_v42 = vpop.eup %4854 }
 0x2cf   :  { %v1233_v43 = vadd.f32 1.0, %v4855_v42  ;;  %v1395_v44 = vpop.f32.mrf.mxu0  ;;  %v1465_v45 = vpop.f32.mrf.mxu1 }
 0x2d0   :  { %v1476_v46 = vadd.f32 %v3950_v40, %v1395_v44  ;;  %v4857_v50 = vpop.eup %4856  ;;  %v1466_v63 = vadd.f32 %v1465_v45, %v5274_v62 }
 0x2d1   :  { %4860 = vrcp.f32 %v1233_v43  ;;  %v4470_v47 = vpop.f32.mrf.mxu0  ;;  %v4481_v48 = vpop.f32.mrf.mxu1  ;;  %v1240_v53 = vadd.f32 1.0, %v4857_v50 }
 0x2d2   :  { %v3956_v49 = vmul.f32 -1.442695, %v1476_v46 }
 0x2d4   :  { %4862 = vpow2.f32 %v3956_v49  ;;  %v3960_v49 = vld [vmem:[%s6154_s0 + $0x16] sm:$0x3] }
 0x2d8   :  { %v4859_v51 = vpop.eup %4858 }
 0x2d9   :  { %v1473_v52 = vadd.f32 1.0, %v4859_v51 }
 0x2db   :  { %4864 = vrcp.f32 %v1473_v52 }
 0x2dc   :  { %4866 = vrcp.f32 %v1240_v53 }
 0x2de   :  { %v4861_v36 = vpop.eup %4860 }
 0x2df   :  { %v1243_v58 = vmul.f32 %v4861_v36, %v1226_v56 }
 0x2e1   :  { %v1244_v59 = vadd.f32 %v3942_v57, %v1243_v58  ;;  %v4863_v41 = vpop.eup %4862  ;;  %v3969_v57 = vld [vmem:[%s6155_s1 + $0x1c] sm:$0x3] }
 0x2e2   :  { %v1480_v61 = vadd.f32 1.0, %v4863_v41 }
 0x2e3   :  { %4868 = vtanh.f32 %v1244_v59 }
 0x2e4   :  { %4870 = vrcp.f32 %v1480_v61 }
 0x2e8   :  { %v4865_v25 = vpop.eup %4864 }
 0x2e9   :  { %v1483_v27 = vmul.f32 %v4865_v25, %v1466_v63  ;;  %v4867_v29 = vpop.eup %4866 }
 0x2ea   :  { %v1246_v30 = vsub.f32 1.0, %v4867_v29  ;;  %v1248_v33 = vmul.f32 %v4867_v29, %v5387_v55  ;;  %v5623_v29 = vld [vmem:[%s6153_s3 + $0x18] sm:$0xff] }
 0x2eb   :  { %v1484_v28 = vadd.f32 %v3951_v26, %v1483_v27 }
 0x2ed   :  { %4872 = vtanh.f32 %v1484_v28  ;;  %v5617_v28 = vld [vmem:[%s6152_s2 + $0x58] sm:$0xff] }
 0x2f0   :  { %v4869_v31 = vpop.eup %4868 }
 0x2f1   :  { %v1247_v32 = vmul.f32 %v4869_v31, %v1246_v30  ;;  %v4871_v35 = vpop.eup %4870  ;;  %v5631_v30 = vld [vmem:[%s6152_s2 + $0x50] sm:$0xff] }
 0x2f2   :  { %v1486_v55 = vsub.f32 1.0, %v4871_v35  ;;  %v5637_v31 = vld [vmem:[%s6153_s3 + $0x10] sm:$0xff] }
 0x2f3   :  { %v5495_v34 = vadd.f32 %v1248_v33, %v1247_v32 }
 0x2f5   :  { %3948 = vst.msk [vmem:[%s6158_s6 + $0x4] sm:$0x3] %vm293_vm2, %v5495_v34  ;;  %4491 = vmatmul.mubr.msk.f32.vlgmr.msra.gmra.mxu0 %vm58_vm1, %v5495_v34  ;;  %4502 = vmatmul.mubr.msk.f32.vlgmr.msra.gmra.mxu1 %vm58_vm1, %v5495_v34 }
 0x2f6   :  { %4505 = vmatpush3.msra.mxu0 %v5110_v10  ;;  %4516 = vmatpush3.msra.mxu1 %v5105_v9  ;;  %v1488_v10 = vmul.f32 %v4871_v35, %v5417_v60  ;;  %v5651_v35 = vld [vmem:[%s6153_s3 + $0x8] sm:$0xff] }
 0x2f7   :  { %4506 = vmatprep.subr.mxu0 %v5000_v0  ;;  %4517 = vmatprep.subr.mxu1 %v5000_v0 }
 0x2f8   :  { %4507 = vmatpush3.msra.mxu0 %v5126_v12  ;;  %4518 = vmatpush3.msra.mxu1 %v5118_v11 }
 0x2f9   :  { %4508 = vmatprep.subr.mxu0 %v5000_v0  ;;  %4519 = vmatprep.subr.mxu1 %v5000_v0 }
 0x2fa   :  { %v4873_v37 = vpop.eup %4872  ;;  %4509 = vmatpush3.msra.mxu0 %v5141_v14  ;;  %4520 = vmatpush3.msra.mxu1 %v5132_v13  ;;  %v3967_v14 = vld [vmem:[%s6155_s1 + $0x18] sm:$0x3] }
 0x2fb   :  { %4510 = vmatprep.subr.mxu0 %v5000_v0  ;;  %4521 = vmatprep.subr.mxu1 %v5000_v0  ;;  %v1487_v9 = vmul.f32 %v4873_v37, %v1486_v55 }
 0x2fc   :  { %4511 = vmatpush3.msra.mxu0 %v5155_v16  ;;  %4512 = vmatprep.mubr.msk.f32.mxu0 %vm5001_vm0, %v5000_v0 }
 0x2fd   :  { %4522 = vmatpush3.msra.mxu1 %v5147_v15  ;;  %4513 = vmatmul.mubr.msk.f32.vlgmr.msra.gmra.mxu0 %vm58_vm1, %v5495_v34  ;;  %v5525_v11 = vadd.f32 %v1488_v10, %v1487_v9  ;;  %v5660_v9 = vld [vmem:[%s6152_s2 + $0x40] sm:$0xff] }
 0x2fe   :  { %4523 = vmatprep.mubr.msk.f32.mxu1 %vm5001_vm0, %v5000_v0  ;;  %4526 = vmatprep.subr.mxu0 %v5000_v0  ;;  %v5668_v10 = vld [vmem:[%s6153_s3] sm:$0xff] }
 0x2ff   :  { %4537 = vmatprep.subr.mxu1 %v5000_v0  ;;  %3957 = vst.msk [vmem:[%s6159_s7 + $0xa] sm:$0x3] %vm293_vm2, %v5525_v11  ;;  %4524 = vmatmul.mubr.msk.f32.vlgmr.msra.gmra.mxu1 %vm58_vm1, %v5525_v11 }
 0x300   :  { %4527 = vmatpush3.msra.mxu0 %v5166_v17  ;;  %4538 = vmatpush3.msra.mxu1 %v5174_v18 }
 0x301   :  { %4528 = vmatprep.subr.mxu0 %v5000_v0  ;;  %4539 = vmatprep.subr.mxu1 %v5000_v0 }
 0x302   :  { %4529 = vmatpush3.msra.mxu0 %v5180_v19  ;;  %4540 = vmatpush3.msra.mxu1 %v5189_v20 }
 0x303   :  { %4530 = vmatprep.subr.mxu0 %v5000_v0  ;;  %4541 = vmatprep.subr.mxu1 %v5000_v0 }
 0x304   :  { %4531 = vmatpush3.msra.mxu0 %v5195_v21  ;;  %4542 = vmatpush3.msra.mxu1 %v5203_v22  ;;  %v3968_v21 = vld [vmem:[%s6155_s1 + $0x1a] sm:$0x3] }
 0x305   :  { %4532 = vmatprep.subr.mxu0 %v5000_v0  ;;  %4543 = vmatprep.subr.mxu1 %v5000_v0 }
 0x306   :  { %4533 = vmatpush3.msra.mxu0 %v5209_v23  ;;  %4534 = vmatprep.mubr.msk.f32.mxu0 %vm5001_vm0, %v5000_v0 }
 0x307   :  { %4544 = vmatpush3.msra.mxu1 %v5217_v24  ;;  %4545 = vmatprep.mubr.msk.f32.mxu1 %vm5001_vm0, %v5000_v0 }
 0x308   :  { %4535 = vmatmul.mubr.msk.f32.vlgmr.msra.gmra.mxu0 %vm58_vm1, %v5525_v11  ;;  %4546 = vmatmul.mubr.msk.f32.vlgmr.msra.gmra.mxu1 %vm58_vm1, %v5525_v11 }
 0x309   :  { %4548 = vmatprep.subr.mxu0 %v5000_v0  ;;  %4559 = vmatprep.subr.mxu1 %v5000_v0 }
 0x30a   :  { %4549 = vmatpush3.msra.mxu0 %v5047_v1  ;;  %4560 = vmatpush3.msra.mxu1 %v5052_v2  ;;  %v3958_v1 = vld [vmem:[%s6154_s0 + $0x12] sm:$0x3] }
 0x30b   :  { %4550 = vmatprep.subr.mxu0 %v5000_v0  ;;  %4561 = vmatprep.subr.mxu1 %v5000_v0 }
 0x30c   :  { %4551 = vmatpush3.msra.mxu0 %v5057_v3  ;;  %4562 = vmatpush3.msra.mxu1 %v5064_v4 }
 0x30d   :  { %4552 = vmatprep.subr.mxu0 %v5000_v0  ;;  %4563 = vmatprep.subr.mxu1 %v5000_v0 }
 0x30e   :  { %4553 = vmatpush3.msra.mxu0 %v5071_v5  ;;  %4564 = vmatpush3.msra.mxu1 %v5076_v6 }
 0x30f   :  { %4554 = vmatprep.subr.mxu0 %v5000_v0  ;;  %4565 = vmatprep.subr.mxu1 %v5000_v0 }
 0x310   :  { %4555 = vmatpush3.msra.mxu0 %v5085_v7  ;;  %4566 = vmatpush3.msra.mxu1 %v5092_v8  ;;  %v3959_v8 = vld [vmem:[%s6154_s0 + $0x14] sm:$0x3] }
 0x311   :  { %4556 = vmatprep.mubr.msk.f32.mxu0 %vm5001_vm0, %v5000_v0  ;;  %4567 = vmatprep.mubr.msk.f32.mxu1 %vm5001_vm0, %v5000_v0 }
 0x312   :  { %4570 = vmatprep.subr.mxu0 %v5000_v0  ;;  %4581 = vmatprep.subr.mxu1 %v5000_v0 }
 0x3b5   :  { %v1565_v2 = vpop.f32.mrf.mxu0  ;;  %v1635_v3 = vpop.f32.mrf.mxu1 }
 0x3b6   :  { %v1709_v4 = vadd.f32 %v3958_v1, %v1565_v2  ;;  %v1716_v12 = vadd.f32 %v3959_v8, %v1635_v3  ;;  %v5689_v1 = vld [vmem:[%s6153_s3 + $0x38] sm:$0xff]  ;;  %v5703_v3 = vld [vmem:[%s6153_s3 + $0x30] sm:$0xff]  ;;  %v5739_v8 = vld [vmem:[%s6153_s3 + $0x40] sm:$0xff] }
 0x3b7   :  { %v4492_v5 = vpop.f32.mrf.mxu0  ;;  %v4503_v6 = vpop.f32.mrf.mxu1  ;;  %v5695_v2 = vld [vmem:[%s6153_s3 + $0x58] sm:$0xff] }
 0x3b8   :  { %v3964_v7 = vmul.f32 -1.442695, %v1709_v4  ;;  %v3965_v15 = vmul.f32 -1.442695, %v1716_v12  ;;  %v5709_v4 = vld [vmem:[%s6153_s3 + $0x50] sm:$0xff]  ;;  %v5717_v5 = vld [vmem:[%s6153_s3 + $0x28] sm:$0xff] }
 0x3b9   :  { %v5723_v6 = vld [vmem:[%s6153_s3 + $0x48] sm:$0xff]  ;;  %v5753_v12 = vld [vmem:[%s6152_s2 + $0x18] sm:$0xff] }
 0x3ba   :  { %4874 = vpow2.f32 %v3964_v7  ;;  %v5731_v7 = vld [vmem:[%s6153_s3 + $0x20] sm:$0xff] }
 0x3bb   :  { %4876 = vpow2.f32 %v3965_v15  ;;  %v5773_v15 = vld [vmem:[%s6152_s2 + $0x30] sm:$0xff] }
 0x3bd   :  { %v1705_v13 = vpop.f32.mrf.mxu0 }
 0x3be   :  { %v1706_v47 = vadd.f32 %v1705_v13, %v5265_v54  ;;  %v5759_v13 = vld [vmem:[%s6152_s2 + $0x38] sm:$0xff] }
 0x3bf   :  { %v1805_v16 = vpop.f32.mrf.mxu1  ;;  %v4514_v17 = vpop.f32.mrf.mxu0 }
 0x3c0   :  { %v1949_v18 = vadd.f32 %v3967_v14, %v1805_v16  ;;  %v5767_v14 = vld [vmem:[%s6152_s2 + $0x10] sm:$0xff]  ;;  %v5781_v16 = vld [vmem:[%s6152_s2 + $0x8] sm:$0xff] }
 0x3c1   :  { %v4525_v19 = vpop.f32.mrf.mxu1  ;;  %v5787_v17 = vld [vmem:[%s6152_s2 + $0x28] sm:$0xff] }
 0x3c2   :  { %v3973_v20 = vmul.f32 -1.442695, %v1949_v18  ;;  %v5795_v18 = vld [vmem:[%s6152_s2] sm:$0xff] }
 0x3c3   :  { %v5801_v19 = vld [vmem:[%s6152_s2 + $0x20] sm:$0xff] }
 0x3c4   :  { %4878 = vpow2.f32 %v3973_v20  ;;  %v3976_v20 = vld [vmem:[%s6154_s0 + $0x18] sm:$0x3] }
 0x3c7   :  { %v4875_v22 = vpop.eup %4874 }
 0x3c8   :  { %v1713_v23 = vadd.f32 1.0, %v4875_v22  ;;  %v1875_v24 = vpop.f32.mrf.mxu0  ;;  %v1945_v60 = vpop.f32.mrf.mxu1 }
 0x3c9   :  { %v1956_v38 = vadd.f32 %v3968_v21, %v1875_v24  ;;  %v4877_v43 = vpop.eup %4876  ;;  %v1946_v56 = vadd.f32 %v1945_v60, %v5274_v62 }
 0x3ca   :  { %4880 = vrcp.f32 %v1713_v23  ;;  %v4536_v39 = vpop.f32.mrf.mxu0  ;;  %v4547_v40 = vpop.f32.mrf.mxu1  ;;  %v1720_v46 = vadd.f32 1.0, %v4877_v43  ;;  %v3985_v43 = vld [vmem:[%s6155_s1 + $0x12] sm:$0x3] }
 0x3cb   :  { %v3974_v42 = vmul.f32 -1.442695, %v1956_v38  ;;  %v3977_v39 = vld [vmem:[%s6154_s0 + $0x1a] sm:$0x3] }
 0x3cd   :  { %4882 = vpow2.f32 %v3974_v42 }
 0x3d1   :  { %v4879_v44 = vpop.eup %4878 }
 0x3d2   :  { %v1953_v45 = vadd.f32 1.0, %v4879_v44 }
 0x3d4   :  { %4884 = vrcp.f32 %v1953_v45 }
 0x3d5   :  { %4886 = vrcp.f32 %v1720_v46 }
 0x3d7   :  { %v4881_v48 = vpop.eup %4880 }
 0x3d8   :  { %v1723_v50 = vmul.f32 %v4881_v48, %v1706_v47 }
 0x3da   :  { %v1724_v51 = vadd.f32 %v3960_v49, %v1723_v50  ;;  %v4883_v52 = vpop.eup %4882  ;;  %v3986_v50 = vld [vmem:[%s6155_s1 + $0x14] sm:$0x3] }
 0x3db   :  { %v1960_v53 = vadd.f32 1.0, %v4883_v52 }
 0x3dc   :  { %4888 = vtanh.f32 %v1724_v51 }
 0x3dd   :  { %4890 = vrcp.f32 %v1960_v53 }
 0x3e1   :  { %v4885_v36 = vpop.eup %4884 }
 0x3e2   :  { %v1963_v54 = vmul.f32 %v4885_v36, %v1946_v56  ;;  %v4887_v59 = vpop.eup %4886 }
 0x3e3   :  { %v1726_v41 = vsub.f32 1.0, %v4887_v59  ;;  %v1728_v25 = vmul.f32 %v4887_v59, %v5495_v34  ;;  %v5645_v34 = vld [vmem:[%s6152_s2 + $0x48] sm:$0xff] }
 0x3e4   :  { %v1964_v58 = vadd.f32 %v3969_v57, %v1963_v54 }
 0x3e6   :  { %4892 = vtanh.f32 %v1964_v58 }
 0x3e9   :  { %v4889_v61 = vpop.eup %4888 }
 0x3ea   :  { %v1727_v63 = vmul.f32 %v4889_v61, %v1726_v41  ;;  %v4891_v27 = vpop.eup %4890 }
 0x3eb   :  { %v1966_v32 = vsub.f32 1.0, %v4891_v27  ;;  %v1968_v37 = vmul.f32 %v4891_v27, %v5525_v11 }
 0x3ec   :  { %v5603_v26 = vadd.f32 %v1728_v25, %v1727_v63  ;;  %v5825_v25 = vld [vmem:[%s6156_s4] sm:$0x3] }
 0x3ee   :  { %3966 = vst.msk [vmem:[%s6158_s6 + $0x6] sm:$0x3] %vm293_vm2, %v5603_v26  ;;  %4557 = vmatmul.mubr.msk.f32.vlgmr.msra.gmra.mxu0 %vm58_vm1, %v5603_v26  ;;  %4568 = vmatmul.mubr.msk.f32.vlgmr.msra.gmra.mxu1 %vm58_vm1, %v5603_v26 }
 0x3ef   :  { %4571 = vmatpush3.msra.mxu0 %v5617_v28  ;;  %4582 = vmatpush3.msra.mxu1 %v5623_v29 }
 0x3f0   :  { %4572 = vmatprep.subr.mxu0 %v5000_v0  ;;  %4583 = vmatprep.subr.mxu1 %v5000_v0 }
 0x3f1   :  { %4573 = vmatpush3.msra.mxu0 %v5631_v30  ;;  %4584 = vmatpush3.msra.mxu1 %v5637_v31 }
 0x3f2   :  { %4574 = vmatprep.subr.mxu0 %v5000_v0  ;;  %4585 = vmatprep.subr.mxu1 %v5000_v0 }
 0x3f3   :  { %v4893_v33 = vpop.eup %4892  ;;  %4575 = vmatpush3.msra.mxu0 %v5645_v34  ;;  %4586 = vmatpush3.msra.mxu1 %v5651_v35 }
 0x3f4   :  { %4576 = vmatprep.subr.mxu0 %v5000_v0  ;;  %4587 = vmatprep.subr.mxu1 %v5000_v0  ;;  %v1967_v55 = vmul.f32 %v4893_v33, %v1966_v32  ;;  %v3978_v33 = vld [vmem:[%s6154_s0 + $0x1c] sm:$0x3] }
 0x3f5   :  { %4577 = vmatpush3.msra.mxu0 %v5660_v9  ;;  %4578 = vmatprep.mubr.msk.f32.mxu0 %vm5001_vm0, %v5000_v0 }
 0x3f6   :  { %4588 = vmatpush3.msra.mxu1 %v5668_v10  ;;  %4579 = vmatmul.mubr.msk.f32.vlgmr.msra.gmra.mxu0 %vm58_vm1, %v5603_v26  ;;  %v5673_v11 = vadd.f32 %v1968_v37, %v1967_v55 }
 0x3f7   :  { %4589 = vmatprep.mubr.msk.f32.mxu1 %vm5001_vm0, %v5000_v0  ;;  %4592 = vmatprep.subr.mxu0 %v5000_v0 }
 0x3f8   :  { %4603 = vmatprep.subr.mxu1 %v5000_v0  ;;  %3975 = vst.msk [vmem:[%s6159_s7 + $0x8] sm:$0x3] %vm293_vm2, %v5673_v11  ;;  %4590 = vmatmul.mubr.msk.f32.vlgmr.msra.gmra.mxu1 %vm58_vm1, %v5673_v11 }
 0x3f9   :  { %4593 = vmatpush3.msra.mxu0 %v5689_v1  ;;  %4604 = vmatpush3.msra.mxu1 %v5695_v2 }
 0x3fa   :  { %4594 = vmatprep.subr.mxu0 %v5000_v0  ;;  %4605 = vmatprep.subr.mxu1 %v5000_v0 }
 0x3fb   :  { %4595 = vmatpush3.msra.mxu0 %v5703_v3  ;;  %4606 = vmatpush3.msra.mxu1 %v5709_v4 }
 0x3fc   :  { %4596 = vmatprep.subr.mxu0 %v5000_v0  ;;  %4607 = vmatprep.subr.mxu1 %v5000_v0 }
 0x3fd   :  { %4597 = vmatpush3.msra.mxu0 %v5717_v5  ;;  %4608 = vmatpush3.msra.mxu1 %v5723_v6 }
 0x3fe   :  { %4598 = vmatprep.subr.mxu0 %v5000_v0  ;;  %4609 = vmatprep.subr.mxu1 %v5000_v0 }
 0x3ff   :  { %4599 = vmatpush3.msra.mxu0 %v5731_v7  ;;  %4600 = vmatprep.mubr.msk.f32.mxu0 %vm5001_vm0, %v5000_v0 }
 0x400   :  { %4610 = vmatpush3.msra.mxu1 %v5739_v8  ;;  %4611 = vmatprep.mubr.msk.f32.mxu1 %vm5001_vm0, %v5000_v0 }
 0x401   :  { %4601 = vmatmul.mubr.msk.f32.vlgmr.msra.gmra.mxu0 %vm58_vm1, %v5673_v11  ;;  %4612 = vmatmul.mubr.msk.f32.vlgmr.msra.gmra.mxu1 %vm58_vm1, %v5673_v11 }
 0x402   :  { %4614 = vmatprep.subr.mxu0 %v5000_v0  ;;  %4625 = vmatprep.subr.mxu1 %v5000_v0 }
 0x403   :  { %4615 = vmatpush3.msra.mxu0 %v5753_v12  ;;  %4626 = vmatpush3.msra.mxu1 %v5759_v13 }
 0x404   :  { %4616 = vmatprep.subr.mxu0 %v5000_v0  ;;  %4627 = vmatprep.subr.mxu1 %v5000_v0 }
 0x405   :  { %4617 = vmatpush3.msra.mxu0 %v5767_v14  ;;  %4628 = vmatpush3.msra.mxu1 %v5773_v15 }
 0x406   :  { %4618 = vmatprep.subr.mxu0 %v5000_v0  ;;  %4629 = vmatprep.subr.mxu1 %v5000_v0 }
 0x407   :  { %4619 = vmatpush3.msra.mxu0 %v5781_v16  ;;  %4630 = vmatpush3.msra.mxu1 %v5787_v17 }
 0x408   :  { %4620 = vmatprep.subr.mxu0 %v5000_v0  ;;  %4631 = vmatprep.subr.mxu1 %v5000_v0 }
 0x409   :  { %4621 = vmatpush3.msra.mxu0 %v5795_v18  ;;  %4632 = vmatpush3.msra.mxu1 %v5801_v19 }
 0x40a   :  { %4622 = vmatprep.mubr.msk.f32.mxu0 %vm5001_vm0, %v5000_v0  ;;  %4633 = vmatprep.mubr.msk.f32.mxu1 %vm5001_vm0, %v5000_v0 }
 0x40b   :  { %4636 = vmatprep.subr.mxu0 %v5000_v0  ;;  %4647 = vmatprep.subr.mxu1 %v5000_v0 }
 0x4ae   :  { %v2045_v21 = vpop.f32.mrf.mxu0  ;;  %v2115_v22 = vpop.f32.mrf.mxu1 }
 0x4af   :  { %v2189_v23 = vadd.f32 %v3976_v20, %v2045_v21  ;;  %v2196_v40 = vadd.f32 %v3977_v39, %v2115_v22 }
 0x4b0   :  { %v4558_v24 = vpop.f32.mrf.mxu0  ;;  %v4569_v60 = vpop.f32.mrf.mxu1 }
 0x4b1   :  { %v3982_v38 = vmul.f32 -1.442695, %v2189_v23  ;;  %v3983_v44 = vmul.f32 -1.442695, %v2196_v40  ;;  %v3987_v24 = vld [vmem:[%s6155_s1 + $0x16] sm:$0x3] }
 0x4b3   :  { %4894 = vpow2.f32 %v3982_v38 }
 0x4b4   :  { %4896 = vpow2.f32 %v3983_v44 }
 0x4b6   :  { %v2185_v42 = vpop.f32.mrf.mxu0 }
 0x4b7   :  { %v2186_v27 = vadd.f32 %v5825_v25, %v2185_v42 }
 0x4b8   :  { %v2285_v45 = vpop.f32.mrf.mxu1  ;;  %v4580_v46 = vpop.f32.mrf.mxu0 }
 0x4b9   :  { %v2429_v47 = vadd.f32 %v3985_v43, %v2285_v45 }
 0x4ba   :  { %v4591_v48 = vpop.f32.mrf.mxu1 }
 0x4bb   :  { %v3991_v49 = vmul.f32 -1.442695, %v2429_v47 }
 0x4bd   :  { %4898 = vpow2.f32 %v3991_v49 }
 0x4c0   :  { %v4895_v51 = vpop.eup %4894 }
 0x4c1   :  { %v2193_v52 = vadd.f32 1.0, %v4895_v51  ;;  %v2355_v53 = vpop.f32.mrf.mxu0  ;;  %v2425_v56 = vpop.f32.mrf.mxu1 }
 0x4c2   :  { %v2436_v36 = vadd.f32 %v3986_v50, %v2355_v53  ;;  %v4897_v59 = vpop.eup %4896  ;;  %v2426_v22 = vadd.f32 %v2425_v56, %v5274_v62 }
 0x4c3   :  { %4900 = vrcp.f32 %v2193_v52  ;;  %v4602_v57 = vpop.f32.mrf.mxu0  ;;  %v4613_v54 = vpop.f32.mrf.mxu1  ;;  %v2200_v63 = vadd.f32 1.0, %v4897_v59  ;;  %v4003_v59 = vld [vmem:[%s6155_s1 + $0xc] sm:$0x3] }
 0x4c4   :  { %v3992_v58 = vmul.f32 -1.442695, %v2436_v36  ;;  %v3995_v57 = vld [vmem:[%s6154_s0 + $0x20] sm:$0x3] }
 0x4c6   :  { %4902 = vpow2.f32 %v3992_v58 }
 0x4ca   :  { %v4899_v41 = vpop.eup %4898 }
 0x4cb   :  { %v2433_v61 = vadd.f32 1.0, %v4899_v41 }
 0x4cd   :  { %4904 = vrcp.f32 %v2433_v61 }
 0x4ce   :  { %4906 = vrcp.f32 %v2200_v63 }
 0x4d0   :  { %v4901_v32 = vpop.eup %4900 }
 0x4d1   :  { %v2203_v55 = vmul.f32 %v4901_v32, %v2186_v27 }
 0x4d3   :  { %v2204_v37 = vadd.f32 %v3978_v33, %v2203_v55  ;;  %v4903_v20 = vpop.eup %4902  ;;  %v4004_v55 = vld [vmem:[%s6155_s1 + $0xe] sm:$0x3] }
 0x4d4   :  { %v2440_v21 = vadd.f32 1.0, %v4903_v20 }
 0x4d5   :  { %4908 = vtanh.f32 %v2204_v37 }
 0x4d6   :  { %4910 = vrcp.f32 %v2440_v21 }
 0x4da   :  { %v4905_v23 = vpop.eup %4904 }
 0x4db   :  { %v2443_v60 = vmul.f32 %v4905_v23, %v2426_v22  ;;  %v4907_v39 = vpop.eup %4906 }
 0x4dc   :  { %v2206_v40 = vsub.f32 1.0, %v4907_v39  ;;  %v2208_v44 = vmul.f32 %v4907_v39, %v5603_v26 }
 0x4dd   :  { %v2444_v38 = vadd.f32 %v3987_v24, %v2443_v60 }
 0x4df   :  { %4912 = vtanh.f32 %v2444_v38 }
 0x4e2   :  { %v4909_v42 = vpop.eup %4908 }
 0x4e3   :  { %v2207_v43 = vmul.f32 %v4909_v42, %v2206_v40  ;;  %v4911_v62 = vpop.eup %4910 }
 0x4e4   :  { %v2446_v26 = vsub.f32 1.0, %v4911_v62  ;;  %v2448_v48 = vmul.f32 %v4911_v62, %v5673_v11  ;;  %v3994_v11 = vld [vmem:[%s6154_s0 + $0x1e] sm:$0x3] }
 0x4e5   :  { %v5836_v45 = vadd.f32 %v2208_v44, %v2207_v43 }
 0x4e7   :  { %3984 = vst.msk [vmem:[%s6158_s6 + $0x8] sm:$0x3] %vm293_vm2, %v5836_v45  ;;  %4623 = vmatmul.mubr.msk.f32.vlgmr.msra.gmra.mxu0 %vm58_vm1, %v5836_v45  ;;  %4634 = vmatmul.mubr.msk.f32.vlgmr.msra.gmra.mxu1 %vm58_vm1, %v5836_v45 }
 0x4e8   :  { %4637 = vmatpush3.msra.mxu0 %v5617_v28  ;;  %4648 = vmatpush3.msra.mxu1 %v5623_v29 }
 0x4e9   :  { %4638 = vmatprep.subr.mxu0 %v5000_v0  ;;  %4649 = vmatprep.subr.mxu1 %v5000_v0 }
 0x4ea   :  { %4639 = vmatpush3.msra.mxu0 %v5631_v30  ;;  %4650 = vmatpush3.msra.mxu1 %v5637_v31 }
 0x4eb   :  { %4640 = vmatprep.subr.mxu0 %v5000_v0  ;;  %4651 = vmatprep.subr.mxu1 %v5000_v0 }
 0x4ec   :  { %v4913_v46 = vpop.eup %4912  ;;  %4641 = vmatpush3.msra.mxu0 %v5645_v34  ;;  %4652 = vmatpush3.msra.mxu1 %v5651_v35 }
 0x4ed   :  { %4642 = vmatprep.subr.mxu0 %v5000_v0  ;;  %4653 = vmatprep.subr.mxu1 %v5000_v0  ;;  %v2447_v47 = vmul.f32 %v4913_v46, %v2446_v26  ;;  %v3996_v26 = vld [vmem:[%s6154_s0 + $0x22] sm:$0x3] }
 0x4ee   :  { %4643 = vmatpush3.msra.mxu0 %v5660_v9  ;;  %4644 = vmatprep.mubr.msk.f32.mxu0 %vm5001_vm0, %v5000_v0 }
 0x4ef   :  { %4654 = vmatpush3.msra.mxu1 %v5668_v10  ;;  %4645 = vmatmul.mubr.msk.f32.vlgmr.msra.gmra.mxu0 %vm58_vm1, %v5836_v45  ;;  %v5866_v49 = vadd.f32 %v2448_v48, %v2447_v47 }
 0x4f0   :  { %4655 = vmatprep.mubr.msk.f32.mxu1 %vm5001_vm0, %v5000_v0  ;;  %4658 = vmatprep.subr.mxu0 %v5000_v0 }
 0x4f1   :  { %4669 = vmatprep.subr.mxu1 %v5000_v0  ;;  %3993 = vst.msk [vmem:[%s6159_s7 + $0x6] sm:$0x3] %vm293_vm2, %v5866_v49  ;;  %4656 = vmatmul.mubr.msk.f32.vlgmr.msra.gmra.mxu1 %vm58_vm1, %v5866_v49 }
 0x4f2   :  { %4659 = vmatpush3.msra.mxu0 %v5689_v1  ;;  %4670 = vmatpush3.msra.mxu1 %v5695_v2 }
 0x4f3   :  { %4660 = vmatprep.subr.mxu0 %v5000_v0  ;;  %4671 = vmatprep.subr.mxu1 %v5000_v0 }
 0x4f4   :  { %4661 = vmatpush3.msra.mxu0 %v5703_v3  ;;  %4672 = vmatpush3.msra.mxu1 %v5709_v4 }
 0x4f5   :  { %4662 = vmatprep.subr.mxu0 %v5000_v0  ;;  %4673 = vmatprep.subr.mxu1 %v5000_v0 }
 0x4f6   :  { %4663 = vmatpush3.msra.mxu0 %v5717_v5  ;;  %4674 = vmatpush3.msra.mxu1 %v5723_v6 }
 0x4f7   :  { %4664 = vmatprep.subr.mxu0 %v5000_v0  ;;  %4675 = vmatprep.subr.mxu1 %v5000_v0 }
 0x4f8   :  { %4665 = vmatpush3.msra.mxu0 %v5731_v7  ;;  %4666 = vmatprep.mubr.msk.f32.mxu0 %vm5001_vm0, %v5000_v0 }
 0x4f9   :  { %4676 = vmatpush3.msra.mxu1 %v5739_v8  ;;  %4677 = vmatprep.mubr.msk.f32.mxu1 %vm5001_vm0, %v5000_v0 }
 0x4fa   :  { %4667 = vmatmul.mubr.msk.f32.vlgmr.msra.gmra.mxu0 %vm58_vm1, %v5866_v49  ;;  %4678 = vmatmul.mubr.msk.f32.vlgmr.msra.gmra.mxu1 %vm58_vm1, %v5866_v49 }
 0x4fb   :  { %4680 = vmatprep.subr.mxu0 %v5000_v0  ;;  %4691 = vmatprep.subr.mxu1 %v5000_v0 }
 0x4fc   :  { %4681 = vmatpush3.msra.mxu0 %v5753_v12  ;;  %4692 = vmatpush3.msra.mxu1 %v5759_v13 }
 0x4fd   :  { %4682 = vmatprep.subr.mxu0 %v5000_v0  ;;  %4693 = vmatprep.subr.mxu1 %v5000_v0 }
 0x4fe   :  { %4683 = vmatpush3.msra.mxu0 %v5767_v14  ;;  %4694 = vmatpush3.msra.mxu1 %v5773_v15 }
 0x4ff   :  { %4684 = vmatprep.subr.mxu0 %v5000_v0  ;;  %4695 = vmatprep.subr.mxu1 %v5000_v0 }
 0x500   :  { %4685 = vmatpush3.msra.mxu0 %v5781_v16  ;;  %4696 = vmatpush3.msra.mxu1 %v5787_v17 }
 0x501   :  { %4686 = vmatprep.subr.mxu0 %v5000_v0  ;;  %4697 = vmatprep.subr.mxu1 %v5000_v0 }
 0x502   :  { %4687 = vmatpush3.msra.mxu0 %v5795_v18  ;;  %4698 = vmatpush3.msra.mxu1 %v5801_v19 }
 0x503   :  { %4688 = vmatprep.mubr.msk.f32.mxu0 %vm5001_vm0, %v5000_v0  ;;  %4699 = vmatprep.mubr.msk.f32.mxu1 %vm5001_vm0, %v5000_v0 }
 0x504   :  { %4702 = vmatprep.subr.mxu0 %v5000_v0  ;;  %4713 = vmatprep.subr.mxu1 %v5000_v0 }
 0x5a7   :  { %v2525_v50 = vpop.f32.mrf.mxu0  ;;  %v2595_v51 = vpop.f32.mrf.mxu1 }
 0x5a8   :  { %v2669_v52 = vadd.f32 %v3994_v11, %v2525_v50  ;;  %v2676_v54 = vadd.f32 %v3995_v57, %v2595_v51  ;;  %v5942_v50 = vld [vmem:[%s6157_s5] sm:$0x3] }
 0x5a9   :  { %v4624_v53 = vpop.f32.mrf.mxu0  ;;  %v4635_v56 = vpop.f32.mrf.mxu1 }
 0x5aa   :  { %v4000_v36 = vmul.f32 -1.442695, %v2669_v52  ;;  %v4001_v41 = vmul.f32 -1.442695, %v2676_v54  ;;  %v4005_v53 = vld [vmem:[%s6155_s1 + $0x10] sm:$0x3] }
 0x5ac   :  { %4914 = vpow2.f32 %v4000_v36 }
 0x5ad   :  { %4916 = vpow2.f32 %v4001_v41 }
 0x5af   :  { %v2665_v58 = vpop.f32.mrf.mxu0 }
 0x5b0   :  { %v2666_v44 = vadd.f32 %v5825_v25, %v2665_v58 }
 0x5b1   :  { %v2765_v61 = vpop.f32.mrf.mxu1  ;;  %v4646_v63 = vpop.f32.mrf.mxu0 }
 0x5b2   :  { %v2909_v27 = vadd.f32 %v4003_v59, %v2765_v61 }
 0x5b3   :  { %v4657_v32 = vpop.f32.mrf.mxu1 }
 0x5b4   :  { %v4009_v33 = vmul.f32 -1.442695, %v2909_v27 }
 0x5b6   :  { %4918 = vpow2.f32 %v4009_v33 }
 0x5b9   :  { %v4915_v37 = vpop.eup %4914 }
 0x5ba   :  { %v2673_v20 = vadd.f32 1.0, %v4915_v37  ;;  %v2835_v21 = vpop.f32.mrf.mxu0  ;;  %v2905_v22 = vpop.f32.mrf.mxu1 }
 0x5bb   :  { %v2916_v23 = vadd.f32 %v4004_v55, %v2835_v21  ;;  %v4917_v39 = vpop.eup %4916  ;;  %v2906_v51 = vadd.f32 %v5942_v50, %v2905_v22 }
 0x5bc   :  { %4920 = vrcp.f32 %v2673_v20  ;;  %v4668_v24 = vpop.f32.mrf.mxu0  ;;  %v4679_v60 = vpop.f32.mrf.mxu1  ;;  %v2680_v43 = vadd.f32 1.0, %v4917_v39  ;;  %v4021_v20 = vld [vmem:[%s6155_s1 + $0x6] sm:$0x3]  ;;  %v4022_v39 = vld [vmem:[%s6155_s1 + $0x8] sm:$0x3] }
 0x5bd   :  { %v4010_v38 = vmul.f32 -1.442695, %v2916_v23 }
 0x5bf   :  { %4922 = vpow2.f32 %v4010_v38 }
 0x5c3   :  { %v4919_v40 = vpop.eup %4918 }
 0x5c4   :  { %v2913_v42 = vadd.f32 1.0, %v4919_v40 }
 0x5c6   :  { %4924 = vrcp.f32 %v2913_v42 }
 0x5c7   :  { %4926 = vrcp.f32 %v2680_v43 }
 0x5c9   :  { %v4921_v62 = vpop.eup %4920 }
 0x5ca   :  { %v2683_v46 = vmul.f32 %v4921_v62, %v2666_v44 }
 0x5cc   :  { %v2684_v47 = vadd.f32 %v3996_v26, %v2683_v46  ;;  %v4923_v48 = vpop.eup %4922 }
 0x5cd   :  { %v2920_v11 = vadd.f32 1.0, %v4923_v48 }
 0x5ce   :  { %4928 = vtanh.f32 %v2684_v47 }
 0x5cf   :  { %4930 = vrcp.f32 %v2920_v11 }
 0x5d3   :  { %v4925_v52 = vpop.eup %4924 }
 0x5d4   :  { %v2923_v56 = vmul.f32 %v4925_v52, %v2906_v51  ;;  %v4927_v57 = vpop.eup %4926 }
 0x5d5   :  { %v2686_v54 = vsub.f32 1.0, %v4927_v57  ;;  %v2688_v41 = vmul.f32 %v4927_v57, %v5836_v45 }
 0x5d6   :  { %v2924_v36 = vadd.f32 %v4005_v53, %v2923_v56 }
 0x5d8   :  { %4932 = vtanh.f32 %v2924_v36  ;;  %v4014_v36 = vld [vmem:[%s6154_s0 + $0x28] sm:$0x3] }
 0x5db   :  { %v4929_v58 = vpop.eup %4928 }
 0x5dc   :  { %v2687_v59 = vmul.f32 %v4929_v58, %v2686_v54  ;;  %v4931_v63 = vpop.eup %4930 }
 0x5dd   :  { %v2926_v45 = vsub.f32 1.0, %v4931_v63  ;;  %v2928_v33 = vmul.f32 %v4931_v63, %v5866_v49 }
 0x5de   :  { %v5949_v61 = vadd.f32 %v2688_v41, %v2687_v59 }
 0x5e0   :  { %4002 = vst.msk [vmem:[%s6158_s6 + $0xa] sm:$0x3] %vm293_vm2, %v5949_v61  ;;  %4689 = vmatmul.mubr.msk.f32.vlgmr.msra.gmra.mxu0 %vm58_vm1, %v5949_v61  ;;  %4700 = vmatmul.mubr.msk.f32.vlgmr.msra.gmra.mxu1 %vm58_vm1, %v5949_v61 }
 0x5e1   :  { %4703 = vmatpush3.msra.mxu0 %v5617_v28  ;;  %4714 = vmatpush3.msra.mxu1 %v5623_v29 }
 0x5e2   :  { %4704 = vmatprep.subr.mxu0 %v5000_v0  ;;  %4715 = vmatprep.subr.mxu1 %v5000_v0 }
 0x5e3   :  { %4705 = vmatpush3.msra.mxu0 %v5631_v30  ;;  %4716 = vmatpush3.msra.mxu1 %v5637_v31 }
 0x5e4   :  { %4706 = vmatprep.subr.mxu0 %v5000_v0  ;;  %4717 = vmatprep.subr.mxu1 %v5000_v0 }
 0x5e5   :  { %v4933_v27 = vpop.eup %4932  ;;  %4707 = vmatpush3.msra.mxu0 %v5645_v34  ;;  %4718 = vmatpush3.msra.mxu1 %v5651_v35 }
 0x5e6   :  { %4708 = vmatprep.subr.mxu0 %v5000_v0  ;;  %4719 = vmatprep.subr.mxu1 %v5000_v0  ;;  %v2927_v32 = vmul.f32 %v4933_v27, %v2926_v45  ;;  %v4023_v45 = vld [vmem:[%s6155_s1 + $0xa] sm:$0x3] }
 0x5e7   :  { %4709 = vmatpush3.msra.mxu0 %v5660_v9  ;;  %4710 = vmatprep.mubr.msk.f32.mxu0 %vm5001_vm0, %v5000_v0 }
 0x5e8   :  { %4720 = vmatpush3.msra.mxu1 %v5668_v10  ;;  %4711 = vmatmul.mubr.msk.f32.vlgmr.msra.gmra.mxu0 %vm58_vm1, %v5949_v61  ;;  %v5979_v55 = vadd.f32 %v2928_v33, %v2927_v32 }
 0x5e9   :  { %4721 = vmatprep.mubr.msk.f32.mxu1 %vm5001_vm0, %v5000_v0  ;;  %4724 = vmatprep.subr.mxu0 %v5000_v0 }
 0x5ea   :  { %4735 = vmatprep.subr.mxu1 %v5000_v0  ;;  %4011 = vst.msk [vmem:[%s6159_s7 + $0x4] sm:$0x3] %vm293_vm2, %v5979_v55  ;;  %4722 = vmatmul.mubr.msk.f32.vlgmr.msra.gmra.mxu1 %vm58_vm1, %v5979_v55 }
 0x5eb   :  { %4725 = vmatpush3.msra.mxu0 %v5689_v1  ;;  %4736 = vmatpush3.msra.mxu1 %v5695_v2 }
 0x5ec   :  { %4726 = vmatprep.subr.mxu0 %v5000_v0  ;;  %4737 = vmatprep.subr.mxu1 %v5000_v0 }
 0x5ed   :  { %4727 = vmatpush3.msra.mxu0 %v5703_v3  ;;  %4738 = vmatpush3.msra.mxu1 %v5709_v4 }
 0x5ee   :  { %4728 = vmatprep.subr.mxu0 %v5000_v0  ;;  %4739 = vmatprep.subr.mxu1 %v5000_v0 }
 0x5ef   :  { %4729 = vmatpush3.msra.mxu0 %v5717_v5  ;;  %4740 = vmatpush3.msra.mxu1 %v5723_v6 }
 0x5f0   :  { %4730 = vmatprep.subr.mxu0 %v5000_v0  ;;  %4741 = vmatprep.subr.mxu1 %v5000_v0 }
 0x5f1   :  { %4731 = vmatpush3.msra.mxu0 %v5731_v7  ;;  %4732 = vmatprep.mubr.msk.f32.mxu0 %vm5001_vm0, %v5000_v0 }
 0x5f2   :  { %4742 = vmatpush3.msra.mxu1 %v5739_v8  ;;  %4743 = vmatprep.mubr.msk.f32.mxu1 %vm5001_vm0, %v5000_v0 }
 0x5f3   :  { %4733 = vmatmul.mubr.msk.f32.vlgmr.msra.gmra.mxu0 %vm58_vm1, %v5979_v55  ;;  %4744 = vmatmul.mubr.msk.f32.vlgmr.msra.gmra.mxu1 %vm58_vm1, %v5979_v55 }
 0x5f4   :  { %4746 = vmatprep.subr.mxu0 %v5000_v0  ;;  %4757 = vmatprep.subr.mxu1 %v5000_v0 }
 0x5f5   :  { %4747 = vmatpush3.msra.mxu0 %v5753_v12  ;;  %4758 = vmatpush3.msra.mxu1 %v5759_v13  ;;  %v4012_v12 = vld [vmem:[%s6154_s0 + $0x24] sm:$0x3] }
 0x5f6   :  { %4748 = vmatprep.subr.mxu0 %v5000_v0  ;;  %4759 = vmatprep.subr.mxu1 %v5000_v0 }
 0x5f7   :  { %4749 = vmatpush3.msra.mxu0 %v5767_v14  ;;  %4760 = vmatpush3.msra.mxu1 %v5773_v15 }
 0x5f8   :  { %4750 = vmatprep.subr.mxu0 %v5000_v0  ;;  %4761 = vmatprep.subr.mxu1 %v5000_v0 }
 0x5f9   :  { %4751 = vmatpush3.msra.mxu0 %v5781_v16  ;;  %4762 = vmatpush3.msra.mxu1 %v5787_v17 }
 0x5fa   :  { %4752 = vmatprep.subr.mxu0 %v5000_v0  ;;  %4763 = vmatprep.subr.mxu1 %v5000_v0 }
 0x5fb   :  { %4753 = vmatpush3.msra.mxu0 %v5795_v18  ;;  %4764 = vmatpush3.msra.mxu1 %v5801_v19  ;;  %v4013_v19 = vld [vmem:[%s6154_s0 + $0x26] sm:$0x3] }
 0x5fc   :  { %4754 = vmatprep.mubr.msk.f32.mxu0 %vm5001_vm0, %v5000_v0  ;;  %4765 = vmatprep.mubr.msk.f32.mxu1 %vm5001_vm0, %v5000_v0 }
 0x5fd   :  { %4768 = vmatprep.subr.mxu0 %v5000_v0  ;;  %4779 = vmatprep.subr.mxu1 %v5000_v0 }
 0x6a0   :  { %v3005_v13 = vpop.f32.mrf.mxu0  ;;  %v3075_v14 = vpop.f32.mrf.mxu1 }
 0x6a1   :  { %v3149_v15 = vadd.f32 %v4012_v12, %v3005_v13  ;;  %v3156_v49 = vadd.f32 %v4013_v19, %v3075_v14 }
 0x6a2   :  { %v4690_v16 = vpop.f32.mrf.mxu0  ;;  %v4701_v17 = vpop.f32.mrf.mxu1 }
 0x6a3   :  { %v4018_v18 = vmul.f32 -1.442695, %v3149_v15  ;;  %v4019_v21 = vmul.f32 -1.442695, %v3156_v49 }
 0x6a5   :  { %4934 = vpow2.f32 %v4018_v18 }
 0x6a6   :  { %4936 = vpow2.f32 %v4019_v21 }
 0x6a8   :  { %v3145_v37 = vpop.f32.mrf.mxu0 }
 0x6a9   :  { %v3146_v53 = vadd.f32 %v5825_v25, %v3145_v37  ;;  %v3653_v37 = vld [vmem:[%s6155_s1 + $0x2] sm:$0x3] }
 0x6aa   :  { %v3245_v22 = vpop.f32.mrf.mxu1  ;;  %v4712_v23 = vpop.f32.mrf.mxu0 }
 0x6ab   :  { %v3389_v24 = vadd.f32 %v4021_v20, %v3245_v22 }
 0x6ac   :  { %v4723_v60 = vpop.f32.mrf.mxu1 }
 0x6ad   :  { %v4027_v38 = vmul.f32 -1.442695, %v3389_v24 }
 0x6af   :  { %4938 = vpow2.f32 %v4027_v38 }
 0x6b2   :  { %v4935_v40 = vpop.eup %4934 }
 0x6b3   :  { %v3153_v42 = vadd.f32 1.0, %v4935_v40  ;;  %v3315_v43 = vpop.f32.mrf.mxu0  ;;  %v3385_v44 = vpop.f32.mrf.mxu1 }
 0x6b4   :  { %v3396_v62 = vadd.f32 %v4022_v39, %v3315_v43  ;;  %v4937_v48 = vpop.eup %4936  ;;  %v3386_v41 = vadd.f32 %v5942_v50, %v3385_v44 }
 0x6b5   :  { %4940 = vrcp.f32 %v3153_v42  ;;  %v4734_v26 = vpop.f32.mrf.mxu0  ;;  %v4745_v46 = vpop.f32.mrf.mxu1  ;;  %v3160_v52 = vadd.f32 1.0, %v4937_v48 }
 0x6b6   :  { %v4028_v47 = vmul.f32 -1.442695, %v3396_v62  ;;  %v4032_v46 = vld [vmem:[%s6154_s0 + $0x2e] sm:$0x3] }
 0x6b8   :  { %4942 = vpow2.f32 %v4028_v47 }
 0x6bc   :  { %v4939_v11 = vpop.eup %4938 }
 0x6bd   :  { %v3393_v51 = vadd.f32 1.0, %v4939_v11 }
 0x6bf   :  { %4944 = vrcp.f32 %v3393_v51 }
 0x6c0   :  { %4946 = vrcp.f32 %v3160_v52 }
 0x6c2   :  { %v4941_v56 = vpop.eup %4940 }
 0x6c3   :  { %v3163_v57 = vmul.f32 %v4941_v56, %v3146_v53  ;;  %v3654_v56 = vld [vmem:[%s6155_s1 + $0x4] sm:$0x3] }
 0x6c5   :  { %v3164_v54 = vadd.f32 %v4014_v36, %v3163_v57  ;;  %v4943_v58 = vpop.eup %4942 }
 0x6c6   :  { %v3400_v59 = vadd.f32 1.0, %v4943_v58 }
 0x6c7   :  { %4948 = vtanh.f32 %v3164_v54 }
 0x6c8   :  { %4950 = vrcp.f32 %v3400_v59 }
 0x6cc   :  { %v4945_v63 = vpop.eup %4944 }
 0x6cd   :  { %v3403_v27 = vmul.f32 %v4945_v63, %v3386_v41  ;;  %v4947_v33 = vpop.eup %4946 }
 0x6ce   :  { %v3166_v12 = vsub.f32 1.0, %v4947_v33  ;;  %v3168_v15 = vmul.f32 %v4947_v33, %v5949_v61 }
 0x6cf   :  { %v3404_v32 = vadd.f32 %v4023_v45, %v3403_v27 }
 0x6d1   :  { %4952 = vtanh.f32 %v3404_v32 }
 0x6d4   :  { %v4949_v13 = vpop.eup %4948 }
 0x6d5   :  { %v3167_v14 = vmul.f32 %v4949_v13, %v3166_v12  ;;  %v4951_v17 = vpop.eup %4950 }
 0x6d6   :  { %v3406_v61 = vsub.f32 1.0, %v4951_v17 }
 0x6d7   :  { %v6057_v16 = vadd.f32 %v3168_v15, %v3167_v14 }
 0x6d9   :  { %4020 = vst.msk [vmem:[%s6158_s6 + $0xc] sm:$0x3] %vm293_vm2, %v6057_v16  ;;  %4755 = vmatmul.mubr.msk.f32.vlgmr.msra.gmra.mxu0 %vm58_vm1, %v6057_v16  ;;  %4766 = vmatmul.mubr.msk.f32.vlgmr.msra.gmra.mxu1 %vm58_vm1, %v6057_v16 }
 0x6da   :  { %4769 = vmatpush3.msra.mxu0 %v5617_v28  ;;  %4780 = vmatpush3.msra.mxu1 %v5623_v29  ;;  %v3408_v29 = vmul.f32 %v4951_v17, %v5979_v55 }
 0x6db   :  { %4770 = vmatprep.subr.mxu0 %v5000_v0  ;;  %4781 = vmatprep.subr.mxu1 %v5000_v0 }
 0x6dc   :  { %4771 = vmatpush3.msra.mxu0 %v5631_v30  ;;  %4782 = vmatpush3.msra.mxu1 %v5637_v31  ;;  %v4030_v31 = vld [vmem:[%s6154_s0 + $0x2a] sm:$0x3] }
 0x6dd   :  { %4772 = vmatprep.subr.mxu0 %v5000_v0  ;;  %4783 = vmatprep.subr.mxu1 %v5000_v0 }
 0x6de   :  { %v4953_v18 = vpop.eup %4952  ;;  %4773 = vmatpush3.msra.mxu0 %v5645_v34  ;;  %4784 = vmatpush3.msra.mxu1 %v5651_v35 }
 0x6df   :  { %4774 = vmatprep.subr.mxu0 %v5000_v0  ;;  %4785 = vmatprep.subr.mxu1 %v5000_v0  ;;  %v3407_v28 = vmul.f32 %v4953_v18, %v3406_v61 }
 0x6e0   :  { %4775 = vmatpush3.msra.mxu0 %v5660_v9  ;;  %4776 = vmatprep.mubr.msk.f32.mxu0 %vm5001_vm0, %v5000_v0 }
 0x6e1   :  { %4786 = vmatpush3.msra.mxu1 %v5668_v10  ;;  %4777 = vmatmul.mubr.msk.f32.vlgmr.msra.gmra.mxu0 %vm58_vm1, %v6057_v16  ;;  %v6087_v30 = vadd.f32 %v3408_v29, %v3407_v28 }
 0x6e2   :  { %4787 = vmatprep.mubr.msk.f32.mxu1 %vm5001_vm0, %v5000_v0  ;;  %4790 = vmatprep.subr.mxu0 %v5000_v0 }
 0x6e3   :  { %4801 = vmatprep.subr.mxu1 %v5000_v0  ;;  %4029 = vst.msk [vmem:[%s6159_s7 + $0x2] sm:$0x3] %vm293_vm2, %v6087_v30  ;;  %4788 = vmatmul.mubr.msk.f32.vlgmr.msra.gmra.mxu1 %vm58_vm1, %v6087_v30 }
 0x6e4   :  { %4791 = vmatpush3.msra.mxu0 %v5689_v1  ;;  %4802 = vmatpush3.msra.mxu1 %v5695_v2 }
 0x6e5   :  { %4792 = vmatprep.subr.mxu0 %v5000_v0  ;;  %4803 = vmatprep.subr.mxu1 %v5000_v0 }
 0x6e6   :  { %4793 = vmatpush3.msra.mxu0 %v5703_v3  ;;  %4804 = vmatpush3.msra.mxu1 %v5709_v4 }
 0x6e7   :  { %4794 = vmatprep.subr.mxu0 %v5000_v0  ;;  %4805 = vmatprep.subr.mxu1 %v5000_v0 }
 0x6e8   :  { %4795 = vmatpush3.msra.mxu0 %v5717_v5  ;;  %4806 = vmatpush3.msra.mxu1 %v5723_v6  ;;  %v3652_v5 = vld [vmem:[%s6155_s1] sm:$0x3] }
 0x6e9   :  { %4796 = vmatprep.subr.mxu0 %v5000_v0  ;;  %4807 = vmatprep.subr.mxu1 %v5000_v0 }
 0x6ea   :  { %4797 = vmatpush3.msra.mxu0 %v5731_v7  ;;  %4798 = vmatprep.mubr.msk.f32.mxu0 %vm5001_vm0, %v5000_v0 }
 0x6eb   :  { %4808 = vmatpush3.msra.mxu1 %v5739_v8  ;;  %4809 = vmatprep.mubr.msk.f32.mxu1 %vm5001_vm0, %v5000_v0  ;;  %v4031_v0 = vld [vmem:[%s6154_s0 + $0x2c] sm:$0x3] }
 0x6ec   :  { %4799 = vmatmul.mubr.msk.f32.vlgmr.msra.gmra.mxu0 %vm58_vm1, %v6087_v30  ;;  %4810 = vmatmul.mubr.msk.f32.vlgmr.msra.gmra.mxu1 %vm58_vm1, %v6087_v30 }
 0x799   :  { %v3485_v34 = vpop.f32.mrf.mxu0  ;;  %v3555_v35 = vpop.f32.mrf.mxu1 }
 0x79a   :  { %v3629_v9 = vadd.f32 %v4030_v31, %v3485_v34  ;;  %v3636_v3 = vadd.f32 %v4031_v0, %v3555_v35 }
 0x79b   :  { %v4756_v10 = vpop.f32.mrf.mxu0  ;;  %v4767_v1 = vpop.f32.mrf.mxu1 }
 0x79c   :  { %v4036_v2 = vmul.f32 -1.442695, %v3629_v9  ;;  %v4037_v6 = vmul.f32 -1.442695, %v3636_v3 }
 0x79e   :  { %4954 = vpow2.f32 %v4036_v2 }
 0x79f   :  { %4956 = vpow2.f32 %v4037_v6 }
 0x7a1   :  { %v3625_v4 = vpop.f32.mrf.mxu0 }
 0x7a2   :  { %v3626_v62 = vadd.f32 %v5825_v25, %v3625_v4 }
 0x7a3   :  { %v3724_v7 = vpop.f32.mrf.mxu1  ;;  %v4778_v8 = vpop.f32.mrf.mxu0 }
 0x7a4   :  { %v3868_v55 = vadd.f32 %v3724_v7, %v3652_v5 }
 0x7a5   :  { %v4789_v19 = vpop.f32.mrf.mxu1 }
 0x7a6   :  { %v4042_v49 = vmul.f32 -1.442695, %v3868_v55 }
 0x7a8   :  { %4958 = vpow2.f32 %v4042_v49 }
 0x7ab   :  { %v4955_v20 = vpop.eup %4954 }
 0x7ac   :  { %v3633_v21 = vadd.f32 1.0, %v4955_v20  ;;  %v3794_v22 = vpop.f32.mrf.mxu0  ;;  %v3864_v23 = vpop.f32.mrf.mxu1 }
 0x7ad   :  { %v3875_v24 = vadd.f32 %v3794_v22, %v3653_v37  ;;  %v4957_v40 = vpop.eup %4956  ;;  %v3865_v52 = vadd.f32 %v5942_v50, %v3864_v23 }
 0x7ae   :  { %4960 = vrcp.f32 %v3633_v21  ;;  %v4800_v60 = vpop.f32.mrf.mxu0  ;;  %v4811_v38 = vpop.f32.mrf.mxu1  ;;  %v3640_v44 = vadd.f32 1.0, %v4957_v40 }
 0x7af   :  { %v4043_v39 = vmul.f32 -1.442695, %v3875_v24 }
 0x7b1   :  { %4962 = vpow2.f32 %v4043_v39 }
 0x7b5   :  { %v4959_v42 = vpop.eup %4958 }
 0x7b6   :  { %v3872_v43 = vadd.f32 1.0, %v4959_v42 }
 0x7b8   :  { %4964 = vrcp.f32 %v3872_v43 }
 0x7b9   :  { %4966 = vrcp.f32 %v3640_v44 }
 0x7bb   :  { %v4961_v26 = vpop.eup %4960 }
 0x7bc   :  { %v3643_v47 = vmul.f32 %v4961_v26, %v3626_v62 }
 0x7be   :  { %v3644_v48 = vadd.f32 %v4032_v46, %v3643_v47  ;;  %v4963_v11 = vpop.eup %4962 }
 0x7bf   :  { %v3879_v51 = vadd.f32 1.0, %v4963_v11 }
 0x7c0   :  { %4968 = vtanh.f32 %v3644_v48 }
 0x7c1   :  { %4970 = vrcp.f32 %v3879_v51 }
 0x7c5   :  { %v4965_v53 = vpop.eup %4964 }
 0x7c6   :  { %v3882_v25 = vmul.f32 %v4965_v53, %v3865_v52  ;;  %v4967_v57 = vpop.eup %4966 }
 0x7c7   :  { %v3646_v54 = vsub.f32 1.0, %v4967_v57  ;;  %v3648_v59 = vmul.f32 %v4967_v57, %v6057_v16 }
 0x7c8   :  { %v3883_v36 = vadd.f32 %v3882_v25, %v3654_v56 }
 0x7ca   :  { %4972 = vtanh.f32 %v3883_v36 }
 0x7cd   :  { %v4969_v58 = vpop.eup %4968 }
 0x7ce   :  { %v3647_v41 = vmul.f32 %v4969_v58, %v3646_v54  ;;  %v4971_v50 = vpop.eup %4970 }
 0x7cf   :  { %v3885_v45 = vsub.f32 1.0, %v4971_v50  ;;  %v3887_v32 = vmul.f32 %v4971_v50, %v6087_v30 }
 0x7d0   :  { %v3649_v63 = vadd.f32 %v3648_v59, %v3647_v41 }
 0x7d2   :  { %4038 = vst.msk [vmem:[%s6158_s6 + $0xe] sm:$0x3] %vm293_vm2, %v3649_v63 }
 0x7d7   :  { %v4973_v27 = vpop.eup %4972 }
 0x7d8   :  { %v3886_v33 = vmul.f32 %v4973_v27, %v3885_v45 }
 0x7da   :  { %v3888_v12 = vadd.f32 %v3887_v32, %v3886_v33 }
 0x7dc   :  { %3889 = vst.msk [vmem:[%s6159_s7] sm:$0x3] %vm293_vm2, %v3888_v12 }

</bundles_post_ra>
